<compile_context>
chip_gen: v6e
topology: v6e:2x2x1
jax: 0.10.0
libtpu: 0.0.40
codegen_flags: <defaults>
</compile_context>

<pallas_src>
import jax
import jax.numpy as jnp
from jax.experimental import pallas as pl
from jax.experimental.pallas import tpu as pltpu


# --- tuning knobs -----------------------------------------------------------
_SMALL_N_THRESHOLD = 1 << 20        # elements; below this, plain XLA wins (launch overhead)
_MAX_LANE_WIDTH = 2048              # widest lane-dense last dim we search for
_TARGET_BLOCK_BYTES = 4 << 20       # ~4 MiB per block: good on v5e / v6e / v7x
_VMEM_LIMIT_BYTES = 48 << 20        # headroom for 2x(in+out) 4 MiB double buffers everywhere


def _mul_zero_kernel(v_ref, o_ref):
    # Elementwise hot path: out = V * 0.0.
    # Keep the multiply so NaN/Inf/-0.0 propagate exactly like torch.mul(0.0).
    o_ref[...] = v_ref[...] * jnp.zeros((), dtype=v_ref.dtype)


def _pick_lane_width(n):
    """Largest multiple of 128 (<= _MAX_LANE_WIDTH) that divides n, else None."""
    if n <= 0 or n % 128 != 0:
        return None
    w = min(_MAX_LANE_WIDTH, n)
    w -= w % 128
    while w >= 128:
        if n % w == 0:
            return w
        w -= 128
    return None


def _mul_zero(x, force_pallas=False):
    """Elementwise x * 0.0 via a lane-dense, row-tiled Pallas kernel.

    Small or lane-misaligned tensors take a plain-XLA fast path: the op is
    purely HBM-bandwidth bound, and for small inputs the kernel launch +
    per-step overhead (and any pad/slice passes) would dominate.
    """
    n = x.size
    width = _pick_lane_width(n)
    if (not force_pallas and n < _SMALL_N_THRESHOLD) or width is None:
        # Same IEEE semantics as the kernel (NaN -> NaN, -x -> -0.0).
        return x * jnp.zeros((), dtype=x.dtype)

    rows = n // width
    x2d = x.reshape(rows, width)
    itemsize = jnp.dtype(x.dtype).itemsize

    # Dtype-aware block size targeting ~4 MiB per block; row count multiple of 8.
    tile_rows = max(8, (_TARGET_BLOCK_BYTES // (width * itemsize)) // 8 * 8)
    # Guarantee >= 2 grid steps when possible so both v7x TensorCores get work.
    if rows >= 16:
        half = -(-rows // 2)           # ceil(rows / 2)
        half = -(-half // 8) * 8       # round up to a multiple of 8
        tile_rows = min(tile_rows, half)
    if tile_rows >= rows:
        tile_rows = rows               # full-extent block is always legal

    grid = (pl.cdiv(rows, tile_rows),)

    cost = pl.CostEstimate(
        flops=n,                               # one mul per element
        transcendentals=0,
        bytes_accessed=2 * n * itemsize,       # read V + write out
    )

    out2d = pl.pallas_call(
        _mul_zero_kernel,
        out_shape=jax.ShapeDtypeStruct((rows, width), x.dtype),
        grid_spec=pl.GridSpec(
            grid=grid,
            in_specs=[pl.BlockSpec((tile_rows, width), lambda i: (i, 0))],
            out_specs=pl.BlockSpec((tile_rows, width), lambda i: (i, 0)),
        ),
        compiler_params=pltpu.CompilerParams(
            dimension_semantics=("parallel",),
            vmem_limit_bytes=_VMEM_LIMIT_BYTES,
        ),
        cost_estimate=cost,
    )(x2d)

    return out2d.reshape(x.shape)


def e_package_forward(inputs):
    """Pallas implementation of E_Package.forward for the zero ('E_None') op.

    Args:
      inputs: tuple (G, V, E); only the feature tensor V is used by the op.
    Returns:
      V * 0.0 with the same shape and dtype as V (seq is None for this op).
    """
    _, V, _ = inputs
    return _mul_zero(V)


if __name__ == "__main__":
    key = jax.random.PRNGKey(0)
    kg, kv, ke, kbig = jax.random.split(key, 4)

    # Small synthetic graph-style inputs: batch=2, nodes=8, hidden=32.
    # (This size takes the plain-XLA fast path, as recommended by the review.)
    B, N, H = 2, 8, 32
    G = jax.random.normal(kg, (B, N, N), dtype=jnp.float32)      # graph/adjacency
    V = jax.random.normal(kv, (B, N, H), dtype=jnp.float32)      # node features
    E = jax.random.normal(ke, (B, N, N, H), dtype=jnp.float32)   # edge features

    out_small = jax.block_until_ready(e_package_forward((G, V, E)))
    assert out_small.shape == V.shape and out_small.dtype == V.dtype
    assert bool(jnp.all(out_small == 0.0))

    # Larger V that exercises the Pallas kernel itself (forced so the test is
    # deterministic regardless of the small-tensor threshold): 8 MiB fp32,
    # lane width 2048, two ~4 MiB row tiles on a 2-step "parallel" grid.
    V_big = jax.random.normal(kbig, (16, 512, 256), dtype=jnp.float32)
    out_big = jax.block_until_ready(_mul_zero(V_big, force_pallas=True))
    assert out_big.shape == V_big.shape and out_big.dtype == V_big.dtype
    assert bool(jnp.all(out_big == 0.0))

    print("KERNEL_OK")
</pallas_src>

<mosaic_0001>
module attributes {stable_mosaic.version = 11 : i64} {
  func.func @_mul_zero_kernel(%arg0: i32, %arg1: memref<512x2048xf32, #tpu.memory_space<vmem>>, %arg2: memref<512x2048xf32, #tpu.memory_space<vmem>>) attributes {dimension_semantics = [#tpu.dimension_semantics<parallel>], iteration_bounds = array<i64: 2>, scalar_prefetch = 0 : i64, scratch_operands = 0 : i64, tpu.core_type = #tpu.core_type<tc>, window_params = [{transform_indices = @transform_0, window_bounds = array<i64: 512, 2048>}, {transform_indices = @transform_1, window_bounds = array<i64: 512, 2048>}]} {
    %c0 = arith.constant 0 : index
    %c0_0 = arith.constant 0 : index
    %0 = vector.load %arg1[%c0, %c0_0] : memref<512x2048xf32, #tpu.memory_space<vmem>>, vector<512x2048xf32>
    %cst = arith.constant 0.000000e+00 : f32
    %1 = vector.broadcast %cst : f32 to vector<512x2048xf32>
    %2 = arith.mulf %0, %1 : vector<512x2048xf32>
    %c0_1 = arith.constant 0 : index
    %c0_2 = arith.constant 0 : index
    %3 = vector.load %arg2[%c0_1, %c0_2] : memref<512x2048xf32, #tpu.memory_space<vmem>>, vector<512x2048xf32>
    tpu.vector_store %arg2[%c0_1, %c0_2], %2 {strides = array<i32>} : memref<512x2048xf32, #tpu.memory_space<vmem>>, vector<512x2048xf32>,
    return
  }
  func.func @transform_0(%arg0: i32) -> (i32, i32) {
    %c0_i32 = arith.constant 0 : i32
    %c0_i32_0 = arith.constant 0 : i32
    return %arg0, %c0_i32 : i32, i32
  }
  func.func @transform_1(%arg0: i32) -> (i32, i32) {
    %c0_i32 = arith.constant 0 : i32
    %c0_i32_0 = arith.constant 0 : i32
    return %arg0, %c0_i32 : i32, i32
  }
}

</mosaic_0001>

<bundles_post_ra>
// kernel: tpu_custom_call.1
= control target key start
LH: loop header
LB: loop body
LE: loop exit
PB: predicated region body
PF: predicated region fallthrough
CT: control target
= control target key end

     0   :  { %6 = vsyncpa [#allocation3], 0  ;;  %s5685_s0 = inlined_call_operand.hbm [shape: f32[1024,2048], index: 0, kind: input, shape index: {}]   ;;  %s5686_s1 = inlined_call_operand.hbm [shape: f32[1024,2048], index: 1, kind: output, shape index: {}]  }
   0x1   :  { %8 = vsyncpa [#allocation3 + $0x1], 0 }
   0x2   :  { %9 = vsyncpa [#allocation4], 0 }
   0x3   :  { %11 = vsyncpa [#allocation4 + $0x1], 0  ;;  %s3478_s6 = smov 0   ;;  %s3480_s7 = smov 0  }
   0x4   :  { %s3482_s8 = smov 0   ;;  %s3484_s9 = smov 0  }
   0x5 LB: > { %s3499_s10 = sadd.s32 4294967295, %s3460_s9   ;;  %s3298_s11 = sadd.s32 4294967294, %s3460_s9   ;;  %s3460_s9 = sphi %s3484_s9, %s5701_s9   ;;  %s3456_s8 = sphi %s3482_s8, %s5700_s8   ;;  %s3452_s7 = sphi %s3480_s7, %s5699_s7   ;;  %s3448_s6 = sphi %s3478_s6, %s5698_s6  }
   0x6   : > { %s3503_s12 = sadd.s32 1, %s3460_s9   ;;  %s24_s13 = sadd.s32 1, %s3456_s8 }
   0x7   : > { %s21_s14 = ssub.s32 %s3460_s9, %s3503_s12  ;;  %p31_p0 = scmp.ne.s32.totalorder %s3456_s8, %s3452_s7 }
   0x8   : > { %p22_p1 = scmp.eq.s32.totalorder %s21_s14, 0  ;;  %p32_p2 = scmp.eq.s32.totalorder %s3460_s9, 0 }
   0x9   : > { %p37_p3 = scmp.ne.s32.totalorder %s3452_s7, %s3448_s6  ;;  %p38_p4 = scmp.eq.s32.totalorder %s3499_s10, 0 }
   0xa   : > { %s3515_s15 = scalar_select %p22_p1, %s3456_s8, %s24_s13  }
   0xb   : > { %p3517_p5 = por %p32_p2, %p31_p0  ;;  %p3521_p6 = por %p38_p4, %p37_p3 }
   0xc   : > { %p61_p7 = scmp.eq.s32.totalorder %s3499_s10, 1  ;;  %p67_p8 = scmp.eq.s32.totalorder %s3298_s11, 1 }
   0xd   : > { %s5690_s17 = scalar_select %p3521_p6, 1, 0 }
   0xe   : > { %p3330_p10 = scmp.lt.s32.totalorder %s3460_s9, 2  ;;  %p3528_p11 = por %p61_p7, %p31_p0 }
   0xf   : > { %p3532_p12 = por %p67_p8, %p37_p3  ;;  %s87_s20 = sand.u32 1, %s3456_s8  }
  0x10   : > { %s5691_s18 = scalar_select %p3528_p11, 1, 0 }
  0x11   : > { %s5692_s19 = scalar_select %p3532_p12, 1, 0 }
  0x12   : > { %s3315_s21 = sshll.u32 %s3460_s9, 17  ;;  %s3301_s22 = sshll.u32 %s87_s20, 13 }
  0x13   : > { %s3541_s25 = scalar_lea.hbm %s5685_s0, %s3315_s21  ;;  %s91_s26 = scalar_lea.vmem [#allocation2], %s3301_s22 }
  0x14   : > { %s99_s27 = sshll.u32 %s91_s26, 4  ;;  %p3545_p13 = pnand %p3330_p10, %p3517_p5  ;;  %s3549_s27 = int_to_ptr.vmem [resolvable:$true] %s99_s27 }
  0x15   : > { %s3551_s29 = scalar_lea.sflag [#allocation3], %s87_s20  ;;  %s3368_s30 = scalar_lea.hbm %s3541_s25, 131072 }
  0x16   : > { %p3369_p0 = scmp.ne.s32.totalorder %s3541_s25, %s3368_s30  ;;  %p3370_p1 = pneg %p3545_p13 }
  0x17   : > { %s3373_s4 = scalar_lea.hbm %s5685_s0, 262144  ;;  %p3374_p4 = scmp.lt.s32.totalorder %s3541_s25, %s5685_s0 }
  0x18   : > { %p3371_p2 = pnand %p3370_p1, %p3369_p0  ;;  %p3375_p5 = scmp.lt.s32.totalorder %s3373_s4, %s3368_s30 }
  0x1a   : > { %p3372_p3 = pneg %p3371_p2  ;;  %p3376_p7 = por %p3375_p5, %p3374_p4 }
  0x1c   : > { %p3377_p8 = pnand %p3376_p7, %p3372_p3 }
  0x1e   : > { %3380 = shalt.err (!%p3377_p8)
}
  0x1f   : > { %s3381_s13 = scalar_lea.vmem %s3549_s27, 131072  ;;  %s3462_s14 = smov [#allocation2]  }
  0x20   : > { %p3382_p10 = scmp.ne.s32.totalorder %s3549_s27, %s3381_s13  ;;  %s3386_s16 = sshll.u32 %s3462_s14, 4  ;;  %s3387_s16 = int_to_ptr.vmem [resolvable:$false] %s3386_s16 }
  0x21   : > { %s3388_s20 = scalar_lea.vmem %s3387_s16, 262144  ;;  %p3389_p2 = scmp.lt.s32.totalorder %s3549_s27, %s3387_s16 }
  0x22   : > { %p3384_p9 = pnand %p3382_p10, %p3370_p1  ;;  %p3390_p12 = scmp.lt.s32.totalorder %s3388_s20, %s3381_s13 }
  0x24   : > { %p3385_p0 = pneg %p3384_p9  ;;  %p3391_p11 = por %p3390_p12, %p3389_p2 }
  0x26   : > { %p3392_p6 = pnand %p3391_p11, %p3385_p0 }
  0x28   : > { %3395 = shalt.err (!%p3392_p6)
}
  0x29   : > { %s3463_s21 = smov 2048   ;;  %s3464_s22 = smov 128  }
  0x2a   : > { %3325 = dma.hbm_to_vmem [thread:$0]  (!%p3545_p13), %s3541_s25, 131072, %s3549_s27, %s3551_s29, %s3463_s21, %s3463_s21, %s3464_s22  }
  0x2b   : > { %p3305_p9 = scmp.ge.s32.totalorder %s3460_s9, 1  ;;  %p107_p1 = scmp.lt.s32.totalorder %s3460_s9, 3 }
  0x2d   : > { %p108_p3 = pnand %p3305_p9, %p107_p1 }
  0x2e   : > { %s3575_s23 = sand.u32 (!%p108_p3), 1, %s3452_s7   ;;  %p5694_p6 = scmp.ne.s32.totalorder (!%p108_p3), %s5690_s17, 0 }
  0x2f   : > { %111 = sbr.rel (%p108_p3) target bundleno = 588 (0x24c), region = 24  ;;  %s3306_s24 = sshll.u32 (!%p108_p3), %s3575_s23, 13 }
  0x30   : > { %s114_s26 = scalar_lea.sflag (!%p108_p3), [#allocation3], %s3575_s23  ;;  %s3579_s30 = scalar_lea.vmem (!%p108_p3), [#allocation2], %s3306_s24 }
  0x34   : > { %3439 = dma.done.wait (%p5694_p6), %s114_s26, 131072  }
  0x35   : > { %3441 = vsyncadd (%p5694_p6), %s114_s26, 4294836224  ;;  %v138_v0 = vld [vmem:[%s3579_s30] sm:$0xff]  ;;  %v139_v1 = vld [vmem:[%s3579_s30 + $0x8] sm:$0xff]  ;;  %s3594_s17 = scalar_lea.vmem [#allocation5], %s3306_s24  ;;  %s3317_s25 = sshll.u32 %s3499_s10, 17 }
  0x36   : > { %v140_v2 = vld [vmem:[%s3579_s30 + $0x10] sm:$0xff]  ;;  %v1162_v3 = vmul.f32 0.0, %v138_v0  ;;  %v1163_v4 = vmul.f32 0.0, %v139_v1  ;;  %v141_v6 = vld [vmem:[%s3579_s30 + $0x18] sm:$0xff]  ;;  %v142_v7 = vld [vmem:[%s3579_s30 + $0x20] sm:$0xff]  ;;  %s5635_s29 = scalar_lea.hbm %s5686_s1, %s3317_s25  ;;  %s3225_s2 = sshll.u32 %s3594_s17, 4  ;;  %s5641_s2 = int_to_ptr.vmem [resolvable:$true] %s3225_s2 }
  0x37   : > { %v1164_v5 = vmul.f32 0.0, %v140_v2  ;;  %v143_v8 = vld [vmem:[%s3579_s30 + $0x28] sm:$0xff]  ;;  %v1165_v9 = vmul.f32 0.0, %v141_v6  ;;  %v1166_v10 = vmul.f32 0.0, %v142_v7  ;;  %v144_v12 = vld [vmem:[%s3579_s30 + $0x30] sm:$0xff]  ;;  %v145_v13 = vld [vmem:[%s3579_s30 + $0x38] sm:$0xff] }
  0x38   : > { %v1167_v11 = vmul.f32 0.0, %v143_v8  ;;  %v146_v14 = vld [vmem:[%s3579_s30 + $0x40] sm:$0xff]  ;;  %2186 = vst [vmem:[%s3594_s17] sm:$0xff] %v1162_v3  ;;  %2187 = vst [vmem:[%s3594_s17 + $0x8] sm:$0xff] %v1163_v4  ;;  %v1168_v15 = vmul.f32 0.0, %v144_v12  ;;  %v1169_v16 = vmul.f32 0.0, %v145_v13  ;;  %v147_v18 = vld [vmem:[%s3579_s30 + $0x48] sm:$0xff] }
  0x39   : > { %2188 = vst [vmem:[%s3594_s17 + $0x10] sm:$0xff] %v1164_v5  ;;  %v1170_v17 = vmul.f32 0.0, %v146_v14  ;;  %v148_v19 = vld [vmem:[%s3579_s30 + $0x50] sm:$0xff]  ;;  %v149_v20 = vld [vmem:[%s3579_s30 + $0x58] sm:$0xff]  ;;  %2189 = vst [vmem:[%s3594_s17 + $0x18] sm:$0xff] %v1165_v9  ;;  %v1171_v21 = vmul.f32 0.0, %v147_v18 }
  0x3a   : > { %2190 = vst [vmem:[%s3594_s17 + $0x20] sm:$0xff] %v1166_v10  ;;  %2191 = vst [vmem:[%s3594_s17 + $0x28] sm:$0xff] %v1167_v11  ;;  %v1172_v22 = vmul.f32 0.0, %v148_v19  ;;  %v1173_v23 = vmul.f32 0.0, %v149_v20  ;;  %v150_v24 = vld [vmem:[%s3579_s30 + $0x60] sm:$0xff]  ;;  %v151_v25 = vld [vmem:[%s3579_s30 + $0x68] sm:$0xff] }
  0x3b   : > { %v152_v26 = vld [vmem:[%s3579_s30 + $0x70] sm:$0xff]  ;;  %2192 = vst [vmem:[%s3594_s17 + $0x30] sm:$0xff] %v1168_v15  ;;  %2193 = vst [vmem:[%s3594_s17 + $0x38] sm:$0xff] %v1169_v16  ;;  %v1174_v27 = vmul.f32 0.0, %v150_v24  ;;  %v1175_v28 = vmul.f32 0.0, %v151_v25  ;;  %v153_v30 = vld [vmem:[%s3579_s30 + $0x78] sm:$0xff] }
  0x3c   : > { %2194 = vst [vmem:[%s3594_s17 + $0x40] sm:$0xff] %v1170_v17  ;;  %v1176_v29 = vmul.f32 0.0, %v152_v26  ;;  %v154_v31 = vld [vmem:[%s3579_s30 + $0x80] sm:$0xff]  ;;  %v155_v32 = vld [vmem:[%s3579_s30 + $0x88] sm:$0xff]  ;;  %2195 = vst [vmem:[%s3594_s17 + $0x48] sm:$0xff] %v1171_v21  ;;  %v1177_v33 = vmul.f32 0.0, %v153_v30 }
  0x3d   : > { %2196 = vst [vmem:[%s3594_s17 + $0x50] sm:$0xff] %v1172_v22  ;;  %2197 = vst [vmem:[%s3594_s17 + $0x58] sm:$0xff] %v1173_v23  ;;  %v1178_v34 = vmul.f32 0.0, %v154_v31  ;;  %v1179_v35 = vmul.f32 0.0, %v155_v32  ;;  %v156_v36 = vld [vmem:[%s3579_s30 + $0x90] sm:$0xff]  ;;  %v157_v37 = vld [vmem:[%s3579_s30 + $0x98] sm:$0xff] }
  0x3e   : > { %v158_v38 = vld [vmem:[%s3579_s30 + $0xa0] sm:$0xff]  ;;  %2198 = vst [vmem:[%s3594_s17 + $0x60] sm:$0xff] %v1174_v27  ;;  %2199 = vst [vmem:[%s3594_s17 + $0x68] sm:$0xff] %v1175_v28  ;;  %v1180_v39 = vmul.f32 0.0, %v156_v36  ;;  %v1181_v40 = vmul.f32 0.0, %v157_v37  ;;  %v159_v42 = vld [vmem:[%s3579_s30 + $0xa8] sm:$0xff] }
  0x3f   : > { %2200 = vst [vmem:[%s3594_s17 + $0x70] sm:$0xff] %v1176_v29  ;;  %v1182_v41 = vmul.f32 0.0, %v158_v38  ;;  %v160_v43 = vld [vmem:[%s3579_s30 + $0xb0] sm:$0xff]  ;;  %v161_v44 = vld [vmem:[%s3579_s30 + $0xb8] sm:$0xff]  ;;  %2201 = vst [vmem:[%s3594_s17 + $0x78] sm:$0xff] %v1177_v33  ;;  %v1183_v45 = vmul.f32 0.0, %v159_v42 }
  0x40   : > { %2202 = vst [vmem:[%s3594_s17 + $0x80] sm:$0xff] %v1178_v34  ;;  %2203 = vst [vmem:[%s3594_s17 + $0x88] sm:$0xff] %v1179_v35  ;;  %v1184_v46 = vmul.f32 0.0, %v160_v43  ;;  %v1185_v47 = vmul.f32 0.0, %v161_v44  ;;  %v162_v48 = vld [vmem:[%s3579_s30 + $0xc0] sm:$0xff]  ;;  %v163_v49 = vld [vmem:[%s3579_s30 + $0xc8] sm:$0xff] }
  0x41   : > { %v164_v50 = vld [vmem:[%s3579_s30 + $0xd0] sm:$0xff]  ;;  %2204 = vst [vmem:[%s3594_s17 + $0x90] sm:$0xff] %v1180_v39  ;;  %2205 = vst [vmem:[%s3594_s17 + $0x98] sm:$0xff] %v1181_v40  ;;  %v1186_v51 = vmul.f32 0.0, %v162_v48  ;;  %v1187_v52 = vmul.f32 0.0, %v163_v49  ;;  %v165_v54 = vld [vmem:[%s3579_s30 + $0xd8] sm:$0xff] }
  0x42   : > { %2206 = vst [vmem:[%s3594_s17 + $0xa0] sm:$0xff] %v1182_v41  ;;  %v1188_v53 = vmul.f32 0.0, %v164_v50  ;;  %v166_v55 = vld [vmem:[%s3579_s30 + $0xe0] sm:$0xff]  ;;  %v167_v56 = vld [vmem:[%s3579_s30 + $0xe8] sm:$0xff]  ;;  %2207 = vst [vmem:[%s3594_s17 + $0xa8] sm:$0xff] %v1183_v45  ;;  %v1189_v57 = vmul.f32 0.0, %v165_v54 }
  0x43   : > { %2208 = vst [vmem:[%s3594_s17 + $0xb0] sm:$0xff] %v1184_v46  ;;  %2209 = vst [vmem:[%s3594_s17 + $0xb8] sm:$0xff] %v1185_v47  ;;  %v1190_v58 = vmul.f32 0.0, %v166_v55  ;;  %v1191_v59 = vmul.f32 0.0, %v167_v56  ;;  %v168_v60 = vld [vmem:[%s3579_s30 + $0xf0] sm:$0xff]  ;;  %v169_v61 = vld [vmem:[%s3579_s30 + $0xf8] sm:$0xff] }
  0x44   : > { %v170_v62 = vld [vmem:[%s3579_s30 + $0x100] sm:$0xff]  ;;  %2210 = vst [vmem:[%s3594_s17 + $0xc0] sm:$0xff] %v1186_v51  ;;  %2211 = vst [vmem:[%s3594_s17 + $0xc8] sm:$0xff] %v1187_v52  ;;  %v1192_v63 = vmul.f32 0.0, %v168_v60  ;;  %v1193_v0 = vmul.f32 0.0, %v169_v61  ;;  %v171_v2 = vld [vmem:[%s3579_s30 + $0x108] sm:$0xff] }
  0x45   : > { %2212 = vst [vmem:[%s3594_s17 + $0xd0] sm:$0xff] %v1188_v53  ;;  %v1194_v1 = vmul.f32 0.0, %v170_v62  ;;  %v172_v3 = vld [vmem:[%s3579_s30 + $0x110] sm:$0xff]  ;;  %v173_v4 = vld [vmem:[%s3579_s30 + $0x118] sm:$0xff]  ;;  %2213 = vst [vmem:[%s3594_s17 + $0xd8] sm:$0xff] %v1189_v57  ;;  %v1195_v5 = vmul.f32 0.0, %v171_v2 }
  0x46   : > { %2214 = vst [vmem:[%s3594_s17 + $0xe0] sm:$0xff] %v1190_v58  ;;  %2215 = vst [vmem:[%s3594_s17 + $0xe8] sm:$0xff] %v1191_v59  ;;  %v1196_v6 = vmul.f32 0.0, %v172_v3  ;;  %v1197_v7 = vmul.f32 0.0, %v173_v4  ;;  %v174_v8 = vld [vmem:[%s3579_s30 + $0x120] sm:$0xff]  ;;  %v175_v9 = vld [vmem:[%s3579_s30 + $0x128] sm:$0xff] }
  0x47   : > { %v176_v10 = vld [vmem:[%s3579_s30 + $0x130] sm:$0xff]  ;;  %2216 = vst [vmem:[%s3594_s17 + $0xf0] sm:$0xff] %v1192_v63  ;;  %2217 = vst [vmem:[%s3594_s17 + $0xf8] sm:$0xff] %v1193_v0  ;;  %v1198_v11 = vmul.f32 0.0, %v174_v8  ;;  %v1199_v12 = vmul.f32 0.0, %v175_v9  ;;  %v177_v14 = vld [vmem:[%s3579_s30 + $0x138] sm:$0xff] }
  0x48   : > { %2218 = vst [vmem:[%s3594_s17 + $0x100] sm:$0xff] %v1194_v1  ;;  %v1200_v13 = vmul.f32 0.0, %v176_v10  ;;  %v178_v15 = vld [vmem:[%s3579_s30 + $0x140] sm:$0xff]  ;;  %v179_v16 = vld [vmem:[%s3579_s30 + $0x148] sm:$0xff]  ;;  %2219 = vst [vmem:[%s3594_s17 + $0x108] sm:$0xff] %v1195_v5  ;;  %v1201_v17 = vmul.f32 0.0, %v177_v14 }
  0x49   : > { %2220 = vst [vmem:[%s3594_s17 + $0x110] sm:$0xff] %v1196_v6  ;;  %2221 = vst [vmem:[%s3594_s17 + $0x118] sm:$0xff] %v1197_v7  ;;  %v1202_v18 = vmul.f32 0.0, %v178_v15  ;;  %v1203_v19 = vmul.f32 0.0, %v179_v16  ;;  %v180_v20 = vld [vmem:[%s3579_s30 + $0x150] sm:$0xff]  ;;  %v181_v21 = vld [vmem:[%s3579_s30 + $0x158] sm:$0xff] }
  0x4a   : > { %v182_v22 = vld [vmem:[%s3579_s30 + $0x160] sm:$0xff]  ;;  %2222 = vst [vmem:[%s3594_s17 + $0x120] sm:$0xff] %v1198_v11  ;;  %2223 = vst [vmem:[%s3594_s17 + $0x128] sm:$0xff] %v1199_v12  ;;  %v1204_v23 = vmul.f32 0.0, %v180_v20  ;;  %v1205_v24 = vmul.f32 0.0, %v181_v21  ;;  %v183_v26 = vld [vmem:[%s3579_s30 + $0x168] sm:$0xff] }
  0x4b   : > { %2224 = vst [vmem:[%s3594_s17 + $0x130] sm:$0xff] %v1200_v13  ;;  %v1206_v25 = vmul.f32 0.0, %v182_v22  ;;  %v184_v27 = vld [vmem:[%s3579_s30 + $0x170] sm:$0xff]  ;;  %v185_v28 = vld [vmem:[%s3579_s30 + $0x178] sm:$0xff]  ;;  %2225 = vst [vmem:[%s3594_s17 + $0x138] sm:$0xff] %v1201_v17  ;;  %v1207_v29 = vmul.f32 0.0, %v183_v26 }
  0x4c   : > { %2226 = vst [vmem:[%s3594_s17 + $0x140] sm:$0xff] %v1202_v18  ;;  %2227 = vst [vmem:[%s3594_s17 + $0x148] sm:$0xff] %v1203_v19  ;;  %v1208_v30 = vmul.f32 0.0, %v184_v27  ;;  %v1209_v31 = vmul.f32 0.0, %v185_v28  ;;  %v186_v32 = vld [vmem:[%s3579_s30 + $0x180] sm:$0xff]  ;;  %v187_v33 = vld [vmem:[%s3579_s30 + $0x188] sm:$0xff] }
  0x4d   : > { %v188_v34 = vld [vmem:[%s3579_s30 + $0x190] sm:$0xff]  ;;  %2228 = vst [vmem:[%s3594_s17 + $0x150] sm:$0xff] %v1204_v23  ;;  %2229 = vst [vmem:[%s3594_s17 + $0x158] sm:$0xff] %v1205_v24  ;;  %v1210_v35 = vmul.f32 0.0, %v186_v32  ;;  %v1211_v36 = vmul.f32 0.0, %v187_v33  ;;  %v189_v38 = vld [vmem:[%s3579_s30 + $0x198] sm:$0xff] }
  0x4e   : > { %2230 = vst [vmem:[%s3594_s17 + $0x160] sm:$0xff] %v1206_v25  ;;  %v1212_v37 = vmul.f32 0.0, %v188_v34  ;;  %v190_v39 = vld [vmem:[%s3579_s30 + $0x1a0] sm:$0xff]  ;;  %v191_v40 = vld [vmem:[%s3579_s30 + $0x1a8] sm:$0xff]  ;;  %2231 = vst [vmem:[%s3594_s17 + $0x168] sm:$0xff] %v1207_v29  ;;  %v1213_v41 = vmul.f32 0.0, %v189_v38 }
  0x4f   : > { %2232 = vst [vmem:[%s3594_s17 + $0x170] sm:$0xff] %v1208_v30  ;;  %2233 = vst [vmem:[%s3594_s17 + $0x178] sm:$0xff] %v1209_v31  ;;  %v1214_v42 = vmul.f32 0.0, %v190_v39  ;;  %v1215_v43 = vmul.f32 0.0, %v191_v40  ;;  %v192_v44 = vld [vmem:[%s3579_s30 + $0x1b0] sm:$0xff]  ;;  %v193_v45 = vld [vmem:[%s3579_s30 + $0x1b8] sm:$0xff] }
  0x50   : > { %v194_v46 = vld [vmem:[%s3579_s30 + $0x1c0] sm:$0xff]  ;;  %2234 = vst [vmem:[%s3594_s17 + $0x180] sm:$0xff] %v1210_v35  ;;  %2235 = vst [vmem:[%s3594_s17 + $0x188] sm:$0xff] %v1211_v36  ;;  %v1216_v47 = vmul.f32 0.0, %v192_v44  ;;  %v1217_v48 = vmul.f32 0.0, %v193_v45  ;;  %v195_v50 = vld [vmem:[%s3579_s30 + $0x1c8] sm:$0xff] }
  0x51   : > { %2236 = vst [vmem:[%s3594_s17 + $0x190] sm:$0xff] %v1212_v37  ;;  %v1218_v49 = vmul.f32 0.0, %v194_v46  ;;  %v196_v51 = vld [vmem:[%s3579_s30 + $0x1d0] sm:$0xff]  ;;  %v197_v52 = vld [vmem:[%s3579_s30 + $0x1d8] sm:$0xff]  ;;  %2237 = vst [vmem:[%s3594_s17 + $0x198] sm:$0xff] %v1213_v41  ;;  %v1219_v53 = vmul.f32 0.0, %v195_v50 }
  0x52   : > { %2238 = vst [vmem:[%s3594_s17 + $0x1a0] sm:$0xff] %v1214_v42  ;;  %2239 = vst [vmem:[%s3594_s17 + $0x1a8] sm:$0xff] %v1215_v43  ;;  %v1220_v54 = vmul.f32 0.0, %v196_v51  ;;  %v1221_v55 = vmul.f32 0.0, %v197_v52  ;;  %v198_v56 = vld [vmem:[%s3579_s30 + $0x1e0] sm:$0xff]  ;;  %v199_v57 = vld [vmem:[%s3579_s30 + $0x1e8] sm:$0xff] }
  0x53   : > { %v200_v58 = vld [vmem:[%s3579_s30 + $0x1f0] sm:$0xff]  ;;  %2240 = vst [vmem:[%s3594_s17 + $0x1b0] sm:$0xff] %v1216_v47  ;;  %2241 = vst [vmem:[%s3594_s17 + $0x1b8] sm:$0xff] %v1217_v48  ;;  %v1222_v59 = vmul.f32 0.0, %v198_v56  ;;  %v1223_v60 = vmul.f32 0.0, %v199_v57  ;;  %v201_v62 = vld [vmem:[%s3579_s30 + $0x1f8] sm:$0xff] }
  0x54   : > { %2242 = vst [vmem:[%s3594_s17 + $0x1c0] sm:$0xff] %v1218_v49  ;;  %v1224_v61 = vmul.f32 0.0, %v200_v58  ;;  %v202_v63 = vld [vmem:[%s3579_s30 + $0x200] sm:$0xff]  ;;  %v203_v0 = vld [vmem:[%s3579_s30 + $0x208] sm:$0xff]  ;;  %2243 = vst [vmem:[%s3594_s17 + $0x1c8] sm:$0xff] %v1219_v53  ;;  %v1225_v1 = vmul.f32 0.0, %v201_v62 }
  0x55   : > { %2244 = vst [vmem:[%s3594_s17 + $0x1d0] sm:$0xff] %v1220_v54  ;;  %2245 = vst [vmem:[%s3594_s17 + $0x1d8] sm:$0xff] %v1221_v55  ;;  %v1226_v2 = vmul.f32 0.0, %v202_v63  ;;  %v1227_v3 = vmul.f32 0.0, %v203_v0  ;;  %v204_v4 = vld [vmem:[%s3579_s30 + $0x210] sm:$0xff]  ;;  %v205_v5 = vld [vmem:[%s3579_s30 + $0x218] sm:$0xff] }
  0x56   : > { %v206_v6 = vld [vmem:[%s3579_s30 + $0x220] sm:$0xff]  ;;  %2246 = vst [vmem:[%s3594_s17 + $0x1e0] sm:$0xff] %v1222_v59  ;;  %2247 = vst [vmem:[%s3594_s17 + $0x1e8] sm:$0xff] %v1223_v60  ;;  %v1228_v7 = vmul.f32 0.0, %v204_v4  ;;  %v1229_v8 = vmul.f32 0.0, %v205_v5  ;;  %v207_v10 = vld [vmem:[%s3579_s30 + $0x228] sm:$0xff] }
  0x57   : > { %2248 = vst [vmem:[%s3594_s17 + $0x1f0] sm:$0xff] %v1224_v61  ;;  %v1230_v9 = vmul.f32 0.0, %v206_v6  ;;  %v208_v11 = vld [vmem:[%s3579_s30 + $0x230] sm:$0xff]  ;;  %v209_v12 = vld [vmem:[%s3579_s30 + $0x238] sm:$0xff]  ;;  %2249 = vst [vmem:[%s3594_s17 + $0x1f8] sm:$0xff] %v1225_v1  ;;  %v1231_v13 = vmul.f32 0.0, %v207_v10 }
  0x58   : > { %2250 = vst [vmem:[%s3594_s17 + $0x200] sm:$0xff] %v1226_v2  ;;  %2251 = vst [vmem:[%s3594_s17 + $0x208] sm:$0xff] %v1227_v3  ;;  %v1232_v14 = vmul.f32 0.0, %v208_v11  ;;  %v1233_v15 = vmul.f32 0.0, %v209_v12  ;;  %v210_v16 = vld [vmem:[%s3579_s30 + $0x240] sm:$0xff]  ;;  %v211_v17 = vld [vmem:[%s3579_s30 + $0x248] sm:$0xff] }
  0x59   : > { %v212_v18 = vld [vmem:[%s3579_s30 + $0x250] sm:$0xff]  ;;  %2252 = vst [vmem:[%s3594_s17 + $0x210] sm:$0xff] %v1228_v7  ;;  %2253 = vst [vmem:[%s3594_s17 + $0x218] sm:$0xff] %v1229_v8  ;;  %v1234_v19 = vmul.f32 0.0, %v210_v16  ;;  %v1235_v20 = vmul.f32 0.0, %v211_v17  ;;  %v213_v22 = vld [vmem:[%s3579_s30 + $0x258] sm:$0xff] }
  0x5a   : > { %2254 = vst [vmem:[%s3594_s17 + $0x220] sm:$0xff] %v1230_v9  ;;  %v1236_v21 = vmul.f32 0.0, %v212_v18  ;;  %v214_v23 = vld [vmem:[%s3579_s30 + $0x260] sm:$0xff]  ;;  %v215_v24 = vld [vmem:[%s3579_s30 + $0x268] sm:$0xff]  ;;  %2255 = vst [vmem:[%s3594_s17 + $0x228] sm:$0xff] %v1231_v13  ;;  %v1237_v25 = vmul.f32 0.0, %v213_v22 }
  0x5b   : > { %2256 = vst [vmem:[%s3594_s17 + $0x230] sm:$0xff] %v1232_v14  ;;  %2257 = vst [vmem:[%s3594_s17 + $0x238] sm:$0xff] %v1233_v15  ;;  %v1238_v26 = vmul.f32 0.0, %v214_v23  ;;  %v1239_v27 = vmul.f32 0.0, %v215_v24  ;;  %v216_v28 = vld [vmem:[%s3579_s30 + $0x270] sm:$0xff]  ;;  %v217_v29 = vld [vmem:[%s3579_s30 + $0x278] sm:$0xff] }
  0x5c   : > { %v218_v30 = vld [vmem:[%s3579_s30 + $0x280] sm:$0xff]  ;;  %2258 = vst [vmem:[%s3594_s17 + $0x240] sm:$0xff] %v1234_v19  ;;  %2259 = vst [vmem:[%s3594_s17 + $0x248] sm:$0xff] %v1235_v20  ;;  %v1240_v31 = vmul.f32 0.0, %v216_v28  ;;  %v1241_v32 = vmul.f32 0.0, %v217_v29  ;;  %v219_v34 = vld [vmem:[%s3579_s30 + $0x288] sm:$0xff] }
  0x5d   : > { %2260 = vst [vmem:[%s3594_s17 + $0x250] sm:$0xff] %v1236_v21  ;;  %v1242_v33 = vmul.f32 0.0, %v218_v30  ;;  %v220_v35 = vld [vmem:[%s3579_s30 + $0x290] sm:$0xff]  ;;  %v221_v36 = vld [vmem:[%s3579_s30 + $0x298] sm:$0xff]  ;;  %2261 = vst [vmem:[%s3594_s17 + $0x258] sm:$0xff] %v1237_v25  ;;  %v1243_v37 = vmul.f32 0.0, %v219_v34 }
  0x5e   : > { %2262 = vst [vmem:[%s3594_s17 + $0x260] sm:$0xff] %v1238_v26  ;;  %2263 = vst [vmem:[%s3594_s17 + $0x268] sm:$0xff] %v1239_v27  ;;  %v1244_v38 = vmul.f32 0.0, %v220_v35  ;;  %v1245_v39 = vmul.f32 0.0, %v221_v36  ;;  %v222_v40 = vld [vmem:[%s3579_s30 + $0x2a0] sm:$0xff]  ;;  %v223_v41 = vld [vmem:[%s3579_s30 + $0x2a8] sm:$0xff] }
  0x5f   : > { %v224_v42 = vld [vmem:[%s3579_s30 + $0x2b0] sm:$0xff]  ;;  %2264 = vst [vmem:[%s3594_s17 + $0x270] sm:$0xff] %v1240_v31  ;;  %2265 = vst [vmem:[%s3594_s17 + $0x278] sm:$0xff] %v1241_v32  ;;  %v1246_v43 = vmul.f32 0.0, %v222_v40  ;;  %v1247_v44 = vmul.f32 0.0, %v223_v41  ;;  %v225_v46 = vld [vmem:[%s3579_s30 + $0x2b8] sm:$0xff] }
  0x60   : > { %2266 = vst [vmem:[%s3594_s17 + $0x280] sm:$0xff] %v1242_v33  ;;  %v1248_v45 = vmul.f32 0.0, %v224_v42  ;;  %v226_v47 = vld [vmem:[%s3579_s30 + $0x2c0] sm:$0xff]  ;;  %v227_v48 = vld [vmem:[%s3579_s30 + $0x2c8] sm:$0xff]  ;;  %2267 = vst [vmem:[%s3594_s17 + $0x288] sm:$0xff] %v1243_v37  ;;  %v1249_v49 = vmul.f32 0.0, %v225_v46 }
  0x61   : > { %2268 = vst [vmem:[%s3594_s17 + $0x290] sm:$0xff] %v1244_v38  ;;  %2269 = vst [vmem:[%s3594_s17 + $0x298] sm:$0xff] %v1245_v39  ;;  %v1250_v50 = vmul.f32 0.0, %v226_v47  ;;  %v1251_v51 = vmul.f32 0.0, %v227_v48  ;;  %v228_v52 = vld [vmem:[%s3579_s30 + $0x2d0] sm:$0xff]  ;;  %v229_v53 = vld [vmem:[%s3579_s30 + $0x2d8] sm:$0xff] }
  0x62   : > { %v230_v54 = vld [vmem:[%s3579_s30 + $0x2e0] sm:$0xff]  ;;  %2270 = vst [vmem:[%s3594_s17 + $0x2a0] sm:$0xff] %v1246_v43  ;;  %2271 = vst [vmem:[%s3594_s17 + $0x2a8] sm:$0xff] %v1247_v44  ;;  %v1252_v55 = vmul.f32 0.0, %v228_v52  ;;  %v1253_v56 = vmul.f32 0.0, %v229_v53  ;;  %v231_v58 = vld [vmem:[%s3579_s30 + $0x2e8] sm:$0xff] }
  0x63   : > { %2272 = vst [vmem:[%s3594_s17 + $0x2b0] sm:$0xff] %v1248_v45  ;;  %v1254_v57 = vmul.f32 0.0, %v230_v54  ;;  %v232_v59 = vld [vmem:[%s3579_s30 + $0x2f0] sm:$0xff]  ;;  %v233_v60 = vld [vmem:[%s3579_s30 + $0x2f8] sm:$0xff]  ;;  %2273 = vst [vmem:[%s3594_s17 + $0x2b8] sm:$0xff] %v1249_v49  ;;  %v1255_v61 = vmul.f32 0.0, %v231_v58 }
  0x64   : > { %2274 = vst [vmem:[%s3594_s17 + $0x2c0] sm:$0xff] %v1250_v50  ;;  %2275 = vst [vmem:[%s3594_s17 + $0x2c8] sm:$0xff] %v1251_v51  ;;  %v1256_v62 = vmul.f32 0.0, %v232_v59  ;;  %v1257_v63 = vmul.f32 0.0, %v233_v60  ;;  %v234_v0 = vld [vmem:[%s3579_s30 + $0x300] sm:$0xff]  ;;  %v235_v1 = vld [vmem:[%s3579_s30 + $0x308] sm:$0xff] }
  0x65   : > { %v236_v2 = vld [vmem:[%s3579_s30 + $0x310] sm:$0xff]  ;;  %2276 = vst [vmem:[%s3594_s17 + $0x2d0] sm:$0xff] %v1252_v55  ;;  %2277 = vst [vmem:[%s3594_s17 + $0x2d8] sm:$0xff] %v1253_v56  ;;  %v1258_v3 = vmul.f32 0.0, %v234_v0  ;;  %v1259_v4 = vmul.f32 0.0, %v235_v1  ;;  %v237_v6 = vld [vmem:[%s3579_s30 + $0x318] sm:$0xff] }
  0x66   : > { %2278 = vst [vmem:[%s3594_s17 + $0x2e0] sm:$0xff] %v1254_v57  ;;  %v1260_v5 = vmul.f32 0.0, %v236_v2  ;;  %v238_v7 = vld [vmem:[%s3579_s30 + $0x320] sm:$0xff]  ;;  %v239_v8 = vld [vmem:[%s3579_s30 + $0x328] sm:$0xff]  ;;  %2279 = vst [vmem:[%s3594_s17 + $0x2e8] sm:$0xff] %v1255_v61  ;;  %v1261_v9 = vmul.f32 0.0, %v237_v6 }
  0x67   : > { %2280 = vst [vmem:[%s3594_s17 + $0x2f0] sm:$0xff] %v1256_v62  ;;  %2281 = vst [vmem:[%s3594_s17 + $0x2f8] sm:$0xff] %v1257_v63  ;;  %v1262_v10 = vmul.f32 0.0, %v238_v7  ;;  %v1263_v11 = vmul.f32 0.0, %v239_v8  ;;  %v240_v12 = vld [vmem:[%s3579_s30 + $0x330] sm:$0xff]  ;;  %v241_v13 = vld [vmem:[%s3579_s30 + $0x338] sm:$0xff] }
  0x68   : > { %v242_v14 = vld [vmem:[%s3579_s30 + $0x340] sm:$0xff]  ;;  %2282 = vst [vmem:[%s3594_s17 + $0x300] sm:$0xff] %v1258_v3  ;;  %2283 = vst [vmem:[%s3594_s17 + $0x308] sm:$0xff] %v1259_v4  ;;  %v1264_v15 = vmul.f32 0.0, %v240_v12  ;;  %v1265_v16 = vmul.f32 0.0, %v241_v13  ;;  %v243_v18 = vld [vmem:[%s3579_s30 + $0x348] sm:$0xff] }
  0x69   : > { %2284 = vst [vmem:[%s3594_s17 + $0x310] sm:$0xff] %v1260_v5  ;;  %v1266_v17 = vmul.f32 0.0, %v242_v14  ;;  %v244_v19 = vld [vmem:[%s3579_s30 + $0x350] sm:$0xff]  ;;  %v245_v20 = vld [vmem:[%s3579_s30 + $0x358] sm:$0xff]  ;;  %2285 = vst [vmem:[%s3594_s17 + $0x318] sm:$0xff] %v1261_v9  ;;  %v1267_v21 = vmul.f32 0.0, %v243_v18 }
  0x6a   : > { %2286 = vst [vmem:[%s3594_s17 + $0x320] sm:$0xff] %v1262_v10  ;;  %2287 = vst [vmem:[%s3594_s17 + $0x328] sm:$0xff] %v1263_v11  ;;  %v1268_v22 = vmul.f32 0.0, %v244_v19  ;;  %v1269_v23 = vmul.f32 0.0, %v245_v20  ;;  %v246_v24 = vld [vmem:[%s3579_s30 + $0x360] sm:$0xff]  ;;  %v247_v25 = vld [vmem:[%s3579_s30 + $0x368] sm:$0xff] }
  0x6b   : > { %v248_v26 = vld [vmem:[%s3579_s30 + $0x370] sm:$0xff]  ;;  %2288 = vst [vmem:[%s3594_s17 + $0x330] sm:$0xff] %v1264_v15  ;;  %2289 = vst [vmem:[%s3594_s17 + $0x338] sm:$0xff] %v1265_v16  ;;  %v1270_v27 = vmul.f32 0.0, %v246_v24  ;;  %v1271_v28 = vmul.f32 0.0, %v247_v25  ;;  %v249_v30 = vld [vmem:[%s3579_s30 + $0x378] sm:$0xff] }
  0x6c   : > { %2290 = vst [vmem:[%s3594_s17 + $0x340] sm:$0xff] %v1266_v17  ;;  %v1272_v29 = vmul.f32 0.0, %v248_v26  ;;  %v250_v31 = vld [vmem:[%s3579_s30 + $0x380] sm:$0xff]  ;;  %v251_v32 = vld [vmem:[%s3579_s30 + $0x388] sm:$0xff]  ;;  %2291 = vst [vmem:[%s3594_s17 + $0x348] sm:$0xff] %v1267_v21  ;;  %v1273_v33 = vmul.f32 0.0, %v249_v30 }
  0x6d   : > { %2292 = vst [vmem:[%s3594_s17 + $0x350] sm:$0xff] %v1268_v22  ;;  %2293 = vst [vmem:[%s3594_s17 + $0x358] sm:$0xff] %v1269_v23  ;;  %v1274_v34 = vmul.f32 0.0, %v250_v31  ;;  %v1275_v35 = vmul.f32 0.0, %v251_v32  ;;  %v252_v36 = vld [vmem:[%s3579_s30 + $0x390] sm:$0xff]  ;;  %v253_v37 = vld [vmem:[%s3579_s30 + $0x398] sm:$0xff] }
  0x6e   : > { %v254_v38 = vld [vmem:[%s3579_s30 + $0x3a0] sm:$0xff]  ;;  %2294 = vst [vmem:[%s3594_s17 + $0x360] sm:$0xff] %v1270_v27  ;;  %2295 = vst [vmem:[%s3594_s17 + $0x368] sm:$0xff] %v1271_v28  ;;  %v1276_v39 = vmul.f32 0.0, %v252_v36  ;;  %v1277_v40 = vmul.f32 0.0, %v253_v37  ;;  %v255_v42 = vld [vmem:[%s3579_s30 + $0x3a8] sm:$0xff] }
  0x6f   : > { %2296 = vst [vmem:[%s3594_s17 + $0x370] sm:$0xff] %v1272_v29  ;;  %v1278_v41 = vmul.f32 0.0, %v254_v38  ;;  %v256_v43 = vld [vmem:[%s3579_s30 + $0x3b0] sm:$0xff]  ;;  %v257_v44 = vld [vmem:[%s3579_s30 + $0x3b8] sm:$0xff]  ;;  %2297 = vst [vmem:[%s3594_s17 + $0x378] sm:$0xff] %v1273_v33  ;;  %v1279_v45 = vmul.f32 0.0, %v255_v42 }
  0x70   : > { %2298 = vst [vmem:[%s3594_s17 + $0x380] sm:$0xff] %v1274_v34  ;;  %2299 = vst [vmem:[%s3594_s17 + $0x388] sm:$0xff] %v1275_v35  ;;  %v1280_v46 = vmul.f32 0.0, %v256_v43  ;;  %v1281_v47 = vmul.f32 0.0, %v257_v44  ;;  %v258_v48 = vld [vmem:[%s3579_s30 + $0x3c0] sm:$0xff]  ;;  %v259_v49 = vld [vmem:[%s3579_s30 + $0x3c8] sm:$0xff] }
  0x71   : > { %v260_v50 = vld [vmem:[%s3579_s30 + $0x3d0] sm:$0xff]  ;;  %2300 = vst [vmem:[%s3594_s17 + $0x390] sm:$0xff] %v1276_v39  ;;  %2301 = vst [vmem:[%s3594_s17 + $0x398] sm:$0xff] %v1277_v40  ;;  %v1282_v51 = vmul.f32 0.0, %v258_v48  ;;  %v1283_v52 = vmul.f32 0.0, %v259_v49  ;;  %v261_v54 = vld [vmem:[%s3579_s30 + $0x3d8] sm:$0xff] }
  0x72   : > { %2302 = vst [vmem:[%s3594_s17 + $0x3a0] sm:$0xff] %v1278_v41  ;;  %v1284_v53 = vmul.f32 0.0, %v260_v50  ;;  %v262_v55 = vld [vmem:[%s3579_s30 + $0x3e0] sm:$0xff]  ;;  %v263_v56 = vld [vmem:[%s3579_s30 + $0x3e8] sm:$0xff]  ;;  %2303 = vst [vmem:[%s3594_s17 + $0x3a8] sm:$0xff] %v1279_v45  ;;  %v1285_v57 = vmul.f32 0.0, %v261_v54 }
  0x73   : > { %2304 = vst [vmem:[%s3594_s17 + $0x3b0] sm:$0xff] %v1280_v46  ;;  %2305 = vst [vmem:[%s3594_s17 + $0x3b8] sm:$0xff] %v1281_v47  ;;  %v1286_v58 = vmul.f32 0.0, %v262_v55  ;;  %v1287_v59 = vmul.f32 0.0, %v263_v56  ;;  %v264_v60 = vld [vmem:[%s3579_s30 + $0x3f0] sm:$0xff]  ;;  %v265_v61 = vld [vmem:[%s3579_s30 + $0x3f8] sm:$0xff] }
  0x74   : > { %v266_v62 = vld [vmem:[%s3579_s30 + $0x400] sm:$0xff]  ;;  %2306 = vst [vmem:[%s3594_s17 + $0x3c0] sm:$0xff] %v1282_v51  ;;  %2307 = vst [vmem:[%s3594_s17 + $0x3c8] sm:$0xff] %v1283_v52  ;;  %v1288_v63 = vmul.f32 0.0, %v264_v60  ;;  %v1289_v0 = vmul.f32 0.0, %v265_v61  ;;  %v267_v2 = vld [vmem:[%s3579_s30 + $0x408] sm:$0xff] }
  0x75   : > { %2308 = vst [vmem:[%s3594_s17 + $0x3d0] sm:$0xff] %v1284_v53  ;;  %v1290_v1 = vmul.f32 0.0, %v266_v62  ;;  %v268_v3 = vld [vmem:[%s3579_s30 + $0x410] sm:$0xff]  ;;  %v269_v4 = vld [vmem:[%s3579_s30 + $0x418] sm:$0xff]  ;;  %2309 = vst [vmem:[%s3594_s17 + $0x3d8] sm:$0xff] %v1285_v57  ;;  %v1291_v5 = vmul.f32 0.0, %v267_v2 }
  0x76   : > { %2310 = vst [vmem:[%s3594_s17 + $0x3e0] sm:$0xff] %v1286_v58  ;;  %2311 = vst [vmem:[%s3594_s17 + $0x3e8] sm:$0xff] %v1287_v59  ;;  %v1292_v6 = vmul.f32 0.0, %v268_v3  ;;  %v1293_v7 = vmul.f32 0.0, %v269_v4  ;;  %v270_v8 = vld [vmem:[%s3579_s30 + $0x420] sm:$0xff]  ;;  %v271_v9 = vld [vmem:[%s3579_s30 + $0x428] sm:$0xff] }
  0x77   : > { %v272_v10 = vld [vmem:[%s3579_s30 + $0x430] sm:$0xff]  ;;  %2312 = vst [vmem:[%s3594_s17 + $0x3f0] sm:$0xff] %v1288_v63  ;;  %2313 = vst [vmem:[%s3594_s17 + $0x3f8] sm:$0xff] %v1289_v0  ;;  %v1294_v11 = vmul.f32 0.0, %v270_v8  ;;  %v1295_v12 = vmul.f32 0.0, %v271_v9  ;;  %v273_v14 = vld [vmem:[%s3579_s30 + $0x438] sm:$0xff] }
  0x78   : > { %2314 = vst [vmem:[%s3594_s17 + $0x400] sm:$0xff] %v1290_v1  ;;  %v1296_v13 = vmul.f32 0.0, %v272_v10  ;;  %v274_v15 = vld [vmem:[%s3579_s30 + $0x440] sm:$0xff]  ;;  %v275_v16 = vld [vmem:[%s3579_s30 + $0x448] sm:$0xff]  ;;  %2315 = vst [vmem:[%s3594_s17 + $0x408] sm:$0xff] %v1291_v5  ;;  %v1297_v17 = vmul.f32 0.0, %v273_v14 }
  0x79   : > { %2316 = vst [vmem:[%s3594_s17 + $0x410] sm:$0xff] %v1292_v6  ;;  %2317 = vst [vmem:[%s3594_s17 + $0x418] sm:$0xff] %v1293_v7  ;;  %v1298_v18 = vmul.f32 0.0, %v274_v15  ;;  %v1299_v19 = vmul.f32 0.0, %v275_v16  ;;  %v276_v20 = vld [vmem:[%s3579_s30 + $0x450] sm:$0xff]  ;;  %v277_v21 = vld [vmem:[%s3579_s30 + $0x458] sm:$0xff] }
  0x7a   : > { %v278_v22 = vld [vmem:[%s3579_s30 + $0x460] sm:$0xff]  ;;  %2318 = vst [vmem:[%s3594_s17 + $0x420] sm:$0xff] %v1294_v11  ;;  %2319 = vst [vmem:[%s3594_s17 + $0x428] sm:$0xff] %v1295_v12  ;;  %v1300_v23 = vmul.f32 0.0, %v276_v20  ;;  %v1301_v24 = vmul.f32 0.0, %v277_v21  ;;  %v279_v26 = vld [vmem:[%s3579_s30 + $0x468] sm:$0xff] }
  0x7b   : > { %2320 = vst [vmem:[%s3594_s17 + $0x430] sm:$0xff] %v1296_v13  ;;  %v1302_v25 = vmul.f32 0.0, %v278_v22  ;;  %v280_v27 = vld [vmem:[%s3579_s30 + $0x470] sm:$0xff]  ;;  %v281_v28 = vld [vmem:[%s3579_s30 + $0x478] sm:$0xff]  ;;  %2321 = vst [vmem:[%s3594_s17 + $0x438] sm:$0xff] %v1297_v17  ;;  %v1303_v29 = vmul.f32 0.0, %v279_v26 }
  0x7c   : > { %2322 = vst [vmem:[%s3594_s17 + $0x440] sm:$0xff] %v1298_v18  ;;  %2323 = vst [vmem:[%s3594_s17 + $0x448] sm:$0xff] %v1299_v19  ;;  %v1304_v30 = vmul.f32 0.0, %v280_v27  ;;  %v1305_v31 = vmul.f32 0.0, %v281_v28  ;;  %v282_v32 = vld [vmem:[%s3579_s30 + $0x480] sm:$0xff]  ;;  %v283_v33 = vld [vmem:[%s3579_s30 + $0x488] sm:$0xff] }
  0x7d   : > { %v284_v34 = vld [vmem:[%s3579_s30 + $0x490] sm:$0xff]  ;;  %2324 = vst [vmem:[%s3594_s17 + $0x450] sm:$0xff] %v1300_v23  ;;  %2325 = vst [vmem:[%s3594_s17 + $0x458] sm:$0xff] %v1301_v24  ;;  %v1306_v35 = vmul.f32 0.0, %v282_v32  ;;  %v1307_v36 = vmul.f32 0.0, %v283_v33  ;;  %v285_v38 = vld [vmem:[%s3579_s30 + $0x498] sm:$0xff] }
  0x7e   : > { %2326 = vst [vmem:[%s3594_s17 + $0x460] sm:$0xff] %v1302_v25  ;;  %v1308_v37 = vmul.f32 0.0, %v284_v34  ;;  %v286_v39 = vld [vmem:[%s3579_s30 + $0x4a0] sm:$0xff]  ;;  %v287_v40 = vld [vmem:[%s3579_s30 + $0x4a8] sm:$0xff]  ;;  %2327 = vst [vmem:[%s3594_s17 + $0x468] sm:$0xff] %v1303_v29  ;;  %v1309_v41 = vmul.f32 0.0, %v285_v38 }
  0x7f   : > { %2328 = vst [vmem:[%s3594_s17 + $0x470] sm:$0xff] %v1304_v30  ;;  %2329 = vst [vmem:[%s3594_s17 + $0x478] sm:$0xff] %v1305_v31  ;;  %v1310_v42 = vmul.f32 0.0, %v286_v39  ;;  %v1311_v43 = vmul.f32 0.0, %v287_v40  ;;  %v288_v44 = vld [vmem:[%s3579_s30 + $0x4b0] sm:$0xff]  ;;  %v289_v45 = vld [vmem:[%s3579_s30 + $0x4b8] sm:$0xff] }
  0x80   : > { %v290_v46 = vld [vmem:[%s3579_s30 + $0x4c0] sm:$0xff]  ;;  %2330 = vst [vmem:[%s3594_s17 + $0x480] sm:$0xff] %v1306_v35  ;;  %2331 = vst [vmem:[%s3594_s17 + $0x488] sm:$0xff] %v1307_v36  ;;  %v1312_v47 = vmul.f32 0.0, %v288_v44  ;;  %v1313_v48 = vmul.f32 0.0, %v289_v45  ;;  %v291_v50 = vld [vmem:[%s3579_s30 + $0x4c8] sm:$0xff] }
  0x81   : > { %2332 = vst [vmem:[%s3594_s17 + $0x490] sm:$0xff] %v1308_v37  ;;  %v1314_v49 = vmul.f32 0.0, %v290_v46  ;;  %v292_v51 = vld [vmem:[%s3579_s30 + $0x4d0] sm:$0xff]  ;;  %v293_v52 = vld [vmem:[%s3579_s30 + $0x4d8] sm:$0xff]  ;;  %2333 = vst [vmem:[%s3594_s17 + $0x498] sm:$0xff] %v1309_v41  ;;  %v1315_v53 = vmul.f32 0.0, %v291_v50 }
  0x82   : > { %2334 = vst [vmem:[%s3594_s17 + $0x4a0] sm:$0xff] %v1310_v42  ;;  %2335 = vst [vmem:[%s3594_s17 + $0x4a8] sm:$0xff] %v1311_v43  ;;  %v1316_v54 = vmul.f32 0.0, %v292_v51  ;;  %v1317_v55 = vmul.f32 0.0, %v293_v52  ;;  %v294_v56 = vld [vmem:[%s3579_s30 + $0x4e0] sm:$0xff]  ;;  %v295_v57 = vld [vmem:[%s3579_s30 + $0x4e8] sm:$0xff] }
  0x83   : > { %v296_v58 = vld [vmem:[%s3579_s30 + $0x4f0] sm:$0xff]  ;;  %2336 = vst [vmem:[%s3594_s17 + $0x4b0] sm:$0xff] %v1312_v47  ;;  %2337 = vst [vmem:[%s3594_s17 + $0x4b8] sm:$0xff] %v1313_v48  ;;  %v1318_v59 = vmul.f32 0.0, %v294_v56  ;;  %v1319_v60 = vmul.f32 0.0, %v295_v57  ;;  %v297_v62 = vld [vmem:[%s3579_s30 + $0x4f8] sm:$0xff] }
  0x84   : > { %2338 = vst [vmem:[%s3594_s17 + $0x4c0] sm:$0xff] %v1314_v49  ;;  %v1320_v61 = vmul.f32 0.0, %v296_v58  ;;  %v298_v63 = vld [vmem:[%s3579_s30 + $0x500] sm:$0xff]  ;;  %v299_v0 = vld [vmem:[%s3579_s30 + $0x508] sm:$0xff]  ;;  %2339 = vst [vmem:[%s3594_s17 + $0x4c8] sm:$0xff] %v1315_v53  ;;  %v1321_v1 = vmul.f32 0.0, %v297_v62 }
  0x85   : > { %2340 = vst [vmem:[%s3594_s17 + $0x4d0] sm:$0xff] %v1316_v54  ;;  %2341 = vst [vmem:[%s3594_s17 + $0x4d8] sm:$0xff] %v1317_v55  ;;  %v1322_v2 = vmul.f32 0.0, %v298_v63  ;;  %v1323_v3 = vmul.f32 0.0, %v299_v0  ;;  %v300_v4 = vld [vmem:[%s3579_s30 + $0x510] sm:$0xff]  ;;  %v301_v5 = vld [vmem:[%s3579_s30 + $0x518] sm:$0xff] }
  0x86   : > { %v302_v6 = vld [vmem:[%s3579_s30 + $0x520] sm:$0xff]  ;;  %2342 = vst [vmem:[%s3594_s17 + $0x4e0] sm:$0xff] %v1318_v59  ;;  %2343 = vst [vmem:[%s3594_s17 + $0x4e8] sm:$0xff] %v1319_v60  ;;  %v1324_v7 = vmul.f32 0.0, %v300_v4  ;;  %v1325_v8 = vmul.f32 0.0, %v301_v5  ;;  %v303_v10 = vld [vmem:[%s3579_s30 + $0x528] sm:$0xff] }
  0x87   : > { %2344 = vst [vmem:[%s3594_s17 + $0x4f0] sm:$0xff] %v1320_v61  ;;  %v1326_v9 = vmul.f32 0.0, %v302_v6  ;;  %v304_v11 = vld [vmem:[%s3579_s30 + $0x530] sm:$0xff]  ;;  %v305_v12 = vld [vmem:[%s3579_s30 + $0x538] sm:$0xff]  ;;  %2345 = vst [vmem:[%s3594_s17 + $0x4f8] sm:$0xff] %v1321_v1  ;;  %v1327_v13 = vmul.f32 0.0, %v303_v10 }
  0x88   : > { %2346 = vst [vmem:[%s3594_s17 + $0x500] sm:$0xff] %v1322_v2  ;;  %2347 = vst [vmem:[%s3594_s17 + $0x508] sm:$0xff] %v1323_v3  ;;  %v1328_v14 = vmul.f32 0.0, %v304_v11  ;;  %v1329_v15 = vmul.f32 0.0, %v305_v12  ;;  %v306_v16 = vld [vmem:[%s3579_s30 + $0x540] sm:$0xff]  ;;  %v307_v17 = vld [vmem:[%s3579_s30 + $0x548] sm:$0xff] }
  0x89   : > { %v308_v18 = vld [vmem:[%s3579_s30 + $0x550] sm:$0xff]  ;;  %2348 = vst [vmem:[%s3594_s17 + $0x510] sm:$0xff] %v1324_v7  ;;  %2349 = vst [vmem:[%s3594_s17 + $0x518] sm:$0xff] %v1325_v8  ;;  %v1330_v19 = vmul.f32 0.0, %v306_v16  ;;  %v1331_v20 = vmul.f32 0.0, %v307_v17  ;;  %v309_v22 = vld [vmem:[%s3579_s30 + $0x558] sm:$0xff] }
  0x8a   : > { %2350 = vst [vmem:[%s3594_s17 + $0x520] sm:$0xff] %v1326_v9  ;;  %v1332_v21 = vmul.f32 0.0, %v308_v18  ;;  %v310_v23 = vld [vmem:[%s3579_s30 + $0x560] sm:$0xff]  ;;  %v311_v24 = vld [vmem:[%s3579_s30 + $0x568] sm:$0xff]  ;;  %2351 = vst [vmem:[%s3594_s17 + $0x528] sm:$0xff] %v1327_v13  ;;  %v1333_v25 = vmul.f32 0.0, %v309_v22 }
  0x8b   : > { %2352 = vst [vmem:[%s3594_s17 + $0x530] sm:$0xff] %v1328_v14  ;;  %2353 = vst [vmem:[%s3594_s17 + $0x538] sm:$0xff] %v1329_v15  ;;  %v1334_v26 = vmul.f32 0.0, %v310_v23  ;;  %v1335_v27 = vmul.f32 0.0, %v311_v24  ;;  %v312_v28 = vld [vmem:[%s3579_s30 + $0x570] sm:$0xff]  ;;  %v313_v29 = vld [vmem:[%s3579_s30 + $0x578] sm:$0xff] }
  0x8c   : > { %v314_v30 = vld [vmem:[%s3579_s30 + $0x580] sm:$0xff]  ;;  %2354 = vst [vmem:[%s3594_s17 + $0x540] sm:$0xff] %v1330_v19  ;;  %2355 = vst [vmem:[%s3594_s17 + $0x548] sm:$0xff] %v1331_v20  ;;  %v1336_v31 = vmul.f32 0.0, %v312_v28  ;;  %v1337_v32 = vmul.f32 0.0, %v313_v29  ;;  %v315_v34 = vld [vmem:[%s3579_s30 + $0x588] sm:$0xff] }
  0x8d   : > { %2356 = vst [vmem:[%s3594_s17 + $0x550] sm:$0xff] %v1332_v21  ;;  %v1338_v33 = vmul.f32 0.0, %v314_v30  ;;  %v316_v35 = vld [vmem:[%s3579_s30 + $0x590] sm:$0xff]  ;;  %v317_v36 = vld [vmem:[%s3579_s30 + $0x598] sm:$0xff]  ;;  %2357 = vst [vmem:[%s3594_s17 + $0x558] sm:$0xff] %v1333_v25  ;;  %v1339_v37 = vmul.f32 0.0, %v315_v34 }
  0x8e   : > { %2358 = vst [vmem:[%s3594_s17 + $0x560] sm:$0xff] %v1334_v26  ;;  %2359 = vst [vmem:[%s3594_s17 + $0x568] sm:$0xff] %v1335_v27  ;;  %v1340_v38 = vmul.f32 0.0, %v316_v35  ;;  %v1341_v39 = vmul.f32 0.0, %v317_v36  ;;  %v318_v40 = vld [vmem:[%s3579_s30 + $0x5a0] sm:$0xff]  ;;  %v319_v41 = vld [vmem:[%s3579_s30 + $0x5a8] sm:$0xff] }
  0x8f   : > { %v320_v42 = vld [vmem:[%s3579_s30 + $0x5b0] sm:$0xff]  ;;  %2360 = vst [vmem:[%s3594_s17 + $0x570] sm:$0xff] %v1336_v31  ;;  %2361 = vst [vmem:[%s3594_s17 + $0x578] sm:$0xff] %v1337_v32  ;;  %v1342_v43 = vmul.f32 0.0, %v318_v40  ;;  %v1343_v44 = vmul.f32 0.0, %v319_v41  ;;  %v321_v46 = vld [vmem:[%s3579_s30 + $0x5b8] sm:$0xff] }
  0x90   : > { %2362 = vst [vmem:[%s3594_s17 + $0x580] sm:$0xff] %v1338_v33  ;;  %v1344_v45 = vmul.f32 0.0, %v320_v42  ;;  %v322_v47 = vld [vmem:[%s3579_s30 + $0x5c0] sm:$0xff]  ;;  %v323_v48 = vld [vmem:[%s3579_s30 + $0x5c8] sm:$0xff]  ;;  %2363 = vst [vmem:[%s3594_s17 + $0x588] sm:$0xff] %v1339_v37  ;;  %v1345_v49 = vmul.f32 0.0, %v321_v46 }
  0x91   : > { %2364 = vst [vmem:[%s3594_s17 + $0x590] sm:$0xff] %v1340_v38  ;;  %2365 = vst [vmem:[%s3594_s17 + $0x598] sm:$0xff] %v1341_v39  ;;  %v1346_v50 = vmul.f32 0.0, %v322_v47  ;;  %v1347_v51 = vmul.f32 0.0, %v323_v48  ;;  %v324_v52 = vld [vmem:[%s3579_s30 + $0x5d0] sm:$0xff]  ;;  %v325_v53 = vld [vmem:[%s3579_s30 + $0x5d8] sm:$0xff] }
  0x92   : > { %v326_v54 = vld [vmem:[%s3579_s30 + $0x5e0] sm:$0xff]  ;;  %2366 = vst [vmem:[%s3594_s17 + $0x5a0] sm:$0xff] %v1342_v43  ;;  %2367 = vst [vmem:[%s3594_s17 + $0x5a8] sm:$0xff] %v1343_v44  ;;  %v1348_v55 = vmul.f32 0.0, %v324_v52  ;;  %v1349_v56 = vmul.f32 0.0, %v325_v53  ;;  %v327_v58 = vld [vmem:[%s3579_s30 + $0x5e8] sm:$0xff] }
  0x93   : > { %2368 = vst [vmem:[%s3594_s17 + $0x5b0] sm:$0xff] %v1344_v45  ;;  %v1350_v57 = vmul.f32 0.0, %v326_v54  ;;  %v328_v59 = vld [vmem:[%s3579_s30 + $0x5f0] sm:$0xff]  ;;  %v329_v60 = vld [vmem:[%s3579_s30 + $0x5f8] sm:$0xff]  ;;  %2369 = vst [vmem:[%s3594_s17 + $0x5b8] sm:$0xff] %v1345_v49  ;;  %v1351_v61 = vmul.f32 0.0, %v327_v58 }
  0x94   : > { %2370 = vst [vmem:[%s3594_s17 + $0x5c0] sm:$0xff] %v1346_v50  ;;  %2371 = vst [vmem:[%s3594_s17 + $0x5c8] sm:$0xff] %v1347_v51  ;;  %v1352_v62 = vmul.f32 0.0, %v328_v59  ;;  %v1353_v63 = vmul.f32 0.0, %v329_v60  ;;  %v330_v0 = vld [vmem:[%s3579_s30 + $0x600] sm:$0xff]  ;;  %v331_v1 = vld [vmem:[%s3579_s30 + $0x608] sm:$0xff] }
  0x95   : > { %v332_v2 = vld [vmem:[%s3579_s30 + $0x610] sm:$0xff]  ;;  %2372 = vst [vmem:[%s3594_s17 + $0x5d0] sm:$0xff] %v1348_v55  ;;  %2373 = vst [vmem:[%s3594_s17 + $0x5d8] sm:$0xff] %v1349_v56  ;;  %v1354_v3 = vmul.f32 0.0, %v330_v0  ;;  %v1355_v4 = vmul.f32 0.0, %v331_v1  ;;  %v333_v6 = vld [vmem:[%s3579_s30 + $0x618] sm:$0xff] }
  0x96   : > { %2374 = vst [vmem:[%s3594_s17 + $0x5e0] sm:$0xff] %v1350_v57  ;;  %v1356_v5 = vmul.f32 0.0, %v332_v2  ;;  %v334_v7 = vld [vmem:[%s3579_s30 + $0x620] sm:$0xff]  ;;  %v335_v8 = vld [vmem:[%s3579_s30 + $0x628] sm:$0xff]  ;;  %2375 = vst [vmem:[%s3594_s17 + $0x5e8] sm:$0xff] %v1351_v61  ;;  %v1357_v9 = vmul.f32 0.0, %v333_v6 }
  0x97   : > { %2376 = vst [vmem:[%s3594_s17 + $0x5f0] sm:$0xff] %v1352_v62  ;;  %2377 = vst [vmem:[%s3594_s17 + $0x5f8] sm:$0xff] %v1353_v63  ;;  %v1358_v10 = vmul.f32 0.0, %v334_v7  ;;  %v1359_v11 = vmul.f32 0.0, %v335_v8  ;;  %v336_v12 = vld [vmem:[%s3579_s30 + $0x630] sm:$0xff]  ;;  %v337_v13 = vld [vmem:[%s3579_s30 + $0x638] sm:$0xff] }
  0x98   : > { %v338_v14 = vld [vmem:[%s3579_s30 + $0x640] sm:$0xff]  ;;  %2378 = vst [vmem:[%s3594_s17 + $0x600] sm:$0xff] %v1354_v3  ;;  %2379 = vst [vmem:[%s3594_s17 + $0x608] sm:$0xff] %v1355_v4  ;;  %v1360_v15 = vmul.f32 0.0, %v336_v12  ;;  %v1361_v16 = vmul.f32 0.0, %v337_v13  ;;  %v339_v18 = vld [vmem:[%s3579_s30 + $0x648] sm:$0xff] }
  0x99   : > { %2380 = vst [vmem:[%s3594_s17 + $0x610] sm:$0xff] %v1356_v5  ;;  %v1362_v17 = vmul.f32 0.0, %v338_v14  ;;  %v340_v19 = vld [vmem:[%s3579_s30 + $0x650] sm:$0xff]  ;;  %v341_v20 = vld [vmem:[%s3579_s30 + $0x658] sm:$0xff]  ;;  %2381 = vst [vmem:[%s3594_s17 + $0x618] sm:$0xff] %v1357_v9  ;;  %v1363_v21 = vmul.f32 0.0, %v339_v18 }
  0x9a   : > { %2382 = vst [vmem:[%s3594_s17 + $0x620] sm:$0xff] %v1358_v10  ;;  %2383 = vst [vmem:[%s3594_s17 + $0x628] sm:$0xff] %v1359_v11  ;;  %v1364_v22 = vmul.f32 0.0, %v340_v19  ;;  %v1365_v23 = vmul.f32 0.0, %v341_v20  ;;  %v342_v24 = vld [vmem:[%s3579_s30 + $0x660] sm:$0xff]  ;;  %v343_v25 = vld [vmem:[%s3579_s30 + $0x668] sm:$0xff] }
  0x9b   : > { %v344_v26 = vld [vmem:[%s3579_s30 + $0x670] sm:$0xff]  ;;  %2384 = vst [vmem:[%s3594_s17 + $0x630] sm:$0xff] %v1360_v15  ;;  %2385 = vst [vmem:[%s3594_s17 + $0x638] sm:$0xff] %v1361_v16  ;;  %v1366_v27 = vmul.f32 0.0, %v342_v24  ;;  %v1367_v28 = vmul.f32 0.0, %v343_v25  ;;  %v345_v30 = vld [vmem:[%s3579_s30 + $0x678] sm:$0xff] }
  0x9c   : > { %2386 = vst [vmem:[%s3594_s17 + $0x640] sm:$0xff] %v1362_v17  ;;  %v1368_v29 = vmul.f32 0.0, %v344_v26  ;;  %v346_v31 = vld [vmem:[%s3579_s30 + $0x680] sm:$0xff]  ;;  %v347_v32 = vld [vmem:[%s3579_s30 + $0x688] sm:$0xff]  ;;  %2387 = vst [vmem:[%s3594_s17 + $0x648] sm:$0xff] %v1363_v21  ;;  %v1369_v33 = vmul.f32 0.0, %v345_v30 }
  0x9d   : > { %2388 = vst [vmem:[%s3594_s17 + $0x650] sm:$0xff] %v1364_v22  ;;  %2389 = vst [vmem:[%s3594_s17 + $0x658] sm:$0xff] %v1365_v23  ;;  %v1370_v34 = vmul.f32 0.0, %v346_v31  ;;  %v1371_v35 = vmul.f32 0.0, %v347_v32  ;;  %v348_v36 = vld [vmem:[%s3579_s30 + $0x690] sm:$0xff]  ;;  %v349_v37 = vld [vmem:[%s3579_s30 + $0x698] sm:$0xff] }
  0x9e   : > { %v350_v38 = vld [vmem:[%s3579_s30 + $0x6a0] sm:$0xff]  ;;  %2390 = vst [vmem:[%s3594_s17 + $0x660] sm:$0xff] %v1366_v27  ;;  %2391 = vst [vmem:[%s3594_s17 + $0x668] sm:$0xff] %v1367_v28  ;;  %v1372_v39 = vmul.f32 0.0, %v348_v36  ;;  %v1373_v40 = vmul.f32 0.0, %v349_v37  ;;  %v351_v42 = vld [vmem:[%s3579_s30 + $0x6a8] sm:$0xff] }
  0x9f   : > { %2392 = vst [vmem:[%s3594_s17 + $0x670] sm:$0xff] %v1368_v29  ;;  %v1374_v41 = vmul.f32 0.0, %v350_v38  ;;  %v352_v43 = vld [vmem:[%s3579_s30 + $0x6b0] sm:$0xff]  ;;  %v353_v44 = vld [vmem:[%s3579_s30 + $0x6b8] sm:$0xff]  ;;  %2393 = vst [vmem:[%s3594_s17 + $0x678] sm:$0xff] %v1369_v33  ;;  %v1375_v45 = vmul.f32 0.0, %v351_v42 }
  0xa0   : > { %2394 = vst [vmem:[%s3594_s17 + $0x680] sm:$0xff] %v1370_v34  ;;  %2395 = vst [vmem:[%s3594_s17 + $0x688] sm:$0xff] %v1371_v35  ;;  %v1376_v46 = vmul.f32 0.0, %v352_v43  ;;  %v1377_v47 = vmul.f32 0.0, %v353_v44  ;;  %v354_v48 = vld [vmem:[%s3579_s30 + $0x6c0] sm:$0xff]  ;;  %v355_v49 = vld [vmem:[%s3579_s30 + $0x6c8] sm:$0xff] }
  0xa1   : > { %v356_v50 = vld [vmem:[%s3579_s30 + $0x6d0] sm:$0xff]  ;;  %2396 = vst [vmem:[%s3594_s17 + $0x690] sm:$0xff] %v1372_v39  ;;  %2397 = vst [vmem:[%s3594_s17 + $0x698] sm:$0xff] %v1373_v40  ;;  %v1378_v51 = vmul.f32 0.0, %v354_v48  ;;  %v1379_v52 = vmul.f32 0.0, %v355_v49  ;;  %v357_v54 = vld [vmem:[%s3579_s30 + $0x6d8] sm:$0xff] }
  0xa2   : > { %2398 = vst [vmem:[%s3594_s17 + $0x6a0] sm:$0xff] %v1374_v41  ;;  %v1380_v53 = vmul.f32 0.0, %v356_v50  ;;  %v358_v55 = vld [vmem:[%s3579_s30 + $0x6e0] sm:$0xff]  ;;  %v359_v56 = vld [vmem:[%s3579_s30 + $0x6e8] sm:$0xff]  ;;  %2399 = vst [vmem:[%s3594_s17 + $0x6a8] sm:$0xff] %v1375_v45  ;;  %v1381_v57 = vmul.f32 0.0, %v357_v54 }
  0xa3   : > { %2400 = vst [vmem:[%s3594_s17 + $0x6b0] sm:$0xff] %v1376_v46  ;;  %2401 = vst [vmem:[%s3594_s17 + $0x6b8] sm:$0xff] %v1377_v47  ;;  %v1382_v58 = vmul.f32 0.0, %v358_v55  ;;  %v1383_v59 = vmul.f32 0.0, %v359_v56  ;;  %v360_v60 = vld [vmem:[%s3579_s30 + $0x6f0] sm:$0xff]  ;;  %v361_v61 = vld [vmem:[%s3579_s30 + $0x6f8] sm:$0xff] }
  0xa4   : > { %v362_v62 = vld [vmem:[%s3579_s30 + $0x700] sm:$0xff]  ;;  %2402 = vst [vmem:[%s3594_s17 + $0x6c0] sm:$0xff] %v1378_v51  ;;  %2403 = vst [vmem:[%s3594_s17 + $0x6c8] sm:$0xff] %v1379_v52  ;;  %v1384_v63 = vmul.f32 0.0, %v360_v60  ;;  %v1385_v0 = vmul.f32 0.0, %v361_v61  ;;  %v363_v2 = vld [vmem:[%s3579_s30 + $0x708] sm:$0xff] }
  0xa5   : > { %2404 = vst [vmem:[%s3594_s17 + $0x6d0] sm:$0xff] %v1380_v53  ;;  %v1386_v1 = vmul.f32 0.0, %v362_v62  ;;  %v364_v3 = vld [vmem:[%s3579_s30 + $0x710] sm:$0xff]  ;;  %v365_v4 = vld [vmem:[%s3579_s30 + $0x718] sm:$0xff]  ;;  %2405 = vst [vmem:[%s3594_s17 + $0x6d8] sm:$0xff] %v1381_v57  ;;  %v1387_v5 = vmul.f32 0.0, %v363_v2 }
  0xa6   : > { %2406 = vst [vmem:[%s3594_s17 + $0x6e0] sm:$0xff] %v1382_v58  ;;  %2407 = vst [vmem:[%s3594_s17 + $0x6e8] sm:$0xff] %v1383_v59  ;;  %v1388_v6 = vmul.f32 0.0, %v364_v3  ;;  %v1389_v7 = vmul.f32 0.0, %v365_v4  ;;  %v366_v8 = vld [vmem:[%s3579_s30 + $0x720] sm:$0xff]  ;;  %v367_v9 = vld [vmem:[%s3579_s30 + $0x728] sm:$0xff] }
  0xa7   : > { %v368_v10 = vld [vmem:[%s3579_s30 + $0x730] sm:$0xff]  ;;  %2408 = vst [vmem:[%s3594_s17 + $0x6f0] sm:$0xff] %v1384_v63  ;;  %2409 = vst [vmem:[%s3594_s17 + $0x6f8] sm:$0xff] %v1385_v0  ;;  %v1390_v11 = vmul.f32 0.0, %v366_v8  ;;  %v1391_v12 = vmul.f32 0.0, %v367_v9  ;;  %v369_v14 = vld [vmem:[%s3579_s30 + $0x738] sm:$0xff] }
  0xa8   : > { %2410 = vst [vmem:[%s3594_s17 + $0x700] sm:$0xff] %v1386_v1  ;;  %v1392_v13 = vmul.f32 0.0, %v368_v10  ;;  %v370_v15 = vld [vmem:[%s3579_s30 + $0x740] sm:$0xff]  ;;  %v371_v16 = vld [vmem:[%s3579_s30 + $0x748] sm:$0xff]  ;;  %2411 = vst [vmem:[%s3594_s17 + $0x708] sm:$0xff] %v1387_v5  ;;  %v1393_v17 = vmul.f32 0.0, %v369_v14 }
  0xa9   : > { %2412 = vst [vmem:[%s3594_s17 + $0x710] sm:$0xff] %v1388_v6  ;;  %2413 = vst [vmem:[%s3594_s17 + $0x718] sm:$0xff] %v1389_v7  ;;  %v1394_v18 = vmul.f32 0.0, %v370_v15  ;;  %v1395_v19 = vmul.f32 0.0, %v371_v16  ;;  %v372_v20 = vld [vmem:[%s3579_s30 + $0x750] sm:$0xff]  ;;  %v373_v21 = vld [vmem:[%s3579_s30 + $0x758] sm:$0xff] }
  0xaa   : > { %v374_v22 = vld [vmem:[%s3579_s30 + $0x760] sm:$0xff]  ;;  %2414 = vst [vmem:[%s3594_s17 + $0x720] sm:$0xff] %v1390_v11  ;;  %2415 = vst [vmem:[%s3594_s17 + $0x728] sm:$0xff] %v1391_v12  ;;  %v1396_v23 = vmul.f32 0.0, %v372_v20  ;;  %v1397_v24 = vmul.f32 0.0, %v373_v21  ;;  %v375_v26 = vld [vmem:[%s3579_s30 + $0x768] sm:$0xff] }
  0xab   : > { %2416 = vst [vmem:[%s3594_s17 + $0x730] sm:$0xff] %v1392_v13  ;;  %v1398_v25 = vmul.f32 0.0, %v374_v22  ;;  %v376_v27 = vld [vmem:[%s3579_s30 + $0x770] sm:$0xff]  ;;  %v377_v28 = vld [vmem:[%s3579_s30 + $0x778] sm:$0xff]  ;;  %2417 = vst [vmem:[%s3594_s17 + $0x738] sm:$0xff] %v1393_v17  ;;  %v1399_v29 = vmul.f32 0.0, %v375_v26 }
  0xac   : > { %2418 = vst [vmem:[%s3594_s17 + $0x740] sm:$0xff] %v1394_v18  ;;  %2419 = vst [vmem:[%s3594_s17 + $0x748] sm:$0xff] %v1395_v19  ;;  %v1400_v30 = vmul.f32 0.0, %v376_v27  ;;  %v1401_v31 = vmul.f32 0.0, %v377_v28  ;;  %v378_v32 = vld [vmem:[%s3579_s30 + $0x780] sm:$0xff]  ;;  %v379_v33 = vld [vmem:[%s3579_s30 + $0x788] sm:$0xff] }
  0xad   : > { %v380_v34 = vld [vmem:[%s3579_s30 + $0x790] sm:$0xff]  ;;  %2420 = vst [vmem:[%s3594_s17 + $0x750] sm:$0xff] %v1396_v23  ;;  %2421 = vst [vmem:[%s3594_s17 + $0x758] sm:$0xff] %v1397_v24  ;;  %v1402_v35 = vmul.f32 0.0, %v378_v32  ;;  %v1403_v36 = vmul.f32 0.0, %v379_v33  ;;  %v381_v38 = vld [vmem:[%s3579_s30 + $0x798] sm:$0xff] }
  0xae   : > { %2422 = vst [vmem:[%s3594_s17 + $0x760] sm:$0xff] %v1398_v25  ;;  %v1404_v37 = vmul.f32 0.0, %v380_v34  ;;  %v382_v39 = vld [vmem:[%s3579_s30 + $0x7a0] sm:$0xff]  ;;  %v383_v40 = vld [vmem:[%s3579_s30 + $0x7a8] sm:$0xff]  ;;  %2423 = vst [vmem:[%s3594_s17 + $0x768] sm:$0xff] %v1399_v29  ;;  %v1405_v41 = vmul.f32 0.0, %v381_v38 }
  0xaf   : > { %2424 = vst [vmem:[%s3594_s17 + $0x770] sm:$0xff] %v1400_v30  ;;  %2425 = vst [vmem:[%s3594_s17 + $0x778] sm:$0xff] %v1401_v31  ;;  %v1406_v42 = vmul.f32 0.0, %v382_v39  ;;  %v1407_v43 = vmul.f32 0.0, %v383_v40  ;;  %v384_v44 = vld [vmem:[%s3579_s30 + $0x7b0] sm:$0xff]  ;;  %v385_v45 = vld [vmem:[%s3579_s30 + $0x7b8] sm:$0xff] }
  0xb0   : > { %v386_v46 = vld [vmem:[%s3579_s30 + $0x7c0] sm:$0xff]  ;;  %2426 = vst [vmem:[%s3594_s17 + $0x780] sm:$0xff] %v1402_v35  ;;  %2427 = vst [vmem:[%s3594_s17 + $0x788] sm:$0xff] %v1403_v36  ;;  %v1408_v47 = vmul.f32 0.0, %v384_v44  ;;  %v1409_v48 = vmul.f32 0.0, %v385_v45  ;;  %v387_v50 = vld [vmem:[%s3579_s30 + $0x7c8] sm:$0xff] }
  0xb1   : > { %2428 = vst [vmem:[%s3594_s17 + $0x790] sm:$0xff] %v1404_v37  ;;  %v1410_v49 = vmul.f32 0.0, %v386_v46  ;;  %v388_v51 = vld [vmem:[%s3579_s30 + $0x7d0] sm:$0xff]  ;;  %v389_v52 = vld [vmem:[%s3579_s30 + $0x7d8] sm:$0xff]  ;;  %2429 = vst [vmem:[%s3594_s17 + $0x798] sm:$0xff] %v1405_v41  ;;  %v1411_v53 = vmul.f32 0.0, %v387_v50 }
  0xb2   : > { %2430 = vst [vmem:[%s3594_s17 + $0x7a0] sm:$0xff] %v1406_v42  ;;  %2431 = vst [vmem:[%s3594_s17 + $0x7a8] sm:$0xff] %v1407_v43  ;;  %v1412_v54 = vmul.f32 0.0, %v388_v51  ;;  %v1413_v55 = vmul.f32 0.0, %v389_v52  ;;  %v390_v56 = vld [vmem:[%s3579_s30 + $0x7e0] sm:$0xff]  ;;  %v391_v57 = vld [vmem:[%s3579_s30 + $0x7e8] sm:$0xff] }
  0xb3   : > { %v392_v58 = vld [vmem:[%s3579_s30 + $0x7f0] sm:$0xff]  ;;  %2432 = vst [vmem:[%s3594_s17 + $0x7b0] sm:$0xff] %v1408_v47  ;;  %2433 = vst [vmem:[%s3594_s17 + $0x7b8] sm:$0xff] %v1409_v48  ;;  %v1414_v59 = vmul.f32 0.0, %v390_v56  ;;  %v1415_v60 = vmul.f32 0.0, %v391_v57  ;;  %v393_v62 = vld [vmem:[%s3579_s30 + $0x7f8] sm:$0xff] }
  0xb4   : > { %2434 = vst [vmem:[%s3594_s17 + $0x7c0] sm:$0xff] %v1410_v49  ;;  %v1416_v61 = vmul.f32 0.0, %v392_v58  ;;  %v394_v63 = vld [vmem:[%s3579_s30 + $0x800] sm:$0xff]  ;;  %v395_v0 = vld [vmem:[%s3579_s30 + $0x808] sm:$0xff]  ;;  %2435 = vst [vmem:[%s3594_s17 + $0x7c8] sm:$0xff] %v1411_v53  ;;  %v1417_v1 = vmul.f32 0.0, %v393_v62 }
  0xb5   : > { %2436 = vst [vmem:[%s3594_s17 + $0x7d0] sm:$0xff] %v1412_v54  ;;  %2437 = vst [vmem:[%s3594_s17 + $0x7d8] sm:$0xff] %v1413_v55  ;;  %v1418_v2 = vmul.f32 0.0, %v394_v63  ;;  %v1419_v3 = vmul.f32 0.0, %v395_v0  ;;  %v396_v4 = vld [vmem:[%s3579_s30 + $0x810] sm:$0xff]  ;;  %v397_v5 = vld [vmem:[%s3579_s30 + $0x818] sm:$0xff] }
  0xb6   : > { %v398_v6 = vld [vmem:[%s3579_s30 + $0x820] sm:$0xff]  ;;  %2438 = vst [vmem:[%s3594_s17 + $0x7e0] sm:$0xff] %v1414_v59  ;;  %2439 = vst [vmem:[%s3594_s17 + $0x7e8] sm:$0xff] %v1415_v60  ;;  %v1420_v7 = vmul.f32 0.0, %v396_v4  ;;  %v1421_v8 = vmul.f32 0.0, %v397_v5  ;;  %v399_v10 = vld [vmem:[%s3579_s30 + $0x828] sm:$0xff] }
  0xb7   : > { %2440 = vst [vmem:[%s3594_s17 + $0x7f0] sm:$0xff] %v1416_v61  ;;  %v1422_v9 = vmul.f32 0.0, %v398_v6  ;;  %v400_v11 = vld [vmem:[%s3579_s30 + $0x830] sm:$0xff]  ;;  %v401_v12 = vld [vmem:[%s3579_s30 + $0x838] sm:$0xff]  ;;  %2441 = vst [vmem:[%s3594_s17 + $0x7f8] sm:$0xff] %v1417_v1  ;;  %v1423_v13 = vmul.f32 0.0, %v399_v10 }
  0xb8   : > { %2442 = vst [vmem:[%s3594_s17 + $0x800] sm:$0xff] %v1418_v2  ;;  %2443 = vst [vmem:[%s3594_s17 + $0x808] sm:$0xff] %v1419_v3  ;;  %v1424_v14 = vmul.f32 0.0, %v400_v11  ;;  %v1425_v15 = vmul.f32 0.0, %v401_v12  ;;  %v402_v16 = vld [vmem:[%s3579_s30 + $0x840] sm:$0xff]  ;;  %v403_v17 = vld [vmem:[%s3579_s30 + $0x848] sm:$0xff] }
  0xb9   : > { %v404_v18 = vld [vmem:[%s3579_s30 + $0x850] sm:$0xff]  ;;  %2444 = vst [vmem:[%s3594_s17 + $0x810] sm:$0xff] %v1420_v7  ;;  %2445 = vst [vmem:[%s3594_s17 + $0x818] sm:$0xff] %v1421_v8  ;;  %v1426_v19 = vmul.f32 0.0, %v402_v16  ;;  %v1427_v20 = vmul.f32 0.0, %v403_v17  ;;  %v405_v22 = vld [vmem:[%s3579_s30 + $0x858] sm:$0xff] }
  0xba   : > { %2446 = vst [vmem:[%s3594_s17 + $0x820] sm:$0xff] %v1422_v9  ;;  %v1428_v21 = vmul.f32 0.0, %v404_v18  ;;  %v406_v23 = vld [vmem:[%s3579_s30 + $0x860] sm:$0xff]  ;;  %v407_v24 = vld [vmem:[%s3579_s30 + $0x868] sm:$0xff]  ;;  %2447 = vst [vmem:[%s3594_s17 + $0x828] sm:$0xff] %v1423_v13  ;;  %v1429_v25 = vmul.f32 0.0, %v405_v22 }
  0xbb   : > { %2448 = vst [vmem:[%s3594_s17 + $0x830] sm:$0xff] %v1424_v14  ;;  %2449 = vst [vmem:[%s3594_s17 + $0x838] sm:$0xff] %v1425_v15  ;;  %v1430_v26 = vmul.f32 0.0, %v406_v23  ;;  %v1431_v27 = vmul.f32 0.0, %v407_v24  ;;  %v408_v28 = vld [vmem:[%s3579_s30 + $0x870] sm:$0xff]  ;;  %v409_v29 = vld [vmem:[%s3579_s30 + $0x878] sm:$0xff] }
  0xbc   : > { %v410_v30 = vld [vmem:[%s3579_s30 + $0x880] sm:$0xff]  ;;  %2450 = vst [vmem:[%s3594_s17 + $0x840] sm:$0xff] %v1426_v19  ;;  %2451 = vst [vmem:[%s3594_s17 + $0x848] sm:$0xff] %v1427_v20  ;;  %v1432_v31 = vmul.f32 0.0, %v408_v28  ;;  %v1433_v32 = vmul.f32 0.0, %v409_v29  ;;  %v411_v34 = vld [vmem:[%s3579_s30 + $0x888] sm:$0xff] }
  0xbd   : > { %2452 = vst [vmem:[%s3594_s17 + $0x850] sm:$0xff] %v1428_v21  ;;  %v1434_v33 = vmul.f32 0.0, %v410_v30  ;;  %v412_v35 = vld [vmem:[%s3579_s30 + $0x890] sm:$0xff]  ;;  %v413_v36 = vld [vmem:[%s3579_s30 + $0x898] sm:$0xff]  ;;  %2453 = vst [vmem:[%s3594_s17 + $0x858] sm:$0xff] %v1429_v25  ;;  %v1435_v37 = vmul.f32 0.0, %v411_v34 }
  0xbe   : > { %2454 = vst [vmem:[%s3594_s17 + $0x860] sm:$0xff] %v1430_v26  ;;  %2455 = vst [vmem:[%s3594_s17 + $0x868] sm:$0xff] %v1431_v27  ;;  %v1436_v38 = vmul.f32 0.0, %v412_v35  ;;  %v1437_v39 = vmul.f32 0.0, %v413_v36  ;;  %v414_v40 = vld [vmem:[%s3579_s30 + $0x8a0] sm:$0xff]  ;;  %v415_v41 = vld [vmem:[%s3579_s30 + $0x8a8] sm:$0xff] }
  0xbf   : > { %v416_v42 = vld [vmem:[%s3579_s30 + $0x8b0] sm:$0xff]  ;;  %2456 = vst [vmem:[%s3594_s17 + $0x870] sm:$0xff] %v1432_v31  ;;  %2457 = vst [vmem:[%s3594_s17 + $0x878] sm:$0xff] %v1433_v32  ;;  %v1438_v43 = vmul.f32 0.0, %v414_v40  ;;  %v1439_v44 = vmul.f32 0.0, %v415_v41  ;;  %v417_v46 = vld [vmem:[%s3579_s30 + $0x8b8] sm:$0xff] }
  0xc0   : > { %2458 = vst [vmem:[%s3594_s17 + $0x880] sm:$0xff] %v1434_v33  ;;  %v1440_v45 = vmul.f32 0.0, %v416_v42  ;;  %v418_v47 = vld [vmem:[%s3579_s30 + $0x8c0] sm:$0xff]  ;;  %v419_v48 = vld [vmem:[%s3579_s30 + $0x8c8] sm:$0xff]  ;;  %2459 = vst [vmem:[%s3594_s17 + $0x888] sm:$0xff] %v1435_v37  ;;  %v1441_v49 = vmul.f32 0.0, %v417_v46 }
  0xc1   : > { %2460 = vst [vmem:[%s3594_s17 + $0x890] sm:$0xff] %v1436_v38  ;;  %2461 = vst [vmem:[%s3594_s17 + $0x898] sm:$0xff] %v1437_v39  ;;  %v1442_v50 = vmul.f32 0.0, %v418_v47  ;;  %v1443_v51 = vmul.f32 0.0, %v419_v48  ;;  %v420_v52 = vld [vmem:[%s3579_s30 + $0x8d0] sm:$0xff]  ;;  %v421_v53 = vld [vmem:[%s3579_s30 + $0x8d8] sm:$0xff] }
  0xc2   : > { %v422_v54 = vld [vmem:[%s3579_s30 + $0x8e0] sm:$0xff]  ;;  %2462 = vst [vmem:[%s3594_s17 + $0x8a0] sm:$0xff] %v1438_v43  ;;  %2463 = vst [vmem:[%s3594_s17 + $0x8a8] sm:$0xff] %v1439_v44  ;;  %v1444_v55 = vmul.f32 0.0, %v420_v52  ;;  %v1445_v56 = vmul.f32 0.0, %v421_v53  ;;  %v423_v58 = vld [vmem:[%s3579_s30 + $0x8e8] sm:$0xff] }
  0xc3   : > { %2464 = vst [vmem:[%s3594_s17 + $0x8b0] sm:$0xff] %v1440_v45  ;;  %v1446_v57 = vmul.f32 0.0, %v422_v54  ;;  %v424_v59 = vld [vmem:[%s3579_s30 + $0x8f0] sm:$0xff]  ;;  %v425_v60 = vld [vmem:[%s3579_s30 + $0x8f8] sm:$0xff]  ;;  %2465 = vst [vmem:[%s3594_s17 + $0x8b8] sm:$0xff] %v1441_v49  ;;  %v1447_v61 = vmul.f32 0.0, %v423_v58 }
  0xc4   : > { %2466 = vst [vmem:[%s3594_s17 + $0x8c0] sm:$0xff] %v1442_v50  ;;  %2467 = vst [vmem:[%s3594_s17 + $0x8c8] sm:$0xff] %v1443_v51  ;;  %v1448_v62 = vmul.f32 0.0, %v424_v59  ;;  %v1449_v63 = vmul.f32 0.0, %v425_v60  ;;  %v426_v0 = vld [vmem:[%s3579_s30 + $0x900] sm:$0xff]  ;;  %v427_v1 = vld [vmem:[%s3579_s30 + $0x908] sm:$0xff] }
  0xc5   : > { %v428_v2 = vld [vmem:[%s3579_s30 + $0x910] sm:$0xff]  ;;  %2468 = vst [vmem:[%s3594_s17 + $0x8d0] sm:$0xff] %v1444_v55  ;;  %2469 = vst [vmem:[%s3594_s17 + $0x8d8] sm:$0xff] %v1445_v56  ;;  %v1450_v3 = vmul.f32 0.0, %v426_v0  ;;  %v1451_v4 = vmul.f32 0.0, %v427_v1  ;;  %v429_v6 = vld [vmem:[%s3579_s30 + $0x918] sm:$0xff] }
  0xc6   : > { %2470 = vst [vmem:[%s3594_s17 + $0x8e0] sm:$0xff] %v1446_v57  ;;  %v1452_v5 = vmul.f32 0.0, %v428_v2  ;;  %v430_v7 = vld [vmem:[%s3579_s30 + $0x920] sm:$0xff]  ;;  %v431_v8 = vld [vmem:[%s3579_s30 + $0x928] sm:$0xff]  ;;  %2471 = vst [vmem:[%s3594_s17 + $0x8e8] sm:$0xff] %v1447_v61  ;;  %v1453_v9 = vmul.f32 0.0, %v429_v6 }
  0xc7   : > { %2472 = vst [vmem:[%s3594_s17 + $0x8f0] sm:$0xff] %v1448_v62  ;;  %2473 = vst [vmem:[%s3594_s17 + $0x8f8] sm:$0xff] %v1449_v63  ;;  %v1454_v10 = vmul.f32 0.0, %v430_v7  ;;  %v1455_v11 = vmul.f32 0.0, %v431_v8  ;;  %v432_v12 = vld [vmem:[%s3579_s30 + $0x930] sm:$0xff]  ;;  %v433_v13 = vld [vmem:[%s3579_s30 + $0x938] sm:$0xff] }
  0xc8   : > { %v434_v14 = vld [vmem:[%s3579_s30 + $0x940] sm:$0xff]  ;;  %2474 = vst [vmem:[%s3594_s17 + $0x900] sm:$0xff] %v1450_v3  ;;  %2475 = vst [vmem:[%s3594_s17 + $0x908] sm:$0xff] %v1451_v4  ;;  %v1456_v15 = vmul.f32 0.0, %v432_v12  ;;  %v1457_v16 = vmul.f32 0.0, %v433_v13  ;;  %v435_v18 = vld [vmem:[%s3579_s30 + $0x948] sm:$0xff] }
  0xc9   : > { %2476 = vst [vmem:[%s3594_s17 + $0x910] sm:$0xff] %v1452_v5  ;;  %v1458_v17 = vmul.f32 0.0, %v434_v14  ;;  %v436_v19 = vld [vmem:[%s3579_s30 + $0x950] sm:$0xff]  ;;  %v437_v20 = vld [vmem:[%s3579_s30 + $0x958] sm:$0xff]  ;;  %2477 = vst [vmem:[%s3594_s17 + $0x918] sm:$0xff] %v1453_v9  ;;  %v1459_v21 = vmul.f32 0.0, %v435_v18 }
  0xca   : > { %2478 = vst [vmem:[%s3594_s17 + $0x920] sm:$0xff] %v1454_v10  ;;  %2479 = vst [vmem:[%s3594_s17 + $0x928] sm:$0xff] %v1455_v11  ;;  %v1460_v22 = vmul.f32 0.0, %v436_v19  ;;  %v1461_v23 = vmul.f32 0.0, %v437_v20  ;;  %v438_v24 = vld [vmem:[%s3579_s30 + $0x960] sm:$0xff]  ;;  %v439_v25 = vld [vmem:[%s3579_s30 + $0x968] sm:$0xff] }
  0xcb   : > { %v440_v26 = vld [vmem:[%s3579_s30 + $0x970] sm:$0xff]  ;;  %2480 = vst [vmem:[%s3594_s17 + $0x930] sm:$0xff] %v1456_v15  ;;  %2481 = vst [vmem:[%s3594_s17 + $0x938] sm:$0xff] %v1457_v16  ;;  %v1462_v27 = vmul.f32 0.0, %v438_v24  ;;  %v1463_v28 = vmul.f32 0.0, %v439_v25  ;;  %v441_v30 = vld [vmem:[%s3579_s30 + $0x978] sm:$0xff] }
  0xcc   : > { %2482 = vst [vmem:[%s3594_s17 + $0x940] sm:$0xff] %v1458_v17  ;;  %v1464_v29 = vmul.f32 0.0, %v440_v26  ;;  %v442_v31 = vld [vmem:[%s3579_s30 + $0x980] sm:$0xff]  ;;  %v443_v32 = vld [vmem:[%s3579_s30 + $0x988] sm:$0xff]  ;;  %2483 = vst [vmem:[%s3594_s17 + $0x948] sm:$0xff] %v1459_v21  ;;  %v1465_v33 = vmul.f32 0.0, %v441_v30 }
  0xcd   : > { %2484 = vst [vmem:[%s3594_s17 + $0x950] sm:$0xff] %v1460_v22  ;;  %2485 = vst [vmem:[%s3594_s17 + $0x958] sm:$0xff] %v1461_v23  ;;  %v1466_v34 = vmul.f32 0.0, %v442_v31  ;;  %v1467_v35 = vmul.f32 0.0, %v443_v32  ;;  %v444_v36 = vld [vmem:[%s3579_s30 + $0x990] sm:$0xff]  ;;  %v445_v37 = vld [vmem:[%s3579_s30 + $0x998] sm:$0xff] }
  0xce   : > { %v446_v38 = vld [vmem:[%s3579_s30 + $0x9a0] sm:$0xff]  ;;  %2486 = vst [vmem:[%s3594_s17 + $0x960] sm:$0xff] %v1462_v27  ;;  %2487 = vst [vmem:[%s3594_s17 + $0x968] sm:$0xff] %v1463_v28  ;;  %v1468_v39 = vmul.f32 0.0, %v444_v36  ;;  %v1469_v40 = vmul.f32 0.0, %v445_v37  ;;  %v447_v42 = vld [vmem:[%s3579_s30 + $0x9a8] sm:$0xff] }
  0xcf   : > { %2488 = vst [vmem:[%s3594_s17 + $0x970] sm:$0xff] %v1464_v29  ;;  %v1470_v41 = vmul.f32 0.0, %v446_v38  ;;  %v448_v43 = vld [vmem:[%s3579_s30 + $0x9b0] sm:$0xff]  ;;  %v449_v44 = vld [vmem:[%s3579_s30 + $0x9b8] sm:$0xff]  ;;  %2489 = vst [vmem:[%s3594_s17 + $0x978] sm:$0xff] %v1465_v33  ;;  %v1471_v45 = vmul.f32 0.0, %v447_v42 }
  0xd0   : > { %2490 = vst [vmem:[%s3594_s17 + $0x980] sm:$0xff] %v1466_v34  ;;  %2491 = vst [vmem:[%s3594_s17 + $0x988] sm:$0xff] %v1467_v35  ;;  %v1472_v46 = vmul.f32 0.0, %v448_v43  ;;  %v1473_v47 = vmul.f32 0.0, %v449_v44  ;;  %v450_v48 = vld [vmem:[%s3579_s30 + $0x9c0] sm:$0xff]  ;;  %v451_v49 = vld [vmem:[%s3579_s30 + $0x9c8] sm:$0xff] }
  0xd1   : > { %v452_v50 = vld [vmem:[%s3579_s30 + $0x9d0] sm:$0xff]  ;;  %2492 = vst [vmem:[%s3594_s17 + $0x990] sm:$0xff] %v1468_v39  ;;  %2493 = vst [vmem:[%s3594_s17 + $0x998] sm:$0xff] %v1469_v40  ;;  %v1474_v51 = vmul.f32 0.0, %v450_v48  ;;  %v1475_v52 = vmul.f32 0.0, %v451_v49  ;;  %v453_v54 = vld [vmem:[%s3579_s30 + $0x9d8] sm:$0xff] }
  0xd2   : > { %2494 = vst [vmem:[%s3594_s17 + $0x9a0] sm:$0xff] %v1470_v41  ;;  %v1476_v53 = vmul.f32 0.0, %v452_v50  ;;  %v454_v55 = vld [vmem:[%s3579_s30 + $0x9e0] sm:$0xff]  ;;  %v455_v56 = vld [vmem:[%s3579_s30 + $0x9e8] sm:$0xff]  ;;  %2495 = vst [vmem:[%s3594_s17 + $0x9a8] sm:$0xff] %v1471_v45  ;;  %v1477_v57 = vmul.f32 0.0, %v453_v54 }
  0xd3   : > { %2496 = vst [vmem:[%s3594_s17 + $0x9b0] sm:$0xff] %v1472_v46  ;;  %2497 = vst [vmem:[%s3594_s17 + $0x9b8] sm:$0xff] %v1473_v47  ;;  %v1478_v58 = vmul.f32 0.0, %v454_v55  ;;  %v1479_v59 = vmul.f32 0.0, %v455_v56  ;;  %v456_v60 = vld [vmem:[%s3579_s30 + $0x9f0] sm:$0xff]  ;;  %v457_v61 = vld [vmem:[%s3579_s30 + $0x9f8] sm:$0xff] }
  0xd4   : > { %v458_v62 = vld [vmem:[%s3579_s30 + $0xa00] sm:$0xff]  ;;  %2498 = vst [vmem:[%s3594_s17 + $0x9c0] sm:$0xff] %v1474_v51  ;;  %2499 = vst [vmem:[%s3594_s17 + $0x9c8] sm:$0xff] %v1475_v52  ;;  %v1480_v63 = vmul.f32 0.0, %v456_v60  ;;  %v1481_v0 = vmul.f32 0.0, %v457_v61  ;;  %v459_v2 = vld [vmem:[%s3579_s30 + $0xa08] sm:$0xff] }
  0xd5   : > { %2500 = vst [vmem:[%s3594_s17 + $0x9d0] sm:$0xff] %v1476_v53  ;;  %v1482_v1 = vmul.f32 0.0, %v458_v62  ;;  %v460_v3 = vld [vmem:[%s3579_s30 + $0xa10] sm:$0xff]  ;;  %v461_v4 = vld [vmem:[%s3579_s30 + $0xa18] sm:$0xff]  ;;  %2501 = vst [vmem:[%s3594_s17 + $0x9d8] sm:$0xff] %v1477_v57  ;;  %v1483_v5 = vmul.f32 0.0, %v459_v2 }
  0xd6   : > { %2502 = vst [vmem:[%s3594_s17 + $0x9e0] sm:$0xff] %v1478_v58  ;;  %2503 = vst [vmem:[%s3594_s17 + $0x9e8] sm:$0xff] %v1479_v59  ;;  %v1484_v6 = vmul.f32 0.0, %v460_v3  ;;  %v1485_v7 = vmul.f32 0.0, %v461_v4  ;;  %v462_v8 = vld [vmem:[%s3579_s30 + $0xa20] sm:$0xff]  ;;  %v463_v9 = vld [vmem:[%s3579_s30 + $0xa28] sm:$0xff] }
  0xd7   : > { %v464_v10 = vld [vmem:[%s3579_s30 + $0xa30] sm:$0xff]  ;;  %2504 = vst [vmem:[%s3594_s17 + $0x9f0] sm:$0xff] %v1480_v63  ;;  %2505 = vst [vmem:[%s3594_s17 + $0x9f8] sm:$0xff] %v1481_v0  ;;  %v1486_v11 = vmul.f32 0.0, %v462_v8  ;;  %v1487_v12 = vmul.f32 0.0, %v463_v9  ;;  %v465_v14 = vld [vmem:[%s3579_s30 + $0xa38] sm:$0xff] }
  0xd8   : > { %2506 = vst [vmem:[%s3594_s17 + $0xa00] sm:$0xff] %v1482_v1  ;;  %v1488_v13 = vmul.f32 0.0, %v464_v10  ;;  %v466_v15 = vld [vmem:[%s3579_s30 + $0xa40] sm:$0xff]  ;;  %v467_v16 = vld [vmem:[%s3579_s30 + $0xa48] sm:$0xff]  ;;  %2507 = vst [vmem:[%s3594_s17 + $0xa08] sm:$0xff] %v1483_v5  ;;  %v1489_v17 = vmul.f32 0.0, %v465_v14 }
  0xd9   : > { %2508 = vst [vmem:[%s3594_s17 + $0xa10] sm:$0xff] %v1484_v6  ;;  %2509 = vst [vmem:[%s3594_s17 + $0xa18] sm:$0xff] %v1485_v7  ;;  %v1490_v18 = vmul.f32 0.0, %v466_v15  ;;  %v1491_v19 = vmul.f32 0.0, %v467_v16  ;;  %v468_v20 = vld [vmem:[%s3579_s30 + $0xa50] sm:$0xff]  ;;  %v469_v21 = vld [vmem:[%s3579_s30 + $0xa58] sm:$0xff] }
  0xda   : > { %v470_v22 = vld [vmem:[%s3579_s30 + $0xa60] sm:$0xff]  ;;  %2510 = vst [vmem:[%s3594_s17 + $0xa20] sm:$0xff] %v1486_v11  ;;  %2511 = vst [vmem:[%s3594_s17 + $0xa28] sm:$0xff] %v1487_v12  ;;  %v1492_v23 = vmul.f32 0.0, %v468_v20  ;;  %v1493_v24 = vmul.f32 0.0, %v469_v21  ;;  %v471_v26 = vld [vmem:[%s3579_s30 + $0xa68] sm:$0xff] }
  0xdb   : > { %2512 = vst [vmem:[%s3594_s17 + $0xa30] sm:$0xff] %v1488_v13  ;;  %v1494_v25 = vmul.f32 0.0, %v470_v22  ;;  %v472_v27 = vld [vmem:[%s3579_s30 + $0xa70] sm:$0xff]  ;;  %v473_v28 = vld [vmem:[%s3579_s30 + $0xa78] sm:$0xff]  ;;  %2513 = vst [vmem:[%s3594_s17 + $0xa38] sm:$0xff] %v1489_v17  ;;  %v1495_v29 = vmul.f32 0.0, %v471_v26 }
  0xdc   : > { %2514 = vst [vmem:[%s3594_s17 + $0xa40] sm:$0xff] %v1490_v18  ;;  %2515 = vst [vmem:[%s3594_s17 + $0xa48] sm:$0xff] %v1491_v19  ;;  %v1496_v30 = vmul.f32 0.0, %v472_v27  ;;  %v1497_v31 = vmul.f32 0.0, %v473_v28  ;;  %v474_v32 = vld [vmem:[%s3579_s30 + $0xa80] sm:$0xff]  ;;  %v475_v33 = vld [vmem:[%s3579_s30 + $0xa88] sm:$0xff] }
  0xdd   : > { %v476_v34 = vld [vmem:[%s3579_s30 + $0xa90] sm:$0xff]  ;;  %2516 = vst [vmem:[%s3594_s17 + $0xa50] sm:$0xff] %v1492_v23  ;;  %2517 = vst [vmem:[%s3594_s17 + $0xa58] sm:$0xff] %v1493_v24  ;;  %v1498_v35 = vmul.f32 0.0, %v474_v32  ;;  %v1499_v36 = vmul.f32 0.0, %v475_v33  ;;  %v477_v38 = vld [vmem:[%s3579_s30 + $0xa98] sm:$0xff] }
  0xde   : > { %2518 = vst [vmem:[%s3594_s17 + $0xa60] sm:$0xff] %v1494_v25  ;;  %v1500_v37 = vmul.f32 0.0, %v476_v34  ;;  %v478_v39 = vld [vmem:[%s3579_s30 + $0xaa0] sm:$0xff]  ;;  %v479_v40 = vld [vmem:[%s3579_s30 + $0xaa8] sm:$0xff]  ;;  %2519 = vst [vmem:[%s3594_s17 + $0xa68] sm:$0xff] %v1495_v29  ;;  %v1501_v41 = vmul.f32 0.0, %v477_v38 }
  0xdf   : > { %2520 = vst [vmem:[%s3594_s17 + $0xa70] sm:$0xff] %v1496_v30  ;;  %2521 = vst [vmem:[%s3594_s17 + $0xa78] sm:$0xff] %v1497_v31  ;;  %v1502_v42 = vmul.f32 0.0, %v478_v39  ;;  %v1503_v43 = vmul.f32 0.0, %v479_v40  ;;  %v480_v44 = vld [vmem:[%s3579_s30 + $0xab0] sm:$0xff]  ;;  %v481_v45 = vld [vmem:[%s3579_s30 + $0xab8] sm:$0xff] }
  0xe0   : > { %v482_v46 = vld [vmem:[%s3579_s30 + $0xac0] sm:$0xff]  ;;  %2522 = vst [vmem:[%s3594_s17 + $0xa80] sm:$0xff] %v1498_v35  ;;  %2523 = vst [vmem:[%s3594_s17 + $0xa88] sm:$0xff] %v1499_v36  ;;  %v1504_v47 = vmul.f32 0.0, %v480_v44  ;;  %v1505_v48 = vmul.f32 0.0, %v481_v45  ;;  %v483_v50 = vld [vmem:[%s3579_s30 + $0xac8] sm:$0xff] }
  0xe1   : > { %2524 = vst [vmem:[%s3594_s17 + $0xa90] sm:$0xff] %v1500_v37  ;;  %v1506_v49 = vmul.f32 0.0, %v482_v46  ;;  %v484_v51 = vld [vmem:[%s3579_s30 + $0xad0] sm:$0xff]  ;;  %v485_v52 = vld [vmem:[%s3579_s30 + $0xad8] sm:$0xff]  ;;  %2525 = vst [vmem:[%s3594_s17 + $0xa98] sm:$0xff] %v1501_v41  ;;  %v1507_v53 = vmul.f32 0.0, %v483_v50 }
  0xe2   : > { %2526 = vst [vmem:[%s3594_s17 + $0xaa0] sm:$0xff] %v1502_v42  ;;  %2527 = vst [vmem:[%s3594_s17 + $0xaa8] sm:$0xff] %v1503_v43  ;;  %v1508_v54 = vmul.f32 0.0, %v484_v51  ;;  %v1509_v55 = vmul.f32 0.0, %v485_v52  ;;  %v486_v56 = vld [vmem:[%s3579_s30 + $0xae0] sm:$0xff]  ;;  %v487_v57 = vld [vmem:[%s3579_s30 + $0xae8] sm:$0xff] }
  0xe3   : > { %v488_v58 = vld [vmem:[%s3579_s30 + $0xaf0] sm:$0xff]  ;;  %2528 = vst [vmem:[%s3594_s17 + $0xab0] sm:$0xff] %v1504_v47  ;;  %2529 = vst [vmem:[%s3594_s17 + $0xab8] sm:$0xff] %v1505_v48  ;;  %v1510_v59 = vmul.f32 0.0, %v486_v56  ;;  %v1511_v60 = vmul.f32 0.0, %v487_v57  ;;  %v489_v62 = vld [vmem:[%s3579_s30 + $0xaf8] sm:$0xff] }
  0xe4   : > { %2530 = vst [vmem:[%s3594_s17 + $0xac0] sm:$0xff] %v1506_v49  ;;  %v1512_v61 = vmul.f32 0.0, %v488_v58  ;;  %v490_v63 = vld [vmem:[%s3579_s30 + $0xb00] sm:$0xff]  ;;  %v491_v0 = vld [vmem:[%s3579_s30 + $0xb08] sm:$0xff]  ;;  %2531 = vst [vmem:[%s3594_s17 + $0xac8] sm:$0xff] %v1507_v53  ;;  %v1513_v1 = vmul.f32 0.0, %v489_v62 }
  0xe5   : > { %2532 = vst [vmem:[%s3594_s17 + $0xad0] sm:$0xff] %v1508_v54  ;;  %2533 = vst [vmem:[%s3594_s17 + $0xad8] sm:$0xff] %v1509_v55  ;;  %v1514_v2 = vmul.f32 0.0, %v490_v63  ;;  %v1515_v3 = vmul.f32 0.0, %v491_v0  ;;  %v492_v4 = vld [vmem:[%s3579_s30 + $0xb10] sm:$0xff]  ;;  %v493_v5 = vld [vmem:[%s3579_s30 + $0xb18] sm:$0xff] }
  0xe6   : > { %v494_v6 = vld [vmem:[%s3579_s30 + $0xb20] sm:$0xff]  ;;  %2534 = vst [vmem:[%s3594_s17 + $0xae0] sm:$0xff] %v1510_v59  ;;  %2535 = vst [vmem:[%s3594_s17 + $0xae8] sm:$0xff] %v1511_v60  ;;  %v1516_v7 = vmul.f32 0.0, %v492_v4  ;;  %v1517_v8 = vmul.f32 0.0, %v493_v5  ;;  %v495_v10 = vld [vmem:[%s3579_s30 + $0xb28] sm:$0xff] }
  0xe7   : > { %2536 = vst [vmem:[%s3594_s17 + $0xaf0] sm:$0xff] %v1512_v61  ;;  %v1518_v9 = vmul.f32 0.0, %v494_v6  ;;  %v496_v11 = vld [vmem:[%s3579_s30 + $0xb30] sm:$0xff]  ;;  %v497_v12 = vld [vmem:[%s3579_s30 + $0xb38] sm:$0xff]  ;;  %2537 = vst [vmem:[%s3594_s17 + $0xaf8] sm:$0xff] %v1513_v1  ;;  %v1519_v13 = vmul.f32 0.0, %v495_v10 }
  0xe8   : > { %2538 = vst [vmem:[%s3594_s17 + $0xb00] sm:$0xff] %v1514_v2  ;;  %2539 = vst [vmem:[%s3594_s17 + $0xb08] sm:$0xff] %v1515_v3  ;;  %v1520_v14 = vmul.f32 0.0, %v496_v11  ;;  %v1521_v15 = vmul.f32 0.0, %v497_v12  ;;  %v498_v16 = vld [vmem:[%s3579_s30 + $0xb40] sm:$0xff]  ;;  %v499_v17 = vld [vmem:[%s3579_s30 + $0xb48] sm:$0xff] }
  0xe9   : > { %v500_v18 = vld [vmem:[%s3579_s30 + $0xb50] sm:$0xff]  ;;  %2540 = vst [vmem:[%s3594_s17 + $0xb10] sm:$0xff] %v1516_v7  ;;  %2541 = vst [vmem:[%s3594_s17 + $0xb18] sm:$0xff] %v1517_v8  ;;  %v1522_v19 = vmul.f32 0.0, %v498_v16  ;;  %v1523_v20 = vmul.f32 0.0, %v499_v17  ;;  %v501_v22 = vld [vmem:[%s3579_s30 + $0xb58] sm:$0xff] }
  0xea   : > { %2542 = vst [vmem:[%s3594_s17 + $0xb20] sm:$0xff] %v1518_v9  ;;  %v1524_v21 = vmul.f32 0.0, %v500_v18  ;;  %v502_v23 = vld [vmem:[%s3579_s30 + $0xb60] sm:$0xff]  ;;  %v503_v24 = vld [vmem:[%s3579_s30 + $0xb68] sm:$0xff]  ;;  %2543 = vst [vmem:[%s3594_s17 + $0xb28] sm:$0xff] %v1519_v13  ;;  %v1525_v25 = vmul.f32 0.0, %v501_v22 }
  0xeb   : > { %2544 = vst [vmem:[%s3594_s17 + $0xb30] sm:$0xff] %v1520_v14  ;;  %2545 = vst [vmem:[%s3594_s17 + $0xb38] sm:$0xff] %v1521_v15  ;;  %v1526_v26 = vmul.f32 0.0, %v502_v23  ;;  %v1527_v27 = vmul.f32 0.0, %v503_v24  ;;  %v504_v28 = vld [vmem:[%s3579_s30 + $0xb70] sm:$0xff]  ;;  %v505_v29 = vld [vmem:[%s3579_s30 + $0xb78] sm:$0xff] }
  0xec   : > { %v506_v30 = vld [vmem:[%s3579_s30 + $0xb80] sm:$0xff]  ;;  %2546 = vst [vmem:[%s3594_s17 + $0xb40] sm:$0xff] %v1522_v19  ;;  %2547 = vst [vmem:[%s3594_s17 + $0xb48] sm:$0xff] %v1523_v20  ;;  %v1528_v31 = vmul.f32 0.0, %v504_v28  ;;  %v1529_v32 = vmul.f32 0.0, %v505_v29  ;;  %v507_v34 = vld [vmem:[%s3579_s30 + $0xb88] sm:$0xff] }
  0xed   : > { %2548 = vst [vmem:[%s3594_s17 + $0xb50] sm:$0xff] %v1524_v21  ;;  %v1530_v33 = vmul.f32 0.0, %v506_v30  ;;  %v508_v35 = vld [vmem:[%s3579_s30 + $0xb90] sm:$0xff]  ;;  %v509_v36 = vld [vmem:[%s3579_s30 + $0xb98] sm:$0xff]  ;;  %2549 = vst [vmem:[%s3594_s17 + $0xb58] sm:$0xff] %v1525_v25  ;;  %v1531_v37 = vmul.f32 0.0, %v507_v34 }
  0xee   : > { %2550 = vst [vmem:[%s3594_s17 + $0xb60] sm:$0xff] %v1526_v26  ;;  %2551 = vst [vmem:[%s3594_s17 + $0xb68] sm:$0xff] %v1527_v27  ;;  %v1532_v38 = vmul.f32 0.0, %v508_v35  ;;  %v1533_v39 = vmul.f32 0.0, %v509_v36  ;;  %v510_v40 = vld [vmem:[%s3579_s30 + $0xba0] sm:$0xff]  ;;  %v511_v41 = vld [vmem:[%s3579_s30 + $0xba8] sm:$0xff] }
  0xef   : > { %v512_v42 = vld [vmem:[%s3579_s30 + $0xbb0] sm:$0xff]  ;;  %2552 = vst [vmem:[%s3594_s17 + $0xb70] sm:$0xff] %v1528_v31  ;;  %2553 = vst [vmem:[%s3594_s17 + $0xb78] sm:$0xff] %v1529_v32  ;;  %v1534_v43 = vmul.f32 0.0, %v510_v40  ;;  %v1535_v44 = vmul.f32 0.0, %v511_v41  ;;  %v513_v46 = vld [vmem:[%s3579_s30 + $0xbb8] sm:$0xff] }
  0xf0   : > { %2554 = vst [vmem:[%s3594_s17 + $0xb80] sm:$0xff] %v1530_v33  ;;  %v1536_v45 = vmul.f32 0.0, %v512_v42  ;;  %v514_v47 = vld [vmem:[%s3579_s30 + $0xbc0] sm:$0xff]  ;;  %v515_v48 = vld [vmem:[%s3579_s30 + $0xbc8] sm:$0xff]  ;;  %2555 = vst [vmem:[%s3594_s17 + $0xb88] sm:$0xff] %v1531_v37  ;;  %v1537_v49 = vmul.f32 0.0, %v513_v46 }
  0xf1   : > { %2556 = vst [vmem:[%s3594_s17 + $0xb90] sm:$0xff] %v1532_v38  ;;  %2557 = vst [vmem:[%s3594_s17 + $0xb98] sm:$0xff] %v1533_v39  ;;  %v1538_v50 = vmul.f32 0.0, %v514_v47  ;;  %v1539_v51 = vmul.f32 0.0, %v515_v48  ;;  %v516_v52 = vld [vmem:[%s3579_s30 + $0xbd0] sm:$0xff]  ;;  %v517_v53 = vld [vmem:[%s3579_s30 + $0xbd8] sm:$0xff] }
  0xf2   : > { %v518_v54 = vld [vmem:[%s3579_s30 + $0xbe0] sm:$0xff]  ;;  %2558 = vst [vmem:[%s3594_s17 + $0xba0] sm:$0xff] %v1534_v43  ;;  %2559 = vst [vmem:[%s3594_s17 + $0xba8] sm:$0xff] %v1535_v44  ;;  %v1540_v55 = vmul.f32 0.0, %v516_v52  ;;  %v1541_v56 = vmul.f32 0.0, %v517_v53  ;;  %v519_v58 = vld [vmem:[%s3579_s30 + $0xbe8] sm:$0xff] }
  0xf3   : > { %2560 = vst [vmem:[%s3594_s17 + $0xbb0] sm:$0xff] %v1536_v45  ;;  %v1542_v57 = vmul.f32 0.0, %v518_v54  ;;  %v520_v59 = vld [vmem:[%s3579_s30 + $0xbf0] sm:$0xff]  ;;  %v521_v60 = vld [vmem:[%s3579_s30 + $0xbf8] sm:$0xff]  ;;  %2561 = vst [vmem:[%s3594_s17 + $0xbb8] sm:$0xff] %v1537_v49  ;;  %v1543_v61 = vmul.f32 0.0, %v519_v58 }
  0xf4   : > { %2562 = vst [vmem:[%s3594_s17 + $0xbc0] sm:$0xff] %v1538_v50  ;;  %2563 = vst [vmem:[%s3594_s17 + $0xbc8] sm:$0xff] %v1539_v51  ;;  %v1544_v62 = vmul.f32 0.0, %v520_v59  ;;  %v1545_v63 = vmul.f32 0.0, %v521_v60  ;;  %v522_v0 = vld [vmem:[%s3579_s30 + $0xc00] sm:$0xff]  ;;  %v523_v1 = vld [vmem:[%s3579_s30 + $0xc08] sm:$0xff] }
  0xf5   : > { %v524_v2 = vld [vmem:[%s3579_s30 + $0xc10] sm:$0xff]  ;;  %2564 = vst [vmem:[%s3594_s17 + $0xbd0] sm:$0xff] %v1540_v55  ;;  %2565 = vst [vmem:[%s3594_s17 + $0xbd8] sm:$0xff] %v1541_v56  ;;  %v1546_v3 = vmul.f32 0.0, %v522_v0  ;;  %v1547_v4 = vmul.f32 0.0, %v523_v1  ;;  %v525_v6 = vld [vmem:[%s3579_s30 + $0xc18] sm:$0xff] }
  0xf6   : > { %2566 = vst [vmem:[%s3594_s17 + $0xbe0] sm:$0xff] %v1542_v57  ;;  %v1548_v5 = vmul.f32 0.0, %v524_v2  ;;  %v526_v7 = vld [vmem:[%s3579_s30 + $0xc20] sm:$0xff]  ;;  %v527_v8 = vld [vmem:[%s3579_s30 + $0xc28] sm:$0xff]  ;;  %2567 = vst [vmem:[%s3594_s17 + $0xbe8] sm:$0xff] %v1543_v61  ;;  %v1549_v9 = vmul.f32 0.0, %v525_v6 }
  0xf7   : > { %2568 = vst [vmem:[%s3594_s17 + $0xbf0] sm:$0xff] %v1544_v62  ;;  %2569 = vst [vmem:[%s3594_s17 + $0xbf8] sm:$0xff] %v1545_v63  ;;  %v1550_v10 = vmul.f32 0.0, %v526_v7  ;;  %v1551_v11 = vmul.f32 0.0, %v527_v8  ;;  %v528_v12 = vld [vmem:[%s3579_s30 + $0xc30] sm:$0xff]  ;;  %v529_v13 = vld [vmem:[%s3579_s30 + $0xc38] sm:$0xff] }
  0xf8   : > { %v530_v14 = vld [vmem:[%s3579_s30 + $0xc40] sm:$0xff]  ;;  %2570 = vst [vmem:[%s3594_s17 + $0xc00] sm:$0xff] %v1546_v3  ;;  %2571 = vst [vmem:[%s3594_s17 + $0xc08] sm:$0xff] %v1547_v4  ;;  %v1552_v15 = vmul.f32 0.0, %v528_v12  ;;  %v1553_v16 = vmul.f32 0.0, %v529_v13  ;;  %v531_v18 = vld [vmem:[%s3579_s30 + $0xc48] sm:$0xff] }
  0xf9   : > { %2572 = vst [vmem:[%s3594_s17 + $0xc10] sm:$0xff] %v1548_v5  ;;  %v1554_v17 = vmul.f32 0.0, %v530_v14  ;;  %v532_v19 = vld [vmem:[%s3579_s30 + $0xc50] sm:$0xff]  ;;  %v533_v20 = vld [vmem:[%s3579_s30 + $0xc58] sm:$0xff]  ;;  %2573 = vst [vmem:[%s3594_s17 + $0xc18] sm:$0xff] %v1549_v9  ;;  %v1555_v21 = vmul.f32 0.0, %v531_v18 }
  0xfa   : > { %2574 = vst [vmem:[%s3594_s17 + $0xc20] sm:$0xff] %v1550_v10  ;;  %2575 = vst [vmem:[%s3594_s17 + $0xc28] sm:$0xff] %v1551_v11  ;;  %v1556_v22 = vmul.f32 0.0, %v532_v19  ;;  %v1557_v23 = vmul.f32 0.0, %v533_v20  ;;  %v534_v24 = vld [vmem:[%s3579_s30 + $0xc60] sm:$0xff]  ;;  %v535_v25 = vld [vmem:[%s3579_s30 + $0xc68] sm:$0xff] }
  0xfb   : > { %v536_v26 = vld [vmem:[%s3579_s30 + $0xc70] sm:$0xff]  ;;  %2576 = vst [vmem:[%s3594_s17 + $0xc30] sm:$0xff] %v1552_v15  ;;  %2577 = vst [vmem:[%s3594_s17 + $0xc38] sm:$0xff] %v1553_v16  ;;  %v1558_v27 = vmul.f32 0.0, %v534_v24  ;;  %v1559_v28 = vmul.f32 0.0, %v535_v25  ;;  %v537_v30 = vld [vmem:[%s3579_s30 + $0xc78] sm:$0xff] }
  0xfc   : > { %2578 = vst [vmem:[%s3594_s17 + $0xc40] sm:$0xff] %v1554_v17  ;;  %v1560_v29 = vmul.f32 0.0, %v536_v26  ;;  %v538_v31 = vld [vmem:[%s3579_s30 + $0xc80] sm:$0xff]  ;;  %v539_v32 = vld [vmem:[%s3579_s30 + $0xc88] sm:$0xff]  ;;  %2579 = vst [vmem:[%s3594_s17 + $0xc48] sm:$0xff] %v1555_v21  ;;  %v1561_v33 = vmul.f32 0.0, %v537_v30 }
  0xfd   : > { %2580 = vst [vmem:[%s3594_s17 + $0xc50] sm:$0xff] %v1556_v22  ;;  %2581 = vst [vmem:[%s3594_s17 + $0xc58] sm:$0xff] %v1557_v23  ;;  %v1562_v34 = vmul.f32 0.0, %v538_v31  ;;  %v1563_v35 = vmul.f32 0.0, %v539_v32  ;;  %v540_v36 = vld [vmem:[%s3579_s30 + $0xc90] sm:$0xff]  ;;  %v541_v37 = vld [vmem:[%s3579_s30 + $0xc98] sm:$0xff] }
  0xfe   : > { %v542_v38 = vld [vmem:[%s3579_s30 + $0xca0] sm:$0xff]  ;;  %2582 = vst [vmem:[%s3594_s17 + $0xc60] sm:$0xff] %v1558_v27  ;;  %2583 = vst [vmem:[%s3594_s17 + $0xc68] sm:$0xff] %v1559_v28  ;;  %v1564_v39 = vmul.f32 0.0, %v540_v36  ;;  %v1565_v40 = vmul.f32 0.0, %v541_v37  ;;  %v543_v42 = vld [vmem:[%s3579_s30 + $0xca8] sm:$0xff] }
  0xff   : > { %2584 = vst [vmem:[%s3594_s17 + $0xc70] sm:$0xff] %v1560_v29  ;;  %v1566_v41 = vmul.f32 0.0, %v542_v38  ;;  %v544_v43 = vld [vmem:[%s3579_s30 + $0xcb0] sm:$0xff]  ;;  %v545_v44 = vld [vmem:[%s3579_s30 + $0xcb8] sm:$0xff]  ;;  %2585 = vst [vmem:[%s3594_s17 + $0xc78] sm:$0xff] %v1561_v33  ;;  %v1567_v45 = vmul.f32 0.0, %v543_v42 }
 0x100   : > { %2586 = vst [vmem:[%s3594_s17 + $0xc80] sm:$0xff] %v1562_v34  ;;  %2587 = vst [vmem:[%s3594_s17 + $0xc88] sm:$0xff] %v1563_v35  ;;  %v1568_v46 = vmul.f32 0.0, %v544_v43  ;;  %v1569_v47 = vmul.f32 0.0, %v545_v44  ;;  %v546_v48 = vld [vmem:[%s3579_s30 + $0xcc0] sm:$0xff]  ;;  %v547_v49 = vld [vmem:[%s3579_s30 + $0xcc8] sm:$0xff] }
 0x101   : > { %v548_v50 = vld [vmem:[%s3579_s30 + $0xcd0] sm:$0xff]  ;;  %2588 = vst [vmem:[%s3594_s17 + $0xc90] sm:$0xff] %v1564_v39  ;;  %2589 = vst [vmem:[%s3594_s17 + $0xc98] sm:$0xff] %v1565_v40  ;;  %v1570_v51 = vmul.f32 0.0, %v546_v48  ;;  %v1571_v52 = vmul.f32 0.0, %v547_v49  ;;  %v549_v54 = vld [vmem:[%s3579_s30 + $0xcd8] sm:$0xff] }
 0x102   : > { %2590 = vst [vmem:[%s3594_s17 + $0xca0] sm:$0xff] %v1566_v41  ;;  %v1572_v53 = vmul.f32 0.0, %v548_v50  ;;  %v550_v55 = vld [vmem:[%s3579_s30 + $0xce0] sm:$0xff]  ;;  %v551_v56 = vld [vmem:[%s3579_s30 + $0xce8] sm:$0xff]  ;;  %2591 = vst [vmem:[%s3594_s17 + $0xca8] sm:$0xff] %v1567_v45  ;;  %v1573_v57 = vmul.f32 0.0, %v549_v54 }
 0x103   : > { %2592 = vst [vmem:[%s3594_s17 + $0xcb0] sm:$0xff] %v1568_v46  ;;  %2593 = vst [vmem:[%s3594_s17 + $0xcb8] sm:$0xff] %v1569_v47  ;;  %v1574_v58 = vmul.f32 0.0, %v550_v55  ;;  %v1575_v59 = vmul.f32 0.0, %v551_v56  ;;  %v552_v60 = vld [vmem:[%s3579_s30 + $0xcf0] sm:$0xff]  ;;  %v553_v61 = vld [vmem:[%s3579_s30 + $0xcf8] sm:$0xff] }
 0x104   : > { %v554_v62 = vld [vmem:[%s3579_s30 + $0xd00] sm:$0xff]  ;;  %2594 = vst [vmem:[%s3594_s17 + $0xcc0] sm:$0xff] %v1570_v51  ;;  %2595 = vst [vmem:[%s3594_s17 + $0xcc8] sm:$0xff] %v1571_v52  ;;  %v1576_v63 = vmul.f32 0.0, %v552_v60  ;;  %v1577_v0 = vmul.f32 0.0, %v553_v61  ;;  %v555_v2 = vld [vmem:[%s3579_s30 + $0xd08] sm:$0xff] }
 0x105   : > { %2596 = vst [vmem:[%s3594_s17 + $0xcd0] sm:$0xff] %v1572_v53  ;;  %v1578_v1 = vmul.f32 0.0, %v554_v62  ;;  %v556_v3 = vld [vmem:[%s3579_s30 + $0xd10] sm:$0xff]  ;;  %v557_v4 = vld [vmem:[%s3579_s30 + $0xd18] sm:$0xff]  ;;  %2597 = vst [vmem:[%s3594_s17 + $0xcd8] sm:$0xff] %v1573_v57  ;;  %v1579_v5 = vmul.f32 0.0, %v555_v2 }
 0x106   : > { %2598 = vst [vmem:[%s3594_s17 + $0xce0] sm:$0xff] %v1574_v58  ;;  %2599 = vst [vmem:[%s3594_s17 + $0xce8] sm:$0xff] %v1575_v59  ;;  %v1580_v6 = vmul.f32 0.0, %v556_v3  ;;  %v1581_v7 = vmul.f32 0.0, %v557_v4  ;;  %v558_v8 = vld [vmem:[%s3579_s30 + $0xd20] sm:$0xff]  ;;  %v559_v9 = vld [vmem:[%s3579_s30 + $0xd28] sm:$0xff] }
 0x107   : > { %v560_v10 = vld [vmem:[%s3579_s30 + $0xd30] sm:$0xff]  ;;  %2600 = vst [vmem:[%s3594_s17 + $0xcf0] sm:$0xff] %v1576_v63  ;;  %2601 = vst [vmem:[%s3594_s17 + $0xcf8] sm:$0xff] %v1577_v0  ;;  %v1582_v11 = vmul.f32 0.0, %v558_v8  ;;  %v1583_v12 = vmul.f32 0.0, %v559_v9  ;;  %v561_v14 = vld [vmem:[%s3579_s30 + $0xd38] sm:$0xff] }
 0x108   : > { %2602 = vst [vmem:[%s3594_s17 + $0xd00] sm:$0xff] %v1578_v1  ;;  %v1584_v13 = vmul.f32 0.0, %v560_v10  ;;  %v562_v15 = vld [vmem:[%s3579_s30 + $0xd40] sm:$0xff]  ;;  %v563_v16 = vld [vmem:[%s3579_s30 + $0xd48] sm:$0xff]  ;;  %2603 = vst [vmem:[%s3594_s17 + $0xd08] sm:$0xff] %v1579_v5  ;;  %v1585_v17 = vmul.f32 0.0, %v561_v14 }
 0x109   : > { %2604 = vst [vmem:[%s3594_s17 + $0xd10] sm:$0xff] %v1580_v6  ;;  %2605 = vst [vmem:[%s3594_s17 + $0xd18] sm:$0xff] %v1581_v7  ;;  %v1586_v18 = vmul.f32 0.0, %v562_v15  ;;  %v1587_v19 = vmul.f32 0.0, %v563_v16  ;;  %v564_v20 = vld [vmem:[%s3579_s30 + $0xd50] sm:$0xff]  ;;  %v565_v21 = vld [vmem:[%s3579_s30 + $0xd58] sm:$0xff] }
 0x10a   : > { %v566_v22 = vld [vmem:[%s3579_s30 + $0xd60] sm:$0xff]  ;;  %2606 = vst [vmem:[%s3594_s17 + $0xd20] sm:$0xff] %v1582_v11  ;;  %2607 = vst [vmem:[%s3594_s17 + $0xd28] sm:$0xff] %v1583_v12  ;;  %v1588_v23 = vmul.f32 0.0, %v564_v20  ;;  %v1589_v24 = vmul.f32 0.0, %v565_v21  ;;  %v567_v26 = vld [vmem:[%s3579_s30 + $0xd68] sm:$0xff] }
 0x10b   : > { %2608 = vst [vmem:[%s3594_s17 + $0xd30] sm:$0xff] %v1584_v13  ;;  %v1590_v25 = vmul.f32 0.0, %v566_v22  ;;  %v568_v27 = vld [vmem:[%s3579_s30 + $0xd70] sm:$0xff]  ;;  %v569_v28 = vld [vmem:[%s3579_s30 + $0xd78] sm:$0xff]  ;;  %2609 = vst [vmem:[%s3594_s17 + $0xd38] sm:$0xff] %v1585_v17  ;;  %v1591_v29 = vmul.f32 0.0, %v567_v26 }
 0x10c   : > { %2610 = vst [vmem:[%s3594_s17 + $0xd40] sm:$0xff] %v1586_v18  ;;  %2611 = vst [vmem:[%s3594_s17 + $0xd48] sm:$0xff] %v1587_v19  ;;  %v1592_v30 = vmul.f32 0.0, %v568_v27  ;;  %v1593_v31 = vmul.f32 0.0, %v569_v28  ;;  %v570_v32 = vld [vmem:[%s3579_s30 + $0xd80] sm:$0xff]  ;;  %v571_v33 = vld [vmem:[%s3579_s30 + $0xd88] sm:$0xff] }
 0x10d   : > { %v572_v34 = vld [vmem:[%s3579_s30 + $0xd90] sm:$0xff]  ;;  %2612 = vst [vmem:[%s3594_s17 + $0xd50] sm:$0xff] %v1588_v23  ;;  %2613 = vst [vmem:[%s3594_s17 + $0xd58] sm:$0xff] %v1589_v24  ;;  %v1594_v35 = vmul.f32 0.0, %v570_v32  ;;  %v1595_v36 = vmul.f32 0.0, %v571_v33  ;;  %v573_v38 = vld [vmem:[%s3579_s30 + $0xd98] sm:$0xff] }
 0x10e   : > { %2614 = vst [vmem:[%s3594_s17 + $0xd60] sm:$0xff] %v1590_v25  ;;  %v1596_v37 = vmul.f32 0.0, %v572_v34  ;;  %v574_v39 = vld [vmem:[%s3579_s30 + $0xda0] sm:$0xff]  ;;  %v575_v40 = vld [vmem:[%s3579_s30 + $0xda8] sm:$0xff]  ;;  %2615 = vst [vmem:[%s3594_s17 + $0xd68] sm:$0xff] %v1591_v29  ;;  %v1597_v41 = vmul.f32 0.0, %v573_v38 }
 0x10f   : > { %2616 = vst [vmem:[%s3594_s17 + $0xd70] sm:$0xff] %v1592_v30  ;;  %2617 = vst [vmem:[%s3594_s17 + $0xd78] sm:$0xff] %v1593_v31  ;;  %v1598_v42 = vmul.f32 0.0, %v574_v39  ;;  %v1599_v43 = vmul.f32 0.0, %v575_v40  ;;  %v576_v44 = vld [vmem:[%s3579_s30 + $0xdb0] sm:$0xff]  ;;  %v577_v45 = vld [vmem:[%s3579_s30 + $0xdb8] sm:$0xff] }
 0x110   : > { %v578_v46 = vld [vmem:[%s3579_s30 + $0xdc0] sm:$0xff]  ;;  %2618 = vst [vmem:[%s3594_s17 + $0xd80] sm:$0xff] %v1594_v35  ;;  %2619 = vst [vmem:[%s3594_s17 + $0xd88] sm:$0xff] %v1595_v36  ;;  %v1600_v47 = vmul.f32 0.0, %v576_v44  ;;  %v1601_v48 = vmul.f32 0.0, %v577_v45  ;;  %v579_v50 = vld [vmem:[%s3579_s30 + $0xdc8] sm:$0xff] }
 0x111   : > { %2620 = vst [vmem:[%s3594_s17 + $0xd90] sm:$0xff] %v1596_v37  ;;  %v1602_v49 = vmul.f32 0.0, %v578_v46  ;;  %v580_v51 = vld [vmem:[%s3579_s30 + $0xdd0] sm:$0xff]  ;;  %v581_v52 = vld [vmem:[%s3579_s30 + $0xdd8] sm:$0xff]  ;;  %2621 = vst [vmem:[%s3594_s17 + $0xd98] sm:$0xff] %v1597_v41  ;;  %v1603_v53 = vmul.f32 0.0, %v579_v50 }
 0x112   : > { %2622 = vst [vmem:[%s3594_s17 + $0xda0] sm:$0xff] %v1598_v42  ;;  %2623 = vst [vmem:[%s3594_s17 + $0xda8] sm:$0xff] %v1599_v43  ;;  %v1604_v54 = vmul.f32 0.0, %v580_v51  ;;  %v1605_v55 = vmul.f32 0.0, %v581_v52  ;;  %v582_v56 = vld [vmem:[%s3579_s30 + $0xde0] sm:$0xff]  ;;  %v583_v57 = vld [vmem:[%s3579_s30 + $0xde8] sm:$0xff] }
 0x113   : > { %v584_v58 = vld [vmem:[%s3579_s30 + $0xdf0] sm:$0xff]  ;;  %2624 = vst [vmem:[%s3594_s17 + $0xdb0] sm:$0xff] %v1600_v47  ;;  %2625 = vst [vmem:[%s3594_s17 + $0xdb8] sm:$0xff] %v1601_v48  ;;  %v1606_v59 = vmul.f32 0.0, %v582_v56  ;;  %v1607_v60 = vmul.f32 0.0, %v583_v57  ;;  %v585_v62 = vld [vmem:[%s3579_s30 + $0xdf8] sm:$0xff] }
 0x114   : > { %2626 = vst [vmem:[%s3594_s17 + $0xdc0] sm:$0xff] %v1602_v49  ;;  %v1608_v61 = vmul.f32 0.0, %v584_v58  ;;  %v586_v63 = vld [vmem:[%s3579_s30 + $0xe00] sm:$0xff]  ;;  %v587_v0 = vld [vmem:[%s3579_s30 + $0xe08] sm:$0xff]  ;;  %2627 = vst [vmem:[%s3594_s17 + $0xdc8] sm:$0xff] %v1603_v53  ;;  %v1609_v1 = vmul.f32 0.0, %v585_v62 }
 0x115   : > { %2628 = vst [vmem:[%s3594_s17 + $0xdd0] sm:$0xff] %v1604_v54  ;;  %2629 = vst [vmem:[%s3594_s17 + $0xdd8] sm:$0xff] %v1605_v55  ;;  %v1610_v2 = vmul.f32 0.0, %v586_v63  ;;  %v1611_v3 = vmul.f32 0.0, %v587_v0  ;;  %v588_v4 = vld [vmem:[%s3579_s30 + $0xe10] sm:$0xff]  ;;  %v589_v5 = vld [vmem:[%s3579_s30 + $0xe18] sm:$0xff] }
 0x116   : > { %v590_v6 = vld [vmem:[%s3579_s30 + $0xe20] sm:$0xff]  ;;  %2630 = vst [vmem:[%s3594_s17 + $0xde0] sm:$0xff] %v1606_v59  ;;  %2631 = vst [vmem:[%s3594_s17 + $0xde8] sm:$0xff] %v1607_v60  ;;  %v1612_v7 = vmul.f32 0.0, %v588_v4  ;;  %v1613_v8 = vmul.f32 0.0, %v589_v5  ;;  %v591_v10 = vld [vmem:[%s3579_s30 + $0xe28] sm:$0xff] }
 0x117   : > { %2632 = vst [vmem:[%s3594_s17 + $0xdf0] sm:$0xff] %v1608_v61  ;;  %v1614_v9 = vmul.f32 0.0, %v590_v6  ;;  %v592_v11 = vld [vmem:[%s3579_s30 + $0xe30] sm:$0xff]  ;;  %v593_v12 = vld [vmem:[%s3579_s30 + $0xe38] sm:$0xff]  ;;  %2633 = vst [vmem:[%s3594_s17 + $0xdf8] sm:$0xff] %v1609_v1  ;;  %v1615_v13 = vmul.f32 0.0, %v591_v10 }
 0x118   : > { %2634 = vst [vmem:[%s3594_s17 + $0xe00] sm:$0xff] %v1610_v2  ;;  %2635 = vst [vmem:[%s3594_s17 + $0xe08] sm:$0xff] %v1611_v3  ;;  %v1616_v14 = vmul.f32 0.0, %v592_v11  ;;  %v1617_v15 = vmul.f32 0.0, %v593_v12  ;;  %v594_v16 = vld [vmem:[%s3579_s30 + $0xe40] sm:$0xff]  ;;  %v595_v17 = vld [vmem:[%s3579_s30 + $0xe48] sm:$0xff] }
 0x119   : > { %v596_v18 = vld [vmem:[%s3579_s30 + $0xe50] sm:$0xff]  ;;  %2636 = vst [vmem:[%s3594_s17 + $0xe10] sm:$0xff] %v1612_v7  ;;  %2637 = vst [vmem:[%s3594_s17 + $0xe18] sm:$0xff] %v1613_v8  ;;  %v1618_v19 = vmul.f32 0.0, %v594_v16  ;;  %v1619_v20 = vmul.f32 0.0, %v595_v17  ;;  %v597_v22 = vld [vmem:[%s3579_s30 + $0xe58] sm:$0xff] }
 0x11a   : > { %2638 = vst [vmem:[%s3594_s17 + $0xe20] sm:$0xff] %v1614_v9  ;;  %v1620_v21 = vmul.f32 0.0, %v596_v18  ;;  %v598_v23 = vld [vmem:[%s3579_s30 + $0xe60] sm:$0xff]  ;;  %v599_v24 = vld [vmem:[%s3579_s30 + $0xe68] sm:$0xff]  ;;  %2639 = vst [vmem:[%s3594_s17 + $0xe28] sm:$0xff] %v1615_v13  ;;  %v1621_v25 = vmul.f32 0.0, %v597_v22 }
 0x11b   : > { %2640 = vst [vmem:[%s3594_s17 + $0xe30] sm:$0xff] %v1616_v14  ;;  %2641 = vst [vmem:[%s3594_s17 + $0xe38] sm:$0xff] %v1617_v15  ;;  %v1622_v26 = vmul.f32 0.0, %v598_v23  ;;  %v1623_v27 = vmul.f32 0.0, %v599_v24  ;;  %v600_v28 = vld [vmem:[%s3579_s30 + $0xe70] sm:$0xff]  ;;  %v601_v29 = vld [vmem:[%s3579_s30 + $0xe78] sm:$0xff] }
 0x11c   : > { %v602_v30 = vld [vmem:[%s3579_s30 + $0xe80] sm:$0xff]  ;;  %2642 = vst [vmem:[%s3594_s17 + $0xe40] sm:$0xff] %v1618_v19  ;;  %2643 = vst [vmem:[%s3594_s17 + $0xe48] sm:$0xff] %v1619_v20  ;;  %v1624_v31 = vmul.f32 0.0, %v600_v28  ;;  %v1625_v32 = vmul.f32 0.0, %v601_v29  ;;  %v603_v34 = vld [vmem:[%s3579_s30 + $0xe88] sm:$0xff] }
 0x11d   : > { %2644 = vst [vmem:[%s3594_s17 + $0xe50] sm:$0xff] %v1620_v21  ;;  %v1626_v33 = vmul.f32 0.0, %v602_v30  ;;  %v604_v35 = vld [vmem:[%s3579_s30 + $0xe90] sm:$0xff]  ;;  %v605_v36 = vld [vmem:[%s3579_s30 + $0xe98] sm:$0xff]  ;;  %2645 = vst [vmem:[%s3594_s17 + $0xe58] sm:$0xff] %v1621_v25  ;;  %v1627_v37 = vmul.f32 0.0, %v603_v34 }
 0x11e   : > { %2646 = vst [vmem:[%s3594_s17 + $0xe60] sm:$0xff] %v1622_v26  ;;  %2647 = vst [vmem:[%s3594_s17 + $0xe68] sm:$0xff] %v1623_v27  ;;  %v1628_v38 = vmul.f32 0.0, %v604_v35  ;;  %v1629_v39 = vmul.f32 0.0, %v605_v36  ;;  %v606_v40 = vld [vmem:[%s3579_s30 + $0xea0] sm:$0xff]  ;;  %v607_v41 = vld [vmem:[%s3579_s30 + $0xea8] sm:$0xff] }
 0x11f   : > { %v608_v42 = vld [vmem:[%s3579_s30 + $0xeb0] sm:$0xff]  ;;  %2648 = vst [vmem:[%s3594_s17 + $0xe70] sm:$0xff] %v1624_v31  ;;  %2649 = vst [vmem:[%s3594_s17 + $0xe78] sm:$0xff] %v1625_v32  ;;  %v1630_v43 = vmul.f32 0.0, %v606_v40  ;;  %v1631_v44 = vmul.f32 0.0, %v607_v41  ;;  %v609_v46 = vld [vmem:[%s3579_s30 + $0xeb8] sm:$0xff] }
 0x120   : > { %2650 = vst [vmem:[%s3594_s17 + $0xe80] sm:$0xff] %v1626_v33  ;;  %v1632_v45 = vmul.f32 0.0, %v608_v42  ;;  %v610_v47 = vld [vmem:[%s3579_s30 + $0xec0] sm:$0xff]  ;;  %v611_v48 = vld [vmem:[%s3579_s30 + $0xec8] sm:$0xff]  ;;  %2651 = vst [vmem:[%s3594_s17 + $0xe88] sm:$0xff] %v1627_v37  ;;  %v1633_v49 = vmul.f32 0.0, %v609_v46 }
 0x121   : > { %2652 = vst [vmem:[%s3594_s17 + $0xe90] sm:$0xff] %v1628_v38  ;;  %2653 = vst [vmem:[%s3594_s17 + $0xe98] sm:$0xff] %v1629_v39  ;;  %v1634_v50 = vmul.f32 0.0, %v610_v47  ;;  %v1635_v51 = vmul.f32 0.0, %v611_v48  ;;  %v612_v52 = vld [vmem:[%s3579_s30 + $0xed0] sm:$0xff]  ;;  %v613_v53 = vld [vmem:[%s3579_s30 + $0xed8] sm:$0xff] }
 0x122   : > { %v614_v54 = vld [vmem:[%s3579_s30 + $0xee0] sm:$0xff]  ;;  %2654 = vst [vmem:[%s3594_s17 + $0xea0] sm:$0xff] %v1630_v43  ;;  %2655 = vst [vmem:[%s3594_s17 + $0xea8] sm:$0xff] %v1631_v44  ;;  %v1636_v55 = vmul.f32 0.0, %v612_v52  ;;  %v1637_v56 = vmul.f32 0.0, %v613_v53  ;;  %v615_v58 = vld [vmem:[%s3579_s30 + $0xee8] sm:$0xff] }
 0x123   : > { %2656 = vst [vmem:[%s3594_s17 + $0xeb0] sm:$0xff] %v1632_v45  ;;  %v1638_v57 = vmul.f32 0.0, %v614_v54  ;;  %v616_v59 = vld [vmem:[%s3579_s30 + $0xef0] sm:$0xff]  ;;  %v617_v60 = vld [vmem:[%s3579_s30 + $0xef8] sm:$0xff]  ;;  %2657 = vst [vmem:[%s3594_s17 + $0xeb8] sm:$0xff] %v1633_v49  ;;  %v1639_v61 = vmul.f32 0.0, %v615_v58 }
 0x124   : > { %2658 = vst [vmem:[%s3594_s17 + $0xec0] sm:$0xff] %v1634_v50  ;;  %2659 = vst [vmem:[%s3594_s17 + $0xec8] sm:$0xff] %v1635_v51  ;;  %v1640_v62 = vmul.f32 0.0, %v616_v59  ;;  %v1641_v63 = vmul.f32 0.0, %v617_v60  ;;  %v618_v0 = vld [vmem:[%s3579_s30 + $0xf00] sm:$0xff]  ;;  %v619_v1 = vld [vmem:[%s3579_s30 + $0xf08] sm:$0xff] }
 0x125   : > { %v620_v2 = vld [vmem:[%s3579_s30 + $0xf10] sm:$0xff]  ;;  %2660 = vst [vmem:[%s3594_s17 + $0xed0] sm:$0xff] %v1636_v55  ;;  %2661 = vst [vmem:[%s3594_s17 + $0xed8] sm:$0xff] %v1637_v56  ;;  %v1642_v3 = vmul.f32 0.0, %v618_v0  ;;  %v1643_v4 = vmul.f32 0.0, %v619_v1  ;;  %v621_v6 = vld [vmem:[%s3579_s30 + $0xf18] sm:$0xff] }
 0x126   : > { %2662 = vst [vmem:[%s3594_s17 + $0xee0] sm:$0xff] %v1638_v57  ;;  %v1644_v5 = vmul.f32 0.0, %v620_v2  ;;  %v622_v7 = vld [vmem:[%s3579_s30 + $0xf20] sm:$0xff]  ;;  %v623_v8 = vld [vmem:[%s3579_s30 + $0xf28] sm:$0xff]  ;;  %2663 = vst [vmem:[%s3594_s17 + $0xee8] sm:$0xff] %v1639_v61  ;;  %v1645_v9 = vmul.f32 0.0, %v621_v6 }
 0x127   : > { %2664 = vst [vmem:[%s3594_s17 + $0xef0] sm:$0xff] %v1640_v62  ;;  %2665 = vst [vmem:[%s3594_s17 + $0xef8] sm:$0xff] %v1641_v63  ;;  %v1646_v10 = vmul.f32 0.0, %v622_v7  ;;  %v1647_v11 = vmul.f32 0.0, %v623_v8  ;;  %v624_v12 = vld [vmem:[%s3579_s30 + $0xf30] sm:$0xff]  ;;  %v625_v13 = vld [vmem:[%s3579_s30 + $0xf38] sm:$0xff] }
 0x128   : > { %v626_v14 = vld [vmem:[%s3579_s30 + $0xf40] sm:$0xff]  ;;  %2666 = vst [vmem:[%s3594_s17 + $0xf00] sm:$0xff] %v1642_v3  ;;  %2667 = vst [vmem:[%s3594_s17 + $0xf08] sm:$0xff] %v1643_v4  ;;  %v1648_v15 = vmul.f32 0.0, %v624_v12  ;;  %v1649_v16 = vmul.f32 0.0, %v625_v13  ;;  %v627_v18 = vld [vmem:[%s3579_s30 + $0xf48] sm:$0xff] }
 0x129   : > { %2668 = vst [vmem:[%s3594_s17 + $0xf10] sm:$0xff] %v1644_v5  ;;  %v1650_v17 = vmul.f32 0.0, %v626_v14  ;;  %v628_v19 = vld [vmem:[%s3579_s30 + $0xf50] sm:$0xff]  ;;  %v629_v20 = vld [vmem:[%s3579_s30 + $0xf58] sm:$0xff]  ;;  %2669 = vst [vmem:[%s3594_s17 + $0xf18] sm:$0xff] %v1645_v9  ;;  %v1651_v21 = vmul.f32 0.0, %v627_v18 }
 0x12a   : > { %2670 = vst [vmem:[%s3594_s17 + $0xf20] sm:$0xff] %v1646_v10  ;;  %2671 = vst [vmem:[%s3594_s17 + $0xf28] sm:$0xff] %v1647_v11  ;;  %v1652_v22 = vmul.f32 0.0, %v628_v19  ;;  %v1653_v23 = vmul.f32 0.0, %v629_v20  ;;  %v630_v24 = vld [vmem:[%s3579_s30 + $0xf60] sm:$0xff]  ;;  %v631_v25 = vld [vmem:[%s3579_s30 + $0xf68] sm:$0xff] }
 0x12b   : > { %v632_v26 = vld [vmem:[%s3579_s30 + $0xf70] sm:$0xff]  ;;  %2672 = vst [vmem:[%s3594_s17 + $0xf30] sm:$0xff] %v1648_v15  ;;  %2673 = vst [vmem:[%s3594_s17 + $0xf38] sm:$0xff] %v1649_v16  ;;  %v1654_v27 = vmul.f32 0.0, %v630_v24  ;;  %v1655_v28 = vmul.f32 0.0, %v631_v25  ;;  %v633_v30 = vld [vmem:[%s3579_s30 + $0xf78] sm:$0xff] }
 0x12c   : > { %2674 = vst [vmem:[%s3594_s17 + $0xf40] sm:$0xff] %v1650_v17  ;;  %v1656_v29 = vmul.f32 0.0, %v632_v26  ;;  %v634_v31 = vld [vmem:[%s3579_s30 + $0xf80] sm:$0xff]  ;;  %v635_v32 = vld [vmem:[%s3579_s30 + $0xf88] sm:$0xff]  ;;  %2675 = vst [vmem:[%s3594_s17 + $0xf48] sm:$0xff] %v1651_v21  ;;  %v1657_v33 = vmul.f32 0.0, %v633_v30 }
 0x12d   : > { %2676 = vst [vmem:[%s3594_s17 + $0xf50] sm:$0xff] %v1652_v22  ;;  %2677 = vst [vmem:[%s3594_s17 + $0xf58] sm:$0xff] %v1653_v23  ;;  %v1658_v34 = vmul.f32 0.0, %v634_v31  ;;  %v1659_v35 = vmul.f32 0.0, %v635_v32  ;;  %v636_v36 = vld [vmem:[%s3579_s30 + $0xf90] sm:$0xff]  ;;  %v637_v37 = vld [vmem:[%s3579_s30 + $0xf98] sm:$0xff] }
 0x12e   : > { %v638_v38 = vld [vmem:[%s3579_s30 + $0xfa0] sm:$0xff]  ;;  %2678 = vst [vmem:[%s3594_s17 + $0xf60] sm:$0xff] %v1654_v27  ;;  %2679 = vst [vmem:[%s3594_s17 + $0xf68] sm:$0xff] %v1655_v28  ;;  %v1660_v39 = vmul.f32 0.0, %v636_v36  ;;  %v1661_v40 = vmul.f32 0.0, %v637_v37  ;;  %v639_v42 = vld [vmem:[%s3579_s30 + $0xfa8] sm:$0xff] }
 0x12f   : > { %2680 = vst [vmem:[%s3594_s17 + $0xf70] sm:$0xff] %v1656_v29  ;;  %v1662_v41 = vmul.f32 0.0, %v638_v38  ;;  %v640_v43 = vld [vmem:[%s3579_s30 + $0xfb0] sm:$0xff]  ;;  %v641_v44 = vld [vmem:[%s3579_s30 + $0xfb8] sm:$0xff]  ;;  %2681 = vst [vmem:[%s3594_s17 + $0xf78] sm:$0xff] %v1657_v33  ;;  %v1663_v45 = vmul.f32 0.0, %v639_v42 }
 0x130   : > { %2682 = vst [vmem:[%s3594_s17 + $0xf80] sm:$0xff] %v1658_v34  ;;  %2683 = vst [vmem:[%s3594_s17 + $0xf88] sm:$0xff] %v1659_v35  ;;  %v1664_v46 = vmul.f32 0.0, %v640_v43  ;;  %v1665_v47 = vmul.f32 0.0, %v641_v44  ;;  %v642_v48 = vld [vmem:[%s3579_s30 + $0xfc0] sm:$0xff]  ;;  %v643_v49 = vld [vmem:[%s3579_s30 + $0xfc8] sm:$0xff] }
 0x131   : > { %v644_v50 = vld [vmem:[%s3579_s30 + $0xfd0] sm:$0xff]  ;;  %2684 = vst [vmem:[%s3594_s17 + $0xf90] sm:$0xff] %v1660_v39  ;;  %2685 = vst [vmem:[%s3594_s17 + $0xf98] sm:$0xff] %v1661_v40  ;;  %v1666_v51 = vmul.f32 0.0, %v642_v48  ;;  %v1667_v52 = vmul.f32 0.0, %v643_v49  ;;  %v645_v54 = vld [vmem:[%s3579_s30 + $0xfd8] sm:$0xff] }
 0x132   : > { %2686 = vst [vmem:[%s3594_s17 + $0xfa0] sm:$0xff] %v1662_v41  ;;  %v1668_v53 = vmul.f32 0.0, %v644_v50  ;;  %v646_v55 = vld [vmem:[%s3579_s30 + $0xfe0] sm:$0xff]  ;;  %v647_v56 = vld [vmem:[%s3579_s30 + $0xfe8] sm:$0xff]  ;;  %2687 = vst [vmem:[%s3594_s17 + $0xfa8] sm:$0xff] %v1663_v45  ;;  %v1669_v57 = vmul.f32 0.0, %v645_v54 }
 0x133   : > { %2688 = vst [vmem:[%s3594_s17 + $0xfb0] sm:$0xff] %v1664_v46  ;;  %2689 = vst [vmem:[%s3594_s17 + $0xfb8] sm:$0xff] %v1665_v47  ;;  %v1670_v58 = vmul.f32 0.0, %v646_v55  ;;  %v1671_v59 = vmul.f32 0.0, %v647_v56  ;;  %v648_v60 = vld [vmem:[%s3579_s30 + $0xff0] sm:$0xff]  ;;  %v649_v61 = vld [vmem:[%s3579_s30 + $0xff8] sm:$0xff] }
 0x134   : > { %v650_v62 = vld [vmem:[%s3579_s30 + $0x1000] sm:$0xff]  ;;  %2690 = vst [vmem:[%s3594_s17 + $0xfc0] sm:$0xff] %v1666_v51  ;;  %2691 = vst [vmem:[%s3594_s17 + $0xfc8] sm:$0xff] %v1667_v52  ;;  %v1672_v63 = vmul.f32 0.0, %v648_v60  ;;  %v1673_v0 = vmul.f32 0.0, %v649_v61  ;;  %v651_v2 = vld [vmem:[%s3579_s30 + $0x1008] sm:$0xff] }
 0x135   : > { %2692 = vst [vmem:[%s3594_s17 + $0xfd0] sm:$0xff] %v1668_v53  ;;  %v1674_v1 = vmul.f32 0.0, %v650_v62  ;;  %v652_v3 = vld [vmem:[%s3579_s30 + $0x1010] sm:$0xff]  ;;  %v653_v4 = vld [vmem:[%s3579_s30 + $0x1018] sm:$0xff]  ;;  %2693 = vst [vmem:[%s3594_s17 + $0xfd8] sm:$0xff] %v1669_v57  ;;  %v1675_v5 = vmul.f32 0.0, %v651_v2 }
 0x136   : > { %2694 = vst [vmem:[%s3594_s17 + $0xfe0] sm:$0xff] %v1670_v58  ;;  %2695 = vst [vmem:[%s3594_s17 + $0xfe8] sm:$0xff] %v1671_v59  ;;  %v1676_v6 = vmul.f32 0.0, %v652_v3  ;;  %v1677_v7 = vmul.f32 0.0, %v653_v4  ;;  %v654_v8 = vld [vmem:[%s3579_s30 + $0x1020] sm:$0xff]  ;;  %v655_v9 = vld [vmem:[%s3579_s30 + $0x1028] sm:$0xff] }
 0x137   : > { %v656_v10 = vld [vmem:[%s3579_s30 + $0x1030] sm:$0xff]  ;;  %2696 = vst [vmem:[%s3594_s17 + $0xff0] sm:$0xff] %v1672_v63  ;;  %2697 = vst [vmem:[%s3594_s17 + $0xff8] sm:$0xff] %v1673_v0  ;;  %v1678_v11 = vmul.f32 0.0, %v654_v8  ;;  %v1679_v12 = vmul.f32 0.0, %v655_v9  ;;  %v657_v14 = vld [vmem:[%s3579_s30 + $0x1038] sm:$0xff] }
 0x138   : > { %2698 = vst [vmem:[%s3594_s17 + $0x1000] sm:$0xff] %v1674_v1  ;;  %v1680_v13 = vmul.f32 0.0, %v656_v10  ;;  %v658_v15 = vld [vmem:[%s3579_s30 + $0x1040] sm:$0xff]  ;;  %v659_v16 = vld [vmem:[%s3579_s30 + $0x1048] sm:$0xff]  ;;  %2699 = vst [vmem:[%s3594_s17 + $0x1008] sm:$0xff] %v1675_v5  ;;  %v1681_v17 = vmul.f32 0.0, %v657_v14 }
 0x139   : > { %2700 = vst [vmem:[%s3594_s17 + $0x1010] sm:$0xff] %v1676_v6  ;;  %2701 = vst [vmem:[%s3594_s17 + $0x1018] sm:$0xff] %v1677_v7  ;;  %v1682_v18 = vmul.f32 0.0, %v658_v15  ;;  %v1683_v19 = vmul.f32 0.0, %v659_v16  ;;  %v660_v20 = vld [vmem:[%s3579_s30 + $0x1050] sm:$0xff]  ;;  %v661_v21 = vld [vmem:[%s3579_s30 + $0x1058] sm:$0xff] }
 0x13a   : > { %v662_v22 = vld [vmem:[%s3579_s30 + $0x1060] sm:$0xff]  ;;  %2702 = vst [vmem:[%s3594_s17 + $0x1020] sm:$0xff] %v1678_v11  ;;  %2703 = vst [vmem:[%s3594_s17 + $0x1028] sm:$0xff] %v1679_v12  ;;  %v1684_v23 = vmul.f32 0.0, %v660_v20  ;;  %v1685_v24 = vmul.f32 0.0, %v661_v21  ;;  %v663_v26 = vld [vmem:[%s3579_s30 + $0x1068] sm:$0xff] }
 0x13b   : > { %2704 = vst [vmem:[%s3594_s17 + $0x1030] sm:$0xff] %v1680_v13  ;;  %v1686_v25 = vmul.f32 0.0, %v662_v22  ;;  %v664_v27 = vld [vmem:[%s3579_s30 + $0x1070] sm:$0xff]  ;;  %v665_v28 = vld [vmem:[%s3579_s30 + $0x1078] sm:$0xff]  ;;  %2705 = vst [vmem:[%s3594_s17 + $0x1038] sm:$0xff] %v1681_v17  ;;  %v1687_v29 = vmul.f32 0.0, %v663_v26 }
 0x13c   : > { %2706 = vst [vmem:[%s3594_s17 + $0x1040] sm:$0xff] %v1682_v18  ;;  %2707 = vst [vmem:[%s3594_s17 + $0x1048] sm:$0xff] %v1683_v19  ;;  %v1688_v30 = vmul.f32 0.0, %v664_v27  ;;  %v1689_v31 = vmul.f32 0.0, %v665_v28  ;;  %v666_v32 = vld [vmem:[%s3579_s30 + $0x1080] sm:$0xff]  ;;  %v667_v33 = vld [vmem:[%s3579_s30 + $0x1088] sm:$0xff] }
 0x13d   : > { %v668_v34 = vld [vmem:[%s3579_s30 + $0x1090] sm:$0xff]  ;;  %2708 = vst [vmem:[%s3594_s17 + $0x1050] sm:$0xff] %v1684_v23  ;;  %2709 = vst [vmem:[%s3594_s17 + $0x1058] sm:$0xff] %v1685_v24  ;;  %v1690_v35 = vmul.f32 0.0, %v666_v32  ;;  %v1691_v36 = vmul.f32 0.0, %v667_v33  ;;  %v669_v38 = vld [vmem:[%s3579_s30 + $0x1098] sm:$0xff] }
 0x13e   : > { %2710 = vst [vmem:[%s3594_s17 + $0x1060] sm:$0xff] %v1686_v25  ;;  %v1692_v37 = vmul.f32 0.0, %v668_v34  ;;  %v670_v39 = vld [vmem:[%s3579_s30 + $0x10a0] sm:$0xff]  ;;  %v671_v40 = vld [vmem:[%s3579_s30 + $0x10a8] sm:$0xff]  ;;  %2711 = vst [vmem:[%s3594_s17 + $0x1068] sm:$0xff] %v1687_v29  ;;  %v1693_v41 = vmul.f32 0.0, %v669_v38 }
 0x13f   : > { %2712 = vst [vmem:[%s3594_s17 + $0x1070] sm:$0xff] %v1688_v30  ;;  %2713 = vst [vmem:[%s3594_s17 + $0x1078] sm:$0xff] %v1689_v31  ;;  %v1694_v42 = vmul.f32 0.0, %v670_v39  ;;  %v1695_v43 = vmul.f32 0.0, %v671_v40  ;;  %v672_v44 = vld [vmem:[%s3579_s30 + $0x10b0] sm:$0xff]  ;;  %v673_v45 = vld [vmem:[%s3579_s30 + $0x10b8] sm:$0xff] }
 0x140   : > { %v674_v46 = vld [vmem:[%s3579_s30 + $0x10c0] sm:$0xff]  ;;  %2714 = vst [vmem:[%s3594_s17 + $0x1080] sm:$0xff] %v1690_v35  ;;  %2715 = vst [vmem:[%s3594_s17 + $0x1088] sm:$0xff] %v1691_v36  ;;  %v1696_v47 = vmul.f32 0.0, %v672_v44  ;;  %v1697_v48 = vmul.f32 0.0, %v673_v45  ;;  %v675_v50 = vld [vmem:[%s3579_s30 + $0x10c8] sm:$0xff] }
 0x141   : > { %2716 = vst [vmem:[%s3594_s17 + $0x1090] sm:$0xff] %v1692_v37  ;;  %v1698_v49 = vmul.f32 0.0, %v674_v46  ;;  %v676_v51 = vld [vmem:[%s3579_s30 + $0x10d0] sm:$0xff]  ;;  %v677_v52 = vld [vmem:[%s3579_s30 + $0x10d8] sm:$0xff]  ;;  %2717 = vst [vmem:[%s3594_s17 + $0x1098] sm:$0xff] %v1693_v41  ;;  %v1699_v53 = vmul.f32 0.0, %v675_v50 }
 0x142   : > { %2718 = vst [vmem:[%s3594_s17 + $0x10a0] sm:$0xff] %v1694_v42  ;;  %2719 = vst [vmem:[%s3594_s17 + $0x10a8] sm:$0xff] %v1695_v43  ;;  %v1700_v54 = vmul.f32 0.0, %v676_v51  ;;  %v1701_v55 = vmul.f32 0.0, %v677_v52  ;;  %v678_v56 = vld [vmem:[%s3579_s30 + $0x10e0] sm:$0xff]  ;;  %v679_v57 = vld [vmem:[%s3579_s30 + $0x10e8] sm:$0xff] }
 0x143   : > { %v680_v58 = vld [vmem:[%s3579_s30 + $0x10f0] sm:$0xff]  ;;  %2720 = vst [vmem:[%s3594_s17 + $0x10b0] sm:$0xff] %v1696_v47  ;;  %2721 = vst [vmem:[%s3594_s17 + $0x10b8] sm:$0xff] %v1697_v48  ;;  %v1702_v59 = vmul.f32 0.0, %v678_v56  ;;  %v1703_v60 = vmul.f32 0.0, %v679_v57  ;;  %v681_v62 = vld [vmem:[%s3579_s30 + $0x10f8] sm:$0xff] }
 0x144   : > { %2722 = vst [vmem:[%s3594_s17 + $0x10c0] sm:$0xff] %v1698_v49  ;;  %v1704_v61 = vmul.f32 0.0, %v680_v58  ;;  %v682_v63 = vld [vmem:[%s3579_s30 + $0x1100] sm:$0xff]  ;;  %v683_v0 = vld [vmem:[%s3579_s30 + $0x1108] sm:$0xff]  ;;  %2723 = vst [vmem:[%s3594_s17 + $0x10c8] sm:$0xff] %v1699_v53  ;;  %v1705_v1 = vmul.f32 0.0, %v681_v62 }
 0x145   : > { %2724 = vst [vmem:[%s3594_s17 + $0x10d0] sm:$0xff] %v1700_v54  ;;  %2725 = vst [vmem:[%s3594_s17 + $0x10d8] sm:$0xff] %v1701_v55  ;;  %v1706_v2 = vmul.f32 0.0, %v682_v63  ;;  %v1707_v3 = vmul.f32 0.0, %v683_v0  ;;  %v684_v4 = vld [vmem:[%s3579_s30 + $0x1110] sm:$0xff]  ;;  %v685_v5 = vld [vmem:[%s3579_s30 + $0x1118] sm:$0xff] }
 0x146   : > { %v686_v6 = vld [vmem:[%s3579_s30 + $0x1120] sm:$0xff]  ;;  %2726 = vst [vmem:[%s3594_s17 + $0x10e0] sm:$0xff] %v1702_v59  ;;  %2727 = vst [vmem:[%s3594_s17 + $0x10e8] sm:$0xff] %v1703_v60  ;;  %v1708_v7 = vmul.f32 0.0, %v684_v4  ;;  %v1709_v8 = vmul.f32 0.0, %v685_v5  ;;  %v687_v10 = vld [vmem:[%s3579_s30 + $0x1128] sm:$0xff] }
 0x147   : > { %2728 = vst [vmem:[%s3594_s17 + $0x10f0] sm:$0xff] %v1704_v61  ;;  %v1710_v9 = vmul.f32 0.0, %v686_v6  ;;  %v688_v11 = vld [vmem:[%s3579_s30 + $0x1130] sm:$0xff]  ;;  %v689_v12 = vld [vmem:[%s3579_s30 + $0x1138] sm:$0xff]  ;;  %2729 = vst [vmem:[%s3594_s17 + $0x10f8] sm:$0xff] %v1705_v1  ;;  %v1711_v13 = vmul.f32 0.0, %v687_v10 }
 0x148   : > { %2730 = vst [vmem:[%s3594_s17 + $0x1100] sm:$0xff] %v1706_v2  ;;  %2731 = vst [vmem:[%s3594_s17 + $0x1108] sm:$0xff] %v1707_v3  ;;  %v1712_v14 = vmul.f32 0.0, %v688_v11  ;;  %v1713_v15 = vmul.f32 0.0, %v689_v12  ;;  %v690_v16 = vld [vmem:[%s3579_s30 + $0x1140] sm:$0xff]  ;;  %v691_v17 = vld [vmem:[%s3579_s30 + $0x1148] sm:$0xff] }
 0x149   : > { %v692_v18 = vld [vmem:[%s3579_s30 + $0x1150] sm:$0xff]  ;;  %2732 = vst [vmem:[%s3594_s17 + $0x1110] sm:$0xff] %v1708_v7  ;;  %2733 = vst [vmem:[%s3594_s17 + $0x1118] sm:$0xff] %v1709_v8  ;;  %v1714_v19 = vmul.f32 0.0, %v690_v16  ;;  %v1715_v20 = vmul.f32 0.0, %v691_v17  ;;  %v693_v22 = vld [vmem:[%s3579_s30 + $0x1158] sm:$0xff] }
 0x14a   : > { %2734 = vst [vmem:[%s3594_s17 + $0x1120] sm:$0xff] %v1710_v9  ;;  %v1716_v21 = vmul.f32 0.0, %v692_v18  ;;  %v694_v23 = vld [vmem:[%s3579_s30 + $0x1160] sm:$0xff]  ;;  %v695_v24 = vld [vmem:[%s3579_s30 + $0x1168] sm:$0xff]  ;;  %2735 = vst [vmem:[%s3594_s17 + $0x1128] sm:$0xff] %v1711_v13  ;;  %v1717_v25 = vmul.f32 0.0, %v693_v22 }
 0x14b   : > { %2736 = vst [vmem:[%s3594_s17 + $0x1130] sm:$0xff] %v1712_v14  ;;  %2737 = vst [vmem:[%s3594_s17 + $0x1138] sm:$0xff] %v1713_v15  ;;  %v1718_v26 = vmul.f32 0.0, %v694_v23  ;;  %v1719_v27 = vmul.f32 0.0, %v695_v24  ;;  %v696_v28 = vld [vmem:[%s3579_s30 + $0x1170] sm:$0xff]  ;;  %v697_v29 = vld [vmem:[%s3579_s30 + $0x1178] sm:$0xff] }
 0x14c   : > { %v698_v30 = vld [vmem:[%s3579_s30 + $0x1180] sm:$0xff]  ;;  %2738 = vst [vmem:[%s3594_s17 + $0x1140] sm:$0xff] %v1714_v19  ;;  %2739 = vst [vmem:[%s3594_s17 + $0x1148] sm:$0xff] %v1715_v20  ;;  %v1720_v31 = vmul.f32 0.0, %v696_v28  ;;  %v1721_v32 = vmul.f32 0.0, %v697_v29  ;;  %v699_v34 = vld [vmem:[%s3579_s30 + $0x1188] sm:$0xff] }
 0x14d   : > { %2740 = vst [vmem:[%s3594_s17 + $0x1150] sm:$0xff] %v1716_v21  ;;  %v1722_v33 = vmul.f32 0.0, %v698_v30  ;;  %v700_v35 = vld [vmem:[%s3579_s30 + $0x1190] sm:$0xff]  ;;  %v701_v36 = vld [vmem:[%s3579_s30 + $0x1198] sm:$0xff]  ;;  %2741 = vst [vmem:[%s3594_s17 + $0x1158] sm:$0xff] %v1717_v25  ;;  %v1723_v37 = vmul.f32 0.0, %v699_v34 }
 0x14e   : > { %2742 = vst [vmem:[%s3594_s17 + $0x1160] sm:$0xff] %v1718_v26  ;;  %2743 = vst [vmem:[%s3594_s17 + $0x1168] sm:$0xff] %v1719_v27  ;;  %v1724_v38 = vmul.f32 0.0, %v700_v35  ;;  %v1725_v39 = vmul.f32 0.0, %v701_v36  ;;  %v702_v40 = vld [vmem:[%s3579_s30 + $0x11a0] sm:$0xff]  ;;  %v703_v41 = vld [vmem:[%s3579_s30 + $0x11a8] sm:$0xff] }
 0x14f   : > { %v704_v42 = vld [vmem:[%s3579_s30 + $0x11b0] sm:$0xff]  ;;  %2744 = vst [vmem:[%s3594_s17 + $0x1170] sm:$0xff] %v1720_v31  ;;  %2745 = vst [vmem:[%s3594_s17 + $0x1178] sm:$0xff] %v1721_v32  ;;  %v1726_v43 = vmul.f32 0.0, %v702_v40  ;;  %v1727_v44 = vmul.f32 0.0, %v703_v41  ;;  %v705_v46 = vld [vmem:[%s3579_s30 + $0x11b8] sm:$0xff] }
 0x150   : > { %2746 = vst [vmem:[%s3594_s17 + $0x1180] sm:$0xff] %v1722_v33  ;;  %v1728_v45 = vmul.f32 0.0, %v704_v42  ;;  %v706_v47 = vld [vmem:[%s3579_s30 + $0x11c0] sm:$0xff]  ;;  %v707_v48 = vld [vmem:[%s3579_s30 + $0x11c8] sm:$0xff]  ;;  %2747 = vst [vmem:[%s3594_s17 + $0x1188] sm:$0xff] %v1723_v37  ;;  %v1729_v49 = vmul.f32 0.0, %v705_v46 }
 0x151   : > { %2748 = vst [vmem:[%s3594_s17 + $0x1190] sm:$0xff] %v1724_v38  ;;  %2749 = vst [vmem:[%s3594_s17 + $0x1198] sm:$0xff] %v1725_v39  ;;  %v1730_v50 = vmul.f32 0.0, %v706_v47  ;;  %v1731_v51 = vmul.f32 0.0, %v707_v48  ;;  %v708_v52 = vld [vmem:[%s3579_s30 + $0x11d0] sm:$0xff]  ;;  %v709_v53 = vld [vmem:[%s3579_s30 + $0x11d8] sm:$0xff] }
 0x152   : > { %v710_v54 = vld [vmem:[%s3579_s30 + $0x11e0] sm:$0xff]  ;;  %2750 = vst [vmem:[%s3594_s17 + $0x11a0] sm:$0xff] %v1726_v43  ;;  %2751 = vst [vmem:[%s3594_s17 + $0x11a8] sm:$0xff] %v1727_v44  ;;  %v1732_v55 = vmul.f32 0.0, %v708_v52  ;;  %v1733_v56 = vmul.f32 0.0, %v709_v53  ;;  %v711_v58 = vld [vmem:[%s3579_s30 + $0x11e8] sm:$0xff] }
 0x153   : > { %2752 = vst [vmem:[%s3594_s17 + $0x11b0] sm:$0xff] %v1728_v45  ;;  %v1734_v57 = vmul.f32 0.0, %v710_v54  ;;  %v712_v59 = vld [vmem:[%s3579_s30 + $0x11f0] sm:$0xff]  ;;  %v713_v60 = vld [vmem:[%s3579_s30 + $0x11f8] sm:$0xff]  ;;  %2753 = vst [vmem:[%s3594_s17 + $0x11b8] sm:$0xff] %v1729_v49  ;;  %v1735_v61 = vmul.f32 0.0, %v711_v58 }
 0x154   : > { %2754 = vst [vmem:[%s3594_s17 + $0x11c0] sm:$0xff] %v1730_v50  ;;  %2755 = vst [vmem:[%s3594_s17 + $0x11c8] sm:$0xff] %v1731_v51  ;;  %v1736_v62 = vmul.f32 0.0, %v712_v59  ;;  %v1737_v63 = vmul.f32 0.0, %v713_v60  ;;  %v714_v0 = vld [vmem:[%s3579_s30 + $0x1200] sm:$0xff]  ;;  %v715_v1 = vld [vmem:[%s3579_s30 + $0x1208] sm:$0xff] }
 0x155   : > { %v716_v2 = vld [vmem:[%s3579_s30 + $0x1210] sm:$0xff]  ;;  %2756 = vst [vmem:[%s3594_s17 + $0x11d0] sm:$0xff] %v1732_v55  ;;  %2757 = vst [vmem:[%s3594_s17 + $0x11d8] sm:$0xff] %v1733_v56  ;;  %v1738_v3 = vmul.f32 0.0, %v714_v0  ;;  %v1739_v4 = vmul.f32 0.0, %v715_v1  ;;  %v717_v6 = vld [vmem:[%s3579_s30 + $0x1218] sm:$0xff] }
 0x156   : > { %2758 = vst [vmem:[%s3594_s17 + $0x11e0] sm:$0xff] %v1734_v57  ;;  %v1740_v5 = vmul.f32 0.0, %v716_v2  ;;  %v718_v7 = vld [vmem:[%s3579_s30 + $0x1220] sm:$0xff]  ;;  %v719_v8 = vld [vmem:[%s3579_s30 + $0x1228] sm:$0xff]  ;;  %2759 = vst [vmem:[%s3594_s17 + $0x11e8] sm:$0xff] %v1735_v61  ;;  %v1741_v9 = vmul.f32 0.0, %v717_v6 }
 0x157   : > { %2760 = vst [vmem:[%s3594_s17 + $0x11f0] sm:$0xff] %v1736_v62  ;;  %2761 = vst [vmem:[%s3594_s17 + $0x11f8] sm:$0xff] %v1737_v63  ;;  %v1742_v10 = vmul.f32 0.0, %v718_v7  ;;  %v1743_v11 = vmul.f32 0.0, %v719_v8  ;;  %v720_v12 = vld [vmem:[%s3579_s30 + $0x1230] sm:$0xff]  ;;  %v721_v13 = vld [vmem:[%s3579_s30 + $0x1238] sm:$0xff] }
 0x158   : > { %v722_v14 = vld [vmem:[%s3579_s30 + $0x1240] sm:$0xff]  ;;  %2762 = vst [vmem:[%s3594_s17 + $0x1200] sm:$0xff] %v1738_v3  ;;  %2763 = vst [vmem:[%s3594_s17 + $0x1208] sm:$0xff] %v1739_v4  ;;  %v1744_v15 = vmul.f32 0.0, %v720_v12  ;;  %v1745_v16 = vmul.f32 0.0, %v721_v13  ;;  %v723_v18 = vld [vmem:[%s3579_s30 + $0x1248] sm:$0xff] }
 0x159   : > { %2764 = vst [vmem:[%s3594_s17 + $0x1210] sm:$0xff] %v1740_v5  ;;  %v1746_v17 = vmul.f32 0.0, %v722_v14  ;;  %v724_v19 = vld [vmem:[%s3579_s30 + $0x1250] sm:$0xff]  ;;  %v725_v20 = vld [vmem:[%s3579_s30 + $0x1258] sm:$0xff]  ;;  %2765 = vst [vmem:[%s3594_s17 + $0x1218] sm:$0xff] %v1741_v9  ;;  %v1747_v21 = vmul.f32 0.0, %v723_v18 }
 0x15a   : > { %2766 = vst [vmem:[%s3594_s17 + $0x1220] sm:$0xff] %v1742_v10  ;;  %2767 = vst [vmem:[%s3594_s17 + $0x1228] sm:$0xff] %v1743_v11  ;;  %v1748_v22 = vmul.f32 0.0, %v724_v19  ;;  %v1749_v23 = vmul.f32 0.0, %v725_v20  ;;  %v726_v24 = vld [vmem:[%s3579_s30 + $0x1260] sm:$0xff]  ;;  %v727_v25 = vld [vmem:[%s3579_s30 + $0x1268] sm:$0xff] }
 0x15b   : > { %v728_v26 = vld [vmem:[%s3579_s30 + $0x1270] sm:$0xff]  ;;  %2768 = vst [vmem:[%s3594_s17 + $0x1230] sm:$0xff] %v1744_v15  ;;  %2769 = vst [vmem:[%s3594_s17 + $0x1238] sm:$0xff] %v1745_v16  ;;  %v1750_v27 = vmul.f32 0.0, %v726_v24  ;;  %v1751_v28 = vmul.f32 0.0, %v727_v25  ;;  %v729_v30 = vld [vmem:[%s3579_s30 + $0x1278] sm:$0xff] }
 0x15c   : > { %2770 = vst [vmem:[%s3594_s17 + $0x1240] sm:$0xff] %v1746_v17  ;;  %v1752_v29 = vmul.f32 0.0, %v728_v26  ;;  %v730_v31 = vld [vmem:[%s3579_s30 + $0x1280] sm:$0xff]  ;;  %v731_v32 = vld [vmem:[%s3579_s30 + $0x1288] sm:$0xff]  ;;  %2771 = vst [vmem:[%s3594_s17 + $0x1248] sm:$0xff] %v1747_v21  ;;  %v1753_v33 = vmul.f32 0.0, %v729_v30 }
 0x15d   : > { %2772 = vst [vmem:[%s3594_s17 + $0x1250] sm:$0xff] %v1748_v22  ;;  %2773 = vst [vmem:[%s3594_s17 + $0x1258] sm:$0xff] %v1749_v23  ;;  %v1754_v34 = vmul.f32 0.0, %v730_v31  ;;  %v1755_v35 = vmul.f32 0.0, %v731_v32  ;;  %v732_v36 = vld [vmem:[%s3579_s30 + $0x1290] sm:$0xff]  ;;  %v733_v37 = vld [vmem:[%s3579_s30 + $0x1298] sm:$0xff] }
 0x15e   : > { %v734_v38 = vld [vmem:[%s3579_s30 + $0x12a0] sm:$0xff]  ;;  %2774 = vst [vmem:[%s3594_s17 + $0x1260] sm:$0xff] %v1750_v27  ;;  %2775 = vst [vmem:[%s3594_s17 + $0x1268] sm:$0xff] %v1751_v28  ;;  %v1756_v39 = vmul.f32 0.0, %v732_v36  ;;  %v1757_v40 = vmul.f32 0.0, %v733_v37  ;;  %v735_v42 = vld [vmem:[%s3579_s30 + $0x12a8] sm:$0xff] }
 0x15f   : > { %2776 = vst [vmem:[%s3594_s17 + $0x1270] sm:$0xff] %v1752_v29  ;;  %v1758_v41 = vmul.f32 0.0, %v734_v38  ;;  %v736_v43 = vld [vmem:[%s3579_s30 + $0x12b0] sm:$0xff]  ;;  %v737_v44 = vld [vmem:[%s3579_s30 + $0x12b8] sm:$0xff]  ;;  %2777 = vst [vmem:[%s3594_s17 + $0x1278] sm:$0xff] %v1753_v33  ;;  %v1759_v45 = vmul.f32 0.0, %v735_v42 }
 0x160   : > { %2778 = vst [vmem:[%s3594_s17 + $0x1280] sm:$0xff] %v1754_v34  ;;  %2779 = vst [vmem:[%s3594_s17 + $0x1288] sm:$0xff] %v1755_v35  ;;  %v1760_v46 = vmul.f32 0.0, %v736_v43  ;;  %v1761_v47 = vmul.f32 0.0, %v737_v44  ;;  %v738_v48 = vld [vmem:[%s3579_s30 + $0x12c0] sm:$0xff]  ;;  %v739_v49 = vld [vmem:[%s3579_s30 + $0x12c8] sm:$0xff] }
 0x161   : > { %v740_v50 = vld [vmem:[%s3579_s30 + $0x12d0] sm:$0xff]  ;;  %2780 = vst [vmem:[%s3594_s17 + $0x1290] sm:$0xff] %v1756_v39  ;;  %2781 = vst [vmem:[%s3594_s17 + $0x1298] sm:$0xff] %v1757_v40  ;;  %v1762_v51 = vmul.f32 0.0, %v738_v48  ;;  %v1763_v52 = vmul.f32 0.0, %v739_v49  ;;  %v741_v54 = vld [vmem:[%s3579_s30 + $0x12d8] sm:$0xff] }
 0x162   : > { %2782 = vst [vmem:[%s3594_s17 + $0x12a0] sm:$0xff] %v1758_v41  ;;  %v1764_v53 = vmul.f32 0.0, %v740_v50  ;;  %v742_v55 = vld [vmem:[%s3579_s30 + $0x12e0] sm:$0xff]  ;;  %v743_v56 = vld [vmem:[%s3579_s30 + $0x12e8] sm:$0xff]  ;;  %2783 = vst [vmem:[%s3594_s17 + $0x12a8] sm:$0xff] %v1759_v45  ;;  %v1765_v57 = vmul.f32 0.0, %v741_v54 }
 0x163   : > { %2784 = vst [vmem:[%s3594_s17 + $0x12b0] sm:$0xff] %v1760_v46  ;;  %2785 = vst [vmem:[%s3594_s17 + $0x12b8] sm:$0xff] %v1761_v47  ;;  %v1766_v58 = vmul.f32 0.0, %v742_v55  ;;  %v1767_v59 = vmul.f32 0.0, %v743_v56  ;;  %v744_v60 = vld [vmem:[%s3579_s30 + $0x12f0] sm:$0xff]  ;;  %v745_v61 = vld [vmem:[%s3579_s30 + $0x12f8] sm:$0xff] }
 0x164   : > { %v746_v62 = vld [vmem:[%s3579_s30 + $0x1300] sm:$0xff]  ;;  %2786 = vst [vmem:[%s3594_s17 + $0x12c0] sm:$0xff] %v1762_v51  ;;  %2787 = vst [vmem:[%s3594_s17 + $0x12c8] sm:$0xff] %v1763_v52  ;;  %v1768_v63 = vmul.f32 0.0, %v744_v60  ;;  %v1769_v0 = vmul.f32 0.0, %v745_v61  ;;  %v747_v2 = vld [vmem:[%s3579_s30 + $0x1308] sm:$0xff] }
 0x165   : > { %2788 = vst [vmem:[%s3594_s17 + $0x12d0] sm:$0xff] %v1764_v53  ;;  %v1770_v1 = vmul.f32 0.0, %v746_v62  ;;  %v748_v3 = vld [vmem:[%s3579_s30 + $0x1310] sm:$0xff]  ;;  %v749_v4 = vld [vmem:[%s3579_s30 + $0x1318] sm:$0xff]  ;;  %2789 = vst [vmem:[%s3594_s17 + $0x12d8] sm:$0xff] %v1765_v57  ;;  %v1771_v5 = vmul.f32 0.0, %v747_v2 }
 0x166   : > { %2790 = vst [vmem:[%s3594_s17 + $0x12e0] sm:$0xff] %v1766_v58  ;;  %2791 = vst [vmem:[%s3594_s17 + $0x12e8] sm:$0xff] %v1767_v59  ;;  %v1772_v6 = vmul.f32 0.0, %v748_v3  ;;  %v1773_v7 = vmul.f32 0.0, %v749_v4  ;;  %v750_v8 = vld [vmem:[%s3579_s30 + $0x1320] sm:$0xff]  ;;  %v751_v9 = vld [vmem:[%s3579_s30 + $0x1328] sm:$0xff] }
 0x167   : > { %v752_v10 = vld [vmem:[%s3579_s30 + $0x1330] sm:$0xff]  ;;  %2792 = vst [vmem:[%s3594_s17 + $0x12f0] sm:$0xff] %v1768_v63  ;;  %2793 = vst [vmem:[%s3594_s17 + $0x12f8] sm:$0xff] %v1769_v0  ;;  %v1774_v11 = vmul.f32 0.0, %v750_v8  ;;  %v1775_v12 = vmul.f32 0.0, %v751_v9  ;;  %v753_v14 = vld [vmem:[%s3579_s30 + $0x1338] sm:$0xff] }
 0x168   : > { %2794 = vst [vmem:[%s3594_s17 + $0x1300] sm:$0xff] %v1770_v1  ;;  %v1776_v13 = vmul.f32 0.0, %v752_v10  ;;  %v754_v15 = vld [vmem:[%s3579_s30 + $0x1340] sm:$0xff]  ;;  %v755_v16 = vld [vmem:[%s3579_s30 + $0x1348] sm:$0xff]  ;;  %2795 = vst [vmem:[%s3594_s17 + $0x1308] sm:$0xff] %v1771_v5  ;;  %v1777_v17 = vmul.f32 0.0, %v753_v14 }
 0x169   : > { %2796 = vst [vmem:[%s3594_s17 + $0x1310] sm:$0xff] %v1772_v6  ;;  %2797 = vst [vmem:[%s3594_s17 + $0x1318] sm:$0xff] %v1773_v7  ;;  %v1778_v18 = vmul.f32 0.0, %v754_v15  ;;  %v1779_v19 = vmul.f32 0.0, %v755_v16  ;;  %v756_v20 = vld [vmem:[%s3579_s30 + $0x1350] sm:$0xff]  ;;  %v757_v21 = vld [vmem:[%s3579_s30 + $0x1358] sm:$0xff] }
 0x16a   : > { %v758_v22 = vld [vmem:[%s3579_s30 + $0x1360] sm:$0xff]  ;;  %2798 = vst [vmem:[%s3594_s17 + $0x1320] sm:$0xff] %v1774_v11  ;;  %2799 = vst [vmem:[%s3594_s17 + $0x1328] sm:$0xff] %v1775_v12  ;;  %v1780_v23 = vmul.f32 0.0, %v756_v20  ;;  %v1781_v24 = vmul.f32 0.0, %v757_v21  ;;  %v759_v26 = vld [vmem:[%s3579_s30 + $0x1368] sm:$0xff] }
 0x16b   : > { %2800 = vst [vmem:[%s3594_s17 + $0x1330] sm:$0xff] %v1776_v13  ;;  %v1782_v25 = vmul.f32 0.0, %v758_v22  ;;  %v760_v27 = vld [vmem:[%s3579_s30 + $0x1370] sm:$0xff]  ;;  %v761_v28 = vld [vmem:[%s3579_s30 + $0x1378] sm:$0xff]  ;;  %2801 = vst [vmem:[%s3594_s17 + $0x1338] sm:$0xff] %v1777_v17  ;;  %v1783_v29 = vmul.f32 0.0, %v759_v26 }
 0x16c   : > { %2802 = vst [vmem:[%s3594_s17 + $0x1340] sm:$0xff] %v1778_v18  ;;  %2803 = vst [vmem:[%s3594_s17 + $0x1348] sm:$0xff] %v1779_v19  ;;  %v1784_v30 = vmul.f32 0.0, %v760_v27  ;;  %v1785_v31 = vmul.f32 0.0, %v761_v28  ;;  %v762_v32 = vld [vmem:[%s3579_s30 + $0x1380] sm:$0xff]  ;;  %v763_v33 = vld [vmem:[%s3579_s30 + $0x1388] sm:$0xff] }
 0x16d   : > { %v764_v34 = vld [vmem:[%s3579_s30 + $0x1390] sm:$0xff]  ;;  %2804 = vst [vmem:[%s3594_s17 + $0x1350] sm:$0xff] %v1780_v23  ;;  %2805 = vst [vmem:[%s3594_s17 + $0x1358] sm:$0xff] %v1781_v24  ;;  %v1786_v35 = vmul.f32 0.0, %v762_v32  ;;  %v1787_v36 = vmul.f32 0.0, %v763_v33  ;;  %v765_v38 = vld [vmem:[%s3579_s30 + $0x1398] sm:$0xff] }
 0x16e   : > { %2806 = vst [vmem:[%s3594_s17 + $0x1360] sm:$0xff] %v1782_v25  ;;  %v1788_v37 = vmul.f32 0.0, %v764_v34  ;;  %v766_v39 = vld [vmem:[%s3579_s30 + $0x13a0] sm:$0xff]  ;;  %v767_v40 = vld [vmem:[%s3579_s30 + $0x13a8] sm:$0xff]  ;;  %2807 = vst [vmem:[%s3594_s17 + $0x1368] sm:$0xff] %v1783_v29  ;;  %v1789_v41 = vmul.f32 0.0, %v765_v38 }
 0x16f   : > { %2808 = vst [vmem:[%s3594_s17 + $0x1370] sm:$0xff] %v1784_v30  ;;  %2809 = vst [vmem:[%s3594_s17 + $0x1378] sm:$0xff] %v1785_v31  ;;  %v1790_v42 = vmul.f32 0.0, %v766_v39  ;;  %v1791_v43 = vmul.f32 0.0, %v767_v40  ;;  %v768_v44 = vld [vmem:[%s3579_s30 + $0x13b0] sm:$0xff]  ;;  %v769_v45 = vld [vmem:[%s3579_s30 + $0x13b8] sm:$0xff] }
 0x170   : > { %v770_v46 = vld [vmem:[%s3579_s30 + $0x13c0] sm:$0xff]  ;;  %2810 = vst [vmem:[%s3594_s17 + $0x1380] sm:$0xff] %v1786_v35  ;;  %2811 = vst [vmem:[%s3594_s17 + $0x1388] sm:$0xff] %v1787_v36  ;;  %v1792_v47 = vmul.f32 0.0, %v768_v44  ;;  %v1793_v48 = vmul.f32 0.0, %v769_v45  ;;  %v771_v50 = vld [vmem:[%s3579_s30 + $0x13c8] sm:$0xff] }
 0x171   : > { %2812 = vst [vmem:[%s3594_s17 + $0x1390] sm:$0xff] %v1788_v37  ;;  %v1794_v49 = vmul.f32 0.0, %v770_v46  ;;  %v772_v51 = vld [vmem:[%s3579_s30 + $0x13d0] sm:$0xff]  ;;  %v773_v52 = vld [vmem:[%s3579_s30 + $0x13d8] sm:$0xff]  ;;  %2813 = vst [vmem:[%s3594_s17 + $0x1398] sm:$0xff] %v1789_v41  ;;  %v1795_v53 = vmul.f32 0.0, %v771_v50 }
 0x172   : > { %2814 = vst [vmem:[%s3594_s17 + $0x13a0] sm:$0xff] %v1790_v42  ;;  %2815 = vst [vmem:[%s3594_s17 + $0x13a8] sm:$0xff] %v1791_v43  ;;  %v1796_v54 = vmul.f32 0.0, %v772_v51  ;;  %v1797_v55 = vmul.f32 0.0, %v773_v52  ;;  %v774_v56 = vld [vmem:[%s3579_s30 + $0x13e0] sm:$0xff]  ;;  %v775_v57 = vld [vmem:[%s3579_s30 + $0x13e8] sm:$0xff] }
 0x173   : > { %v776_v58 = vld [vmem:[%s3579_s30 + $0x13f0] sm:$0xff]  ;;  %2816 = vst [vmem:[%s3594_s17 + $0x13b0] sm:$0xff] %v1792_v47  ;;  %2817 = vst [vmem:[%s3594_s17 + $0x13b8] sm:$0xff] %v1793_v48  ;;  %v1798_v59 = vmul.f32 0.0, %v774_v56  ;;  %v1799_v60 = vmul.f32 0.0, %v775_v57  ;;  %v777_v62 = vld [vmem:[%s3579_s30 + $0x13f8] sm:$0xff] }
 0x174   : > { %2818 = vst [vmem:[%s3594_s17 + $0x13c0] sm:$0xff] %v1794_v49  ;;  %v1800_v61 = vmul.f32 0.0, %v776_v58  ;;  %v778_v63 = vld [vmem:[%s3579_s30 + $0x1400] sm:$0xff]  ;;  %v779_v0 = vld [vmem:[%s3579_s30 + $0x1408] sm:$0xff]  ;;  %2819 = vst [vmem:[%s3594_s17 + $0x13c8] sm:$0xff] %v1795_v53  ;;  %v1801_v1 = vmul.f32 0.0, %v777_v62 }
 0x175   : > { %2820 = vst [vmem:[%s3594_s17 + $0x13d0] sm:$0xff] %v1796_v54  ;;  %2821 = vst [vmem:[%s3594_s17 + $0x13d8] sm:$0xff] %v1797_v55  ;;  %v1802_v2 = vmul.f32 0.0, %v778_v63  ;;  %v1803_v3 = vmul.f32 0.0, %v779_v0  ;;  %v780_v4 = vld [vmem:[%s3579_s30 + $0x1410] sm:$0xff]  ;;  %v781_v5 = vld [vmem:[%s3579_s30 + $0x1418] sm:$0xff] }
 0x176   : > { %v782_v6 = vld [vmem:[%s3579_s30 + $0x1420] sm:$0xff]  ;;  %2822 = vst [vmem:[%s3594_s17 + $0x13e0] sm:$0xff] %v1798_v59  ;;  %2823 = vst [vmem:[%s3594_s17 + $0x13e8] sm:$0xff] %v1799_v60  ;;  %v1804_v7 = vmul.f32 0.0, %v780_v4  ;;  %v1805_v8 = vmul.f32 0.0, %v781_v5  ;;  %v783_v10 = vld [vmem:[%s3579_s30 + $0x1428] sm:$0xff] }
 0x177   : > { %2824 = vst [vmem:[%s3594_s17 + $0x13f0] sm:$0xff] %v1800_v61  ;;  %v1806_v9 = vmul.f32 0.0, %v782_v6  ;;  %v784_v11 = vld [vmem:[%s3579_s30 + $0x1430] sm:$0xff]  ;;  %v785_v12 = vld [vmem:[%s3579_s30 + $0x1438] sm:$0xff]  ;;  %2825 = vst [vmem:[%s3594_s17 + $0x13f8] sm:$0xff] %v1801_v1  ;;  %v1807_v13 = vmul.f32 0.0, %v783_v10 }
 0x178   : > { %2826 = vst [vmem:[%s3594_s17 + $0x1400] sm:$0xff] %v1802_v2  ;;  %2827 = vst [vmem:[%s3594_s17 + $0x1408] sm:$0xff] %v1803_v3  ;;  %v1808_v14 = vmul.f32 0.0, %v784_v11  ;;  %v1809_v15 = vmul.f32 0.0, %v785_v12  ;;  %v786_v16 = vld [vmem:[%s3579_s30 + $0x1440] sm:$0xff]  ;;  %v787_v17 = vld [vmem:[%s3579_s30 + $0x1448] sm:$0xff] }
 0x179   : > { %v788_v18 = vld [vmem:[%s3579_s30 + $0x1450] sm:$0xff]  ;;  %2828 = vst [vmem:[%s3594_s17 + $0x1410] sm:$0xff] %v1804_v7  ;;  %2829 = vst [vmem:[%s3594_s17 + $0x1418] sm:$0xff] %v1805_v8  ;;  %v1810_v19 = vmul.f32 0.0, %v786_v16  ;;  %v1811_v20 = vmul.f32 0.0, %v787_v17  ;;  %v789_v22 = vld [vmem:[%s3579_s30 + $0x1458] sm:$0xff] }
 0x17a   : > { %2830 = vst [vmem:[%s3594_s17 + $0x1420] sm:$0xff] %v1806_v9  ;;  %v1812_v21 = vmul.f32 0.0, %v788_v18  ;;  %v790_v23 = vld [vmem:[%s3579_s30 + $0x1460] sm:$0xff]  ;;  %v791_v24 = vld [vmem:[%s3579_s30 + $0x1468] sm:$0xff]  ;;  %2831 = vst [vmem:[%s3594_s17 + $0x1428] sm:$0xff] %v1807_v13  ;;  %v1813_v25 = vmul.f32 0.0, %v789_v22 }
 0x17b   : > { %2832 = vst [vmem:[%s3594_s17 + $0x1430] sm:$0xff] %v1808_v14  ;;  %2833 = vst [vmem:[%s3594_s17 + $0x1438] sm:$0xff] %v1809_v15  ;;  %v1814_v26 = vmul.f32 0.0, %v790_v23  ;;  %v1815_v27 = vmul.f32 0.0, %v791_v24  ;;  %v792_v28 = vld [vmem:[%s3579_s30 + $0x1470] sm:$0xff]  ;;  %v793_v29 = vld [vmem:[%s3579_s30 + $0x1478] sm:$0xff] }
 0x17c   : > { %v794_v30 = vld [vmem:[%s3579_s30 + $0x1480] sm:$0xff]  ;;  %2834 = vst [vmem:[%s3594_s17 + $0x1440] sm:$0xff] %v1810_v19  ;;  %2835 = vst [vmem:[%s3594_s17 + $0x1448] sm:$0xff] %v1811_v20  ;;  %v1816_v31 = vmul.f32 0.0, %v792_v28  ;;  %v1817_v32 = vmul.f32 0.0, %v793_v29  ;;  %v795_v34 = vld [vmem:[%s3579_s30 + $0x1488] sm:$0xff] }
 0x17d   : > { %2836 = vst [vmem:[%s3594_s17 + $0x1450] sm:$0xff] %v1812_v21  ;;  %v1818_v33 = vmul.f32 0.0, %v794_v30  ;;  %v796_v35 = vld [vmem:[%s3579_s30 + $0x1490] sm:$0xff]  ;;  %v797_v36 = vld [vmem:[%s3579_s30 + $0x1498] sm:$0xff]  ;;  %2837 = vst [vmem:[%s3594_s17 + $0x1458] sm:$0xff] %v1813_v25  ;;  %v1819_v37 = vmul.f32 0.0, %v795_v34 }
 0x17e   : > { %2838 = vst [vmem:[%s3594_s17 + $0x1460] sm:$0xff] %v1814_v26  ;;  %2839 = vst [vmem:[%s3594_s17 + $0x1468] sm:$0xff] %v1815_v27  ;;  %v1820_v38 = vmul.f32 0.0, %v796_v35  ;;  %v1821_v39 = vmul.f32 0.0, %v797_v36  ;;  %v798_v40 = vld [vmem:[%s3579_s30 + $0x14a0] sm:$0xff]  ;;  %v799_v41 = vld [vmem:[%s3579_s30 + $0x14a8] sm:$0xff] }
 0x17f   : > { %v800_v42 = vld [vmem:[%s3579_s30 + $0x14b0] sm:$0xff]  ;;  %2840 = vst [vmem:[%s3594_s17 + $0x1470] sm:$0xff] %v1816_v31  ;;  %2841 = vst [vmem:[%s3594_s17 + $0x1478] sm:$0xff] %v1817_v32  ;;  %v1822_v43 = vmul.f32 0.0, %v798_v40  ;;  %v1823_v44 = vmul.f32 0.0, %v799_v41  ;;  %v801_v46 = vld [vmem:[%s3579_s30 + $0x14b8] sm:$0xff] }
 0x180   : > { %2842 = vst [vmem:[%s3594_s17 + $0x1480] sm:$0xff] %v1818_v33  ;;  %v1824_v45 = vmul.f32 0.0, %v800_v42  ;;  %v802_v47 = vld [vmem:[%s3579_s30 + $0x14c0] sm:$0xff]  ;;  %v803_v48 = vld [vmem:[%s3579_s30 + $0x14c8] sm:$0xff]  ;;  %2843 = vst [vmem:[%s3594_s17 + $0x1488] sm:$0xff] %v1819_v37  ;;  %v1825_v49 = vmul.f32 0.0, %v801_v46 }
 0x181   : > { %2844 = vst [vmem:[%s3594_s17 + $0x1490] sm:$0xff] %v1820_v38  ;;  %2845 = vst [vmem:[%s3594_s17 + $0x1498] sm:$0xff] %v1821_v39  ;;  %v1826_v50 = vmul.f32 0.0, %v802_v47  ;;  %v1827_v51 = vmul.f32 0.0, %v803_v48  ;;  %v804_v52 = vld [vmem:[%s3579_s30 + $0x14d0] sm:$0xff]  ;;  %v805_v53 = vld [vmem:[%s3579_s30 + $0x14d8] sm:$0xff] }
 0x182   : > { %v806_v54 = vld [vmem:[%s3579_s30 + $0x14e0] sm:$0xff]  ;;  %2846 = vst [vmem:[%s3594_s17 + $0x14a0] sm:$0xff] %v1822_v43  ;;  %2847 = vst [vmem:[%s3594_s17 + $0x14a8] sm:$0xff] %v1823_v44  ;;  %v1828_v55 = vmul.f32 0.0, %v804_v52  ;;  %v1829_v56 = vmul.f32 0.0, %v805_v53  ;;  %v807_v58 = vld [vmem:[%s3579_s30 + $0x14e8] sm:$0xff] }
 0x183   : > { %2848 = vst [vmem:[%s3594_s17 + $0x14b0] sm:$0xff] %v1824_v45  ;;  %v1830_v57 = vmul.f32 0.0, %v806_v54  ;;  %v808_v59 = vld [vmem:[%s3579_s30 + $0x14f0] sm:$0xff]  ;;  %v809_v60 = vld [vmem:[%s3579_s30 + $0x14f8] sm:$0xff]  ;;  %2849 = vst [vmem:[%s3594_s17 + $0x14b8] sm:$0xff] %v1825_v49  ;;  %v1831_v61 = vmul.f32 0.0, %v807_v58 }
 0x184   : > { %2850 = vst [vmem:[%s3594_s17 + $0x14c0] sm:$0xff] %v1826_v50  ;;  %2851 = vst [vmem:[%s3594_s17 + $0x14c8] sm:$0xff] %v1827_v51  ;;  %v1832_v62 = vmul.f32 0.0, %v808_v59  ;;  %v1833_v63 = vmul.f32 0.0, %v809_v60  ;;  %v810_v0 = vld [vmem:[%s3579_s30 + $0x1500] sm:$0xff]  ;;  %v811_v1 = vld [vmem:[%s3579_s30 + $0x1508] sm:$0xff] }
 0x185   : > { %v812_v2 = vld [vmem:[%s3579_s30 + $0x1510] sm:$0xff]  ;;  %2852 = vst [vmem:[%s3594_s17 + $0x14d0] sm:$0xff] %v1828_v55  ;;  %2853 = vst [vmem:[%s3594_s17 + $0x14d8] sm:$0xff] %v1829_v56  ;;  %v1834_v3 = vmul.f32 0.0, %v810_v0  ;;  %v1835_v4 = vmul.f32 0.0, %v811_v1  ;;  %v813_v6 = vld [vmem:[%s3579_s30 + $0x1518] sm:$0xff] }
 0x186   : > { %2854 = vst [vmem:[%s3594_s17 + $0x14e0] sm:$0xff] %v1830_v57  ;;  %v1836_v5 = vmul.f32 0.0, %v812_v2  ;;  %v814_v7 = vld [vmem:[%s3579_s30 + $0x1520] sm:$0xff]  ;;  %v815_v8 = vld [vmem:[%s3579_s30 + $0x1528] sm:$0xff]  ;;  %2855 = vst [vmem:[%s3594_s17 + $0x14e8] sm:$0xff] %v1831_v61  ;;  %v1837_v9 = vmul.f32 0.0, %v813_v6 }
 0x187   : > { %2856 = vst [vmem:[%s3594_s17 + $0x14f0] sm:$0xff] %v1832_v62  ;;  %2857 = vst [vmem:[%s3594_s17 + $0x14f8] sm:$0xff] %v1833_v63  ;;  %v1838_v10 = vmul.f32 0.0, %v814_v7  ;;  %v1839_v11 = vmul.f32 0.0, %v815_v8  ;;  %v816_v12 = vld [vmem:[%s3579_s30 + $0x1530] sm:$0xff]  ;;  %v817_v13 = vld [vmem:[%s3579_s30 + $0x1538] sm:$0xff] }
 0x188   : > { %v818_v14 = vld [vmem:[%s3579_s30 + $0x1540] sm:$0xff]  ;;  %2858 = vst [vmem:[%s3594_s17 + $0x1500] sm:$0xff] %v1834_v3  ;;  %2859 = vst [vmem:[%s3594_s17 + $0x1508] sm:$0xff] %v1835_v4  ;;  %v1840_v15 = vmul.f32 0.0, %v816_v12  ;;  %v1841_v16 = vmul.f32 0.0, %v817_v13  ;;  %v819_v18 = vld [vmem:[%s3579_s30 + $0x1548] sm:$0xff] }
 0x189   : > { %2860 = vst [vmem:[%s3594_s17 + $0x1510] sm:$0xff] %v1836_v5  ;;  %v1842_v17 = vmul.f32 0.0, %v818_v14  ;;  %v820_v19 = vld [vmem:[%s3579_s30 + $0x1550] sm:$0xff]  ;;  %v821_v20 = vld [vmem:[%s3579_s30 + $0x1558] sm:$0xff]  ;;  %2861 = vst [vmem:[%s3594_s17 + $0x1518] sm:$0xff] %v1837_v9  ;;  %v1843_v21 = vmul.f32 0.0, %v819_v18 }
 0x18a   : > { %2862 = vst [vmem:[%s3594_s17 + $0x1520] sm:$0xff] %v1838_v10  ;;  %2863 = vst [vmem:[%s3594_s17 + $0x1528] sm:$0xff] %v1839_v11  ;;  %v1844_v22 = vmul.f32 0.0, %v820_v19  ;;  %v1845_v23 = vmul.f32 0.0, %v821_v20  ;;  %v822_v24 = vld [vmem:[%s3579_s30 + $0x1560] sm:$0xff]  ;;  %v823_v25 = vld [vmem:[%s3579_s30 + $0x1568] sm:$0xff] }
 0x18b   : > { %v824_v26 = vld [vmem:[%s3579_s30 + $0x1570] sm:$0xff]  ;;  %2864 = vst [vmem:[%s3594_s17 + $0x1530] sm:$0xff] %v1840_v15  ;;  %2865 = vst [vmem:[%s3594_s17 + $0x1538] sm:$0xff] %v1841_v16  ;;  %v1846_v27 = vmul.f32 0.0, %v822_v24  ;;  %v1847_v28 = vmul.f32 0.0, %v823_v25  ;;  %v825_v30 = vld [vmem:[%s3579_s30 + $0x1578] sm:$0xff] }
 0x18c   : > { %2866 = vst [vmem:[%s3594_s17 + $0x1540] sm:$0xff] %v1842_v17  ;;  %v1848_v29 = vmul.f32 0.0, %v824_v26  ;;  %v826_v31 = vld [vmem:[%s3579_s30 + $0x1580] sm:$0xff]  ;;  %v827_v32 = vld [vmem:[%s3579_s30 + $0x1588] sm:$0xff]  ;;  %2867 = vst [vmem:[%s3594_s17 + $0x1548] sm:$0xff] %v1843_v21  ;;  %v1849_v33 = vmul.f32 0.0, %v825_v30 }
 0x18d   : > { %2868 = vst [vmem:[%s3594_s17 + $0x1550] sm:$0xff] %v1844_v22  ;;  %2869 = vst [vmem:[%s3594_s17 + $0x1558] sm:$0xff] %v1845_v23  ;;  %v1850_v34 = vmul.f32 0.0, %v826_v31  ;;  %v1851_v35 = vmul.f32 0.0, %v827_v32  ;;  %v828_v36 = vld [vmem:[%s3579_s30 + $0x1590] sm:$0xff]  ;;  %v829_v37 = vld [vmem:[%s3579_s30 + $0x1598] sm:$0xff] }
 0x18e   : > { %v830_v38 = vld [vmem:[%s3579_s30 + $0x15a0] sm:$0xff]  ;;  %2870 = vst [vmem:[%s3594_s17 + $0x1560] sm:$0xff] %v1846_v27  ;;  %2871 = vst [vmem:[%s3594_s17 + $0x1568] sm:$0xff] %v1847_v28  ;;  %v1852_v39 = vmul.f32 0.0, %v828_v36  ;;  %v1853_v40 = vmul.f32 0.0, %v829_v37  ;;  %v831_v42 = vld [vmem:[%s3579_s30 + $0x15a8] sm:$0xff] }
 0x18f   : > { %2872 = vst [vmem:[%s3594_s17 + $0x1570] sm:$0xff] %v1848_v29  ;;  %v1854_v41 = vmul.f32 0.0, %v830_v38  ;;  %v832_v43 = vld [vmem:[%s3579_s30 + $0x15b0] sm:$0xff]  ;;  %v833_v44 = vld [vmem:[%s3579_s30 + $0x15b8] sm:$0xff]  ;;  %2873 = vst [vmem:[%s3594_s17 + $0x1578] sm:$0xff] %v1849_v33  ;;  %v1855_v45 = vmul.f32 0.0, %v831_v42 }
 0x190   : > { %2874 = vst [vmem:[%s3594_s17 + $0x1580] sm:$0xff] %v1850_v34  ;;  %2875 = vst [vmem:[%s3594_s17 + $0x1588] sm:$0xff] %v1851_v35  ;;  %v1856_v46 = vmul.f32 0.0, %v832_v43  ;;  %v1857_v47 = vmul.f32 0.0, %v833_v44  ;;  %v834_v48 = vld [vmem:[%s3579_s30 + $0x15c0] sm:$0xff]  ;;  %v835_v49 = vld [vmem:[%s3579_s30 + $0x15c8] sm:$0xff] }
 0x191   : > { %v836_v50 = vld [vmem:[%s3579_s30 + $0x15d0] sm:$0xff]  ;;  %2876 = vst [vmem:[%s3594_s17 + $0x1590] sm:$0xff] %v1852_v39  ;;  %2877 = vst [vmem:[%s3594_s17 + $0x1598] sm:$0xff] %v1853_v40  ;;  %v1858_v51 = vmul.f32 0.0, %v834_v48  ;;  %v1859_v52 = vmul.f32 0.0, %v835_v49  ;;  %v837_v54 = vld [vmem:[%s3579_s30 + $0x15d8] sm:$0xff] }
 0x192   : > { %2878 = vst [vmem:[%s3594_s17 + $0x15a0] sm:$0xff] %v1854_v41  ;;  %v1860_v53 = vmul.f32 0.0, %v836_v50  ;;  %v838_v55 = vld [vmem:[%s3579_s30 + $0x15e0] sm:$0xff]  ;;  %v839_v56 = vld [vmem:[%s3579_s30 + $0x15e8] sm:$0xff]  ;;  %2879 = vst [vmem:[%s3594_s17 + $0x15a8] sm:$0xff] %v1855_v45  ;;  %v1861_v57 = vmul.f32 0.0, %v837_v54 }
 0x193   : > { %2880 = vst [vmem:[%s3594_s17 + $0x15b0] sm:$0xff] %v1856_v46  ;;  %2881 = vst [vmem:[%s3594_s17 + $0x15b8] sm:$0xff] %v1857_v47  ;;  %v1862_v58 = vmul.f32 0.0, %v838_v55  ;;  %v1863_v59 = vmul.f32 0.0, %v839_v56  ;;  %v840_v60 = vld [vmem:[%s3579_s30 + $0x15f0] sm:$0xff]  ;;  %v841_v61 = vld [vmem:[%s3579_s30 + $0x15f8] sm:$0xff] }
 0x194   : > { %v842_v62 = vld [vmem:[%s3579_s30 + $0x1600] sm:$0xff]  ;;  %2882 = vst [vmem:[%s3594_s17 + $0x15c0] sm:$0xff] %v1858_v51  ;;  %2883 = vst [vmem:[%s3594_s17 + $0x15c8] sm:$0xff] %v1859_v52  ;;  %v1864_v63 = vmul.f32 0.0, %v840_v60  ;;  %v1865_v0 = vmul.f32 0.0, %v841_v61  ;;  %v843_v2 = vld [vmem:[%s3579_s30 + $0x1608] sm:$0xff] }
 0x195   : > { %2884 = vst [vmem:[%s3594_s17 + $0x15d0] sm:$0xff] %v1860_v53  ;;  %v1866_v1 = vmul.f32 0.0, %v842_v62  ;;  %v844_v3 = vld [vmem:[%s3579_s30 + $0x1610] sm:$0xff]  ;;  %v845_v4 = vld [vmem:[%s3579_s30 + $0x1618] sm:$0xff]  ;;  %2885 = vst [vmem:[%s3594_s17 + $0x15d8] sm:$0xff] %v1861_v57  ;;  %v1867_v5 = vmul.f32 0.0, %v843_v2 }
 0x196   : > { %2886 = vst [vmem:[%s3594_s17 + $0x15e0] sm:$0xff] %v1862_v58  ;;  %2887 = vst [vmem:[%s3594_s17 + $0x15e8] sm:$0xff] %v1863_v59  ;;  %v1868_v6 = vmul.f32 0.0, %v844_v3  ;;  %v1869_v7 = vmul.f32 0.0, %v845_v4  ;;  %v846_v8 = vld [vmem:[%s3579_s30 + $0x1620] sm:$0xff]  ;;  %v847_v9 = vld [vmem:[%s3579_s30 + $0x1628] sm:$0xff] }
 0x197   : > { %v848_v10 = vld [vmem:[%s3579_s30 + $0x1630] sm:$0xff]  ;;  %2888 = vst [vmem:[%s3594_s17 + $0x15f0] sm:$0xff] %v1864_v63  ;;  %2889 = vst [vmem:[%s3594_s17 + $0x15f8] sm:$0xff] %v1865_v0  ;;  %v1870_v11 = vmul.f32 0.0, %v846_v8  ;;  %v1871_v12 = vmul.f32 0.0, %v847_v9  ;;  %v849_v14 = vld [vmem:[%s3579_s30 + $0x1638] sm:$0xff] }
 0x198   : > { %2890 = vst [vmem:[%s3594_s17 + $0x1600] sm:$0xff] %v1866_v1  ;;  %v1872_v13 = vmul.f32 0.0, %v848_v10  ;;  %v850_v15 = vld [vmem:[%s3579_s30 + $0x1640] sm:$0xff]  ;;  %v851_v16 = vld [vmem:[%s3579_s30 + $0x1648] sm:$0xff]  ;;  %2891 = vst [vmem:[%s3594_s17 + $0x1608] sm:$0xff] %v1867_v5  ;;  %v1873_v17 = vmul.f32 0.0, %v849_v14 }
 0x199   : > { %2892 = vst [vmem:[%s3594_s17 + $0x1610] sm:$0xff] %v1868_v6  ;;  %2893 = vst [vmem:[%s3594_s17 + $0x1618] sm:$0xff] %v1869_v7  ;;  %v1874_v18 = vmul.f32 0.0, %v850_v15  ;;  %v1875_v19 = vmul.f32 0.0, %v851_v16  ;;  %v852_v20 = vld [vmem:[%s3579_s30 + $0x1650] sm:$0xff]  ;;  %v853_v21 = vld [vmem:[%s3579_s30 + $0x1658] sm:$0xff] }
 0x19a   : > { %v854_v22 = vld [vmem:[%s3579_s30 + $0x1660] sm:$0xff]  ;;  %2894 = vst [vmem:[%s3594_s17 + $0x1620] sm:$0xff] %v1870_v11  ;;  %2895 = vst [vmem:[%s3594_s17 + $0x1628] sm:$0xff] %v1871_v12  ;;  %v1876_v23 = vmul.f32 0.0, %v852_v20  ;;  %v1877_v24 = vmul.f32 0.0, %v853_v21  ;;  %v855_v26 = vld [vmem:[%s3579_s30 + $0x1668] sm:$0xff] }
 0x19b   : > { %2896 = vst [vmem:[%s3594_s17 + $0x1630] sm:$0xff] %v1872_v13  ;;  %v1878_v25 = vmul.f32 0.0, %v854_v22  ;;  %v856_v27 = vld [vmem:[%s3579_s30 + $0x1670] sm:$0xff]  ;;  %v857_v28 = vld [vmem:[%s3579_s30 + $0x1678] sm:$0xff]  ;;  %2897 = vst [vmem:[%s3594_s17 + $0x1638] sm:$0xff] %v1873_v17  ;;  %v1879_v29 = vmul.f32 0.0, %v855_v26 }
 0x19c   : > { %2898 = vst [vmem:[%s3594_s17 + $0x1640] sm:$0xff] %v1874_v18  ;;  %2899 = vst [vmem:[%s3594_s17 + $0x1648] sm:$0xff] %v1875_v19  ;;  %v1880_v30 = vmul.f32 0.0, %v856_v27  ;;  %v1881_v31 = vmul.f32 0.0, %v857_v28  ;;  %v858_v32 = vld [vmem:[%s3579_s30 + $0x1680] sm:$0xff]  ;;  %v859_v33 = vld [vmem:[%s3579_s30 + $0x1688] sm:$0xff] }
 0x19d   : > { %v860_v34 = vld [vmem:[%s3579_s30 + $0x1690] sm:$0xff]  ;;  %2900 = vst [vmem:[%s3594_s17 + $0x1650] sm:$0xff] %v1876_v23  ;;  %2901 = vst [vmem:[%s3594_s17 + $0x1658] sm:$0xff] %v1877_v24  ;;  %v1882_v35 = vmul.f32 0.0, %v858_v32  ;;  %v1883_v36 = vmul.f32 0.0, %v859_v33  ;;  %v861_v38 = vld [vmem:[%s3579_s30 + $0x1698] sm:$0xff] }
 0x19e   : > { %2902 = vst [vmem:[%s3594_s17 + $0x1660] sm:$0xff] %v1878_v25  ;;  %v1884_v37 = vmul.f32 0.0, %v860_v34  ;;  %v862_v39 = vld [vmem:[%s3579_s30 + $0x16a0] sm:$0xff]  ;;  %v863_v40 = vld [vmem:[%s3579_s30 + $0x16a8] sm:$0xff]  ;;  %2903 = vst [vmem:[%s3594_s17 + $0x1668] sm:$0xff] %v1879_v29  ;;  %v1885_v41 = vmul.f32 0.0, %v861_v38 }
 0x19f   : > { %2904 = vst [vmem:[%s3594_s17 + $0x1670] sm:$0xff] %v1880_v30  ;;  %2905 = vst [vmem:[%s3594_s17 + $0x1678] sm:$0xff] %v1881_v31  ;;  %v1886_v42 = vmul.f32 0.0, %v862_v39  ;;  %v1887_v43 = vmul.f32 0.0, %v863_v40  ;;  %v864_v44 = vld [vmem:[%s3579_s30 + $0x16b0] sm:$0xff]  ;;  %v865_v45 = vld [vmem:[%s3579_s30 + $0x16b8] sm:$0xff] }
 0x1a0   : > { %v866_v46 = vld [vmem:[%s3579_s30 + $0x16c0] sm:$0xff]  ;;  %2906 = vst [vmem:[%s3594_s17 + $0x1680] sm:$0xff] %v1882_v35  ;;  %2907 = vst [vmem:[%s3594_s17 + $0x1688] sm:$0xff] %v1883_v36  ;;  %v1888_v47 = vmul.f32 0.0, %v864_v44  ;;  %v1889_v48 = vmul.f32 0.0, %v865_v45  ;;  %v867_v50 = vld [vmem:[%s3579_s30 + $0x16c8] sm:$0xff] }
 0x1a1   : > { %2908 = vst [vmem:[%s3594_s17 + $0x1690] sm:$0xff] %v1884_v37  ;;  %v1890_v49 = vmul.f32 0.0, %v866_v46  ;;  %v868_v51 = vld [vmem:[%s3579_s30 + $0x16d0] sm:$0xff]  ;;  %v869_v52 = vld [vmem:[%s3579_s30 + $0x16d8] sm:$0xff]  ;;  %2909 = vst [vmem:[%s3594_s17 + $0x1698] sm:$0xff] %v1885_v41  ;;  %v1891_v53 = vmul.f32 0.0, %v867_v50 }
 0x1a2   : > { %2910 = vst [vmem:[%s3594_s17 + $0x16a0] sm:$0xff] %v1886_v42  ;;  %2911 = vst [vmem:[%s3594_s17 + $0x16a8] sm:$0xff] %v1887_v43  ;;  %v1892_v54 = vmul.f32 0.0, %v868_v51  ;;  %v1893_v55 = vmul.f32 0.0, %v869_v52  ;;  %v870_v56 = vld [vmem:[%s3579_s30 + $0x16e0] sm:$0xff]  ;;  %v871_v57 = vld [vmem:[%s3579_s30 + $0x16e8] sm:$0xff] }
 0x1a3   : > { %v872_v58 = vld [vmem:[%s3579_s30 + $0x16f0] sm:$0xff]  ;;  %2912 = vst [vmem:[%s3594_s17 + $0x16b0] sm:$0xff] %v1888_v47  ;;  %2913 = vst [vmem:[%s3594_s17 + $0x16b8] sm:$0xff] %v1889_v48  ;;  %v1894_v59 = vmul.f32 0.0, %v870_v56  ;;  %v1895_v60 = vmul.f32 0.0, %v871_v57  ;;  %v873_v62 = vld [vmem:[%s3579_s30 + $0x16f8] sm:$0xff] }
 0x1a4   : > { %2914 = vst [vmem:[%s3594_s17 + $0x16c0] sm:$0xff] %v1890_v49  ;;  %v1896_v61 = vmul.f32 0.0, %v872_v58  ;;  %v874_v63 = vld [vmem:[%s3579_s30 + $0x1700] sm:$0xff]  ;;  %v875_v0 = vld [vmem:[%s3579_s30 + $0x1708] sm:$0xff]  ;;  %2915 = vst [vmem:[%s3594_s17 + $0x16c8] sm:$0xff] %v1891_v53  ;;  %v1897_v1 = vmul.f32 0.0, %v873_v62 }
 0x1a5   : > { %2916 = vst [vmem:[%s3594_s17 + $0x16d0] sm:$0xff] %v1892_v54  ;;  %2917 = vst [vmem:[%s3594_s17 + $0x16d8] sm:$0xff] %v1893_v55  ;;  %v1898_v2 = vmul.f32 0.0, %v874_v63  ;;  %v1899_v3 = vmul.f32 0.0, %v875_v0  ;;  %v876_v4 = vld [vmem:[%s3579_s30 + $0x1710] sm:$0xff]  ;;  %v877_v5 = vld [vmem:[%s3579_s30 + $0x1718] sm:$0xff] }
 0x1a6   : > { %v878_v6 = vld [vmem:[%s3579_s30 + $0x1720] sm:$0xff]  ;;  %2918 = vst [vmem:[%s3594_s17 + $0x16e0] sm:$0xff] %v1894_v59  ;;  %2919 = vst [vmem:[%s3594_s17 + $0x16e8] sm:$0xff] %v1895_v60  ;;  %v1900_v7 = vmul.f32 0.0, %v876_v4  ;;  %v1901_v8 = vmul.f32 0.0, %v877_v5  ;;  %v879_v10 = vld [vmem:[%s3579_s30 + $0x1728] sm:$0xff] }
 0x1a7   : > { %2920 = vst [vmem:[%s3594_s17 + $0x16f0] sm:$0xff] %v1896_v61  ;;  %v1902_v9 = vmul.f32 0.0, %v878_v6  ;;  %v880_v11 = vld [vmem:[%s3579_s30 + $0x1730] sm:$0xff]  ;;  %v881_v12 = vld [vmem:[%s3579_s30 + $0x1738] sm:$0xff]  ;;  %2921 = vst [vmem:[%s3594_s17 + $0x16f8] sm:$0xff] %v1897_v1  ;;  %v1903_v13 = vmul.f32 0.0, %v879_v10 }
 0x1a8   : > { %2922 = vst [vmem:[%s3594_s17 + $0x1700] sm:$0xff] %v1898_v2  ;;  %2923 = vst [vmem:[%s3594_s17 + $0x1708] sm:$0xff] %v1899_v3  ;;  %v1904_v14 = vmul.f32 0.0, %v880_v11  ;;  %v1905_v15 = vmul.f32 0.0, %v881_v12  ;;  %v882_v16 = vld [vmem:[%s3579_s30 + $0x1740] sm:$0xff]  ;;  %v883_v17 = vld [vmem:[%s3579_s30 + $0x1748] sm:$0xff] }
 0x1a9   : > { %v884_v18 = vld [vmem:[%s3579_s30 + $0x1750] sm:$0xff]  ;;  %2924 = vst [vmem:[%s3594_s17 + $0x1710] sm:$0xff] %v1900_v7  ;;  %2925 = vst [vmem:[%s3594_s17 + $0x1718] sm:$0xff] %v1901_v8  ;;  %v1906_v19 = vmul.f32 0.0, %v882_v16  ;;  %v1907_v20 = vmul.f32 0.0, %v883_v17  ;;  %v885_v22 = vld [vmem:[%s3579_s30 + $0x1758] sm:$0xff] }
 0x1aa   : > { %2926 = vst [vmem:[%s3594_s17 + $0x1720] sm:$0xff] %v1902_v9  ;;  %v1908_v21 = vmul.f32 0.0, %v884_v18  ;;  %v886_v23 = vld [vmem:[%s3579_s30 + $0x1760] sm:$0xff]  ;;  %v887_v24 = vld [vmem:[%s3579_s30 + $0x1768] sm:$0xff]  ;;  %2927 = vst [vmem:[%s3594_s17 + $0x1728] sm:$0xff] %v1903_v13  ;;  %v1909_v25 = vmul.f32 0.0, %v885_v22 }
 0x1ab   : > { %2928 = vst [vmem:[%s3594_s17 + $0x1730] sm:$0xff] %v1904_v14  ;;  %2929 = vst [vmem:[%s3594_s17 + $0x1738] sm:$0xff] %v1905_v15  ;;  %v1910_v26 = vmul.f32 0.0, %v886_v23  ;;  %v1911_v27 = vmul.f32 0.0, %v887_v24  ;;  %v888_v28 = vld [vmem:[%s3579_s30 + $0x1770] sm:$0xff]  ;;  %v889_v29 = vld [vmem:[%s3579_s30 + $0x1778] sm:$0xff] }
 0x1ac   : > { %v890_v30 = vld [vmem:[%s3579_s30 + $0x1780] sm:$0xff]  ;;  %2930 = vst [vmem:[%s3594_s17 + $0x1740] sm:$0xff] %v1906_v19  ;;  %2931 = vst [vmem:[%s3594_s17 + $0x1748] sm:$0xff] %v1907_v20  ;;  %v1912_v31 = vmul.f32 0.0, %v888_v28  ;;  %v1913_v32 = vmul.f32 0.0, %v889_v29  ;;  %v891_v34 = vld [vmem:[%s3579_s30 + $0x1788] sm:$0xff] }
 0x1ad   : > { %2932 = vst [vmem:[%s3594_s17 + $0x1750] sm:$0xff] %v1908_v21  ;;  %v1914_v33 = vmul.f32 0.0, %v890_v30  ;;  %v892_v35 = vld [vmem:[%s3579_s30 + $0x1790] sm:$0xff]  ;;  %v893_v36 = vld [vmem:[%s3579_s30 + $0x1798] sm:$0xff]  ;;  %2933 = vst [vmem:[%s3594_s17 + $0x1758] sm:$0xff] %v1909_v25  ;;  %v1915_v37 = vmul.f32 0.0, %v891_v34 }
 0x1ae   : > { %2934 = vst [vmem:[%s3594_s17 + $0x1760] sm:$0xff] %v1910_v26  ;;  %2935 = vst [vmem:[%s3594_s17 + $0x1768] sm:$0xff] %v1911_v27  ;;  %v1916_v38 = vmul.f32 0.0, %v892_v35  ;;  %v1917_v39 = vmul.f32 0.0, %v893_v36  ;;  %v894_v40 = vld [vmem:[%s3579_s30 + $0x17a0] sm:$0xff]  ;;  %v895_v41 = vld [vmem:[%s3579_s30 + $0x17a8] sm:$0xff] }
 0x1af   : > { %v896_v42 = vld [vmem:[%s3579_s30 + $0x17b0] sm:$0xff]  ;;  %2936 = vst [vmem:[%s3594_s17 + $0x1770] sm:$0xff] %v1912_v31  ;;  %2937 = vst [vmem:[%s3594_s17 + $0x1778] sm:$0xff] %v1913_v32  ;;  %v1918_v43 = vmul.f32 0.0, %v894_v40  ;;  %v1919_v44 = vmul.f32 0.0, %v895_v41  ;;  %v897_v46 = vld [vmem:[%s3579_s30 + $0x17b8] sm:$0xff] }
 0x1b0   : > { %2938 = vst [vmem:[%s3594_s17 + $0x1780] sm:$0xff] %v1914_v33  ;;  %v1920_v45 = vmul.f32 0.0, %v896_v42  ;;  %v898_v47 = vld [vmem:[%s3579_s30 + $0x17c0] sm:$0xff]  ;;  %v899_v48 = vld [vmem:[%s3579_s30 + $0x17c8] sm:$0xff]  ;;  %2939 = vst [vmem:[%s3594_s17 + $0x1788] sm:$0xff] %v1915_v37  ;;  %v1921_v49 = vmul.f32 0.0, %v897_v46 }
 0x1b1   : > { %2940 = vst [vmem:[%s3594_s17 + $0x1790] sm:$0xff] %v1916_v38  ;;  %2941 = vst [vmem:[%s3594_s17 + $0x1798] sm:$0xff] %v1917_v39  ;;  %v1922_v50 = vmul.f32 0.0, %v898_v47  ;;  %v1923_v51 = vmul.f32 0.0, %v899_v48  ;;  %v900_v52 = vld [vmem:[%s3579_s30 + $0x17d0] sm:$0xff]  ;;  %v901_v53 = vld [vmem:[%s3579_s30 + $0x17d8] sm:$0xff] }
 0x1b2   : > { %v902_v54 = vld [vmem:[%s3579_s30 + $0x17e0] sm:$0xff]  ;;  %2942 = vst [vmem:[%s3594_s17 + $0x17a0] sm:$0xff] %v1918_v43  ;;  %2943 = vst [vmem:[%s3594_s17 + $0x17a8] sm:$0xff] %v1919_v44  ;;  %v1924_v55 = vmul.f32 0.0, %v900_v52  ;;  %v1925_v56 = vmul.f32 0.0, %v901_v53  ;;  %v903_v58 = vld [vmem:[%s3579_s30 + $0x17e8] sm:$0xff] }
 0x1b3   : > { %2944 = vst [vmem:[%s3594_s17 + $0x17b0] sm:$0xff] %v1920_v45  ;;  %v1926_v57 = vmul.f32 0.0, %v902_v54  ;;  %v904_v59 = vld [vmem:[%s3579_s30 + $0x17f0] sm:$0xff]  ;;  %v905_v60 = vld [vmem:[%s3579_s30 + $0x17f8] sm:$0xff]  ;;  %2945 = vst [vmem:[%s3594_s17 + $0x17b8] sm:$0xff] %v1921_v49  ;;  %v1927_v61 = vmul.f32 0.0, %v903_v58 }
 0x1b4   : > { %2946 = vst [vmem:[%s3594_s17 + $0x17c0] sm:$0xff] %v1922_v50  ;;  %2947 = vst [vmem:[%s3594_s17 + $0x17c8] sm:$0xff] %v1923_v51  ;;  %v1928_v62 = vmul.f32 0.0, %v904_v59  ;;  %v1929_v63 = vmul.f32 0.0, %v905_v60  ;;  %v906_v0 = vld [vmem:[%s3579_s30 + $0x1800] sm:$0xff]  ;;  %v907_v1 = vld [vmem:[%s3579_s30 + $0x1808] sm:$0xff] }
 0x1b5   : > { %v908_v2 = vld [vmem:[%s3579_s30 + $0x1810] sm:$0xff]  ;;  %2948 = vst [vmem:[%s3594_s17 + $0x17d0] sm:$0xff] %v1924_v55  ;;  %2949 = vst [vmem:[%s3594_s17 + $0x17d8] sm:$0xff] %v1925_v56  ;;  %v1930_v3 = vmul.f32 0.0, %v906_v0  ;;  %v1931_v4 = vmul.f32 0.0, %v907_v1  ;;  %v909_v6 = vld [vmem:[%s3579_s30 + $0x1818] sm:$0xff] }
 0x1b6   : > { %2950 = vst [vmem:[%s3594_s17 + $0x17e0] sm:$0xff] %v1926_v57  ;;  %v1932_v5 = vmul.f32 0.0, %v908_v2  ;;  %v910_v7 = vld [vmem:[%s3579_s30 + $0x1820] sm:$0xff]  ;;  %v911_v8 = vld [vmem:[%s3579_s30 + $0x1828] sm:$0xff]  ;;  %2951 = vst [vmem:[%s3594_s17 + $0x17e8] sm:$0xff] %v1927_v61  ;;  %v1933_v9 = vmul.f32 0.0, %v909_v6 }
 0x1b7   : > { %2952 = vst [vmem:[%s3594_s17 + $0x17f0] sm:$0xff] %v1928_v62  ;;  %2953 = vst [vmem:[%s3594_s17 + $0x17f8] sm:$0xff] %v1929_v63  ;;  %v1934_v10 = vmul.f32 0.0, %v910_v7  ;;  %v1935_v11 = vmul.f32 0.0, %v911_v8  ;;  %v912_v12 = vld [vmem:[%s3579_s30 + $0x1830] sm:$0xff]  ;;  %v913_v13 = vld [vmem:[%s3579_s30 + $0x1838] sm:$0xff] }
 0x1b8   : > { %v914_v14 = vld [vmem:[%s3579_s30 + $0x1840] sm:$0xff]  ;;  %2954 = vst [vmem:[%s3594_s17 + $0x1800] sm:$0xff] %v1930_v3  ;;  %2955 = vst [vmem:[%s3594_s17 + $0x1808] sm:$0xff] %v1931_v4  ;;  %v1936_v15 = vmul.f32 0.0, %v912_v12  ;;  %v1937_v16 = vmul.f32 0.0, %v913_v13  ;;  %v915_v18 = vld [vmem:[%s3579_s30 + $0x1848] sm:$0xff] }
 0x1b9   : > { %2956 = vst [vmem:[%s3594_s17 + $0x1810] sm:$0xff] %v1932_v5  ;;  %v1938_v17 = vmul.f32 0.0, %v914_v14  ;;  %v916_v19 = vld [vmem:[%s3579_s30 + $0x1850] sm:$0xff]  ;;  %v917_v20 = vld [vmem:[%s3579_s30 + $0x1858] sm:$0xff]  ;;  %2957 = vst [vmem:[%s3594_s17 + $0x1818] sm:$0xff] %v1933_v9  ;;  %v1939_v21 = vmul.f32 0.0, %v915_v18 }
 0x1ba   : > { %2958 = vst [vmem:[%s3594_s17 + $0x1820] sm:$0xff] %v1934_v10  ;;  %2959 = vst [vmem:[%s3594_s17 + $0x1828] sm:$0xff] %v1935_v11  ;;  %v1940_v22 = vmul.f32 0.0, %v916_v19  ;;  %v1941_v23 = vmul.f32 0.0, %v917_v20  ;;  %v918_v24 = vld [vmem:[%s3579_s30 + $0x1860] sm:$0xff]  ;;  %v919_v25 = vld [vmem:[%s3579_s30 + $0x1868] sm:$0xff] }
 0x1bb   : > { %v920_v26 = vld [vmem:[%s3579_s30 + $0x1870] sm:$0xff]  ;;  %2960 = vst [vmem:[%s3594_s17 + $0x1830] sm:$0xff] %v1936_v15  ;;  %2961 = vst [vmem:[%s3594_s17 + $0x1838] sm:$0xff] %v1937_v16  ;;  %v1942_v27 = vmul.f32 0.0, %v918_v24  ;;  %v1943_v28 = vmul.f32 0.0, %v919_v25  ;;  %v921_v30 = vld [vmem:[%s3579_s30 + $0x1878] sm:$0xff] }
 0x1bc   : > { %2962 = vst [vmem:[%s3594_s17 + $0x1840] sm:$0xff] %v1938_v17  ;;  %v1944_v29 = vmul.f32 0.0, %v920_v26  ;;  %v922_v31 = vld [vmem:[%s3579_s30 + $0x1880] sm:$0xff]  ;;  %v923_v32 = vld [vmem:[%s3579_s30 + $0x1888] sm:$0xff]  ;;  %2963 = vst [vmem:[%s3594_s17 + $0x1848] sm:$0xff] %v1939_v21  ;;  %v1945_v33 = vmul.f32 0.0, %v921_v30 }
 0x1bd   : > { %2964 = vst [vmem:[%s3594_s17 + $0x1850] sm:$0xff] %v1940_v22  ;;  %2965 = vst [vmem:[%s3594_s17 + $0x1858] sm:$0xff] %v1941_v23  ;;  %v1946_v34 = vmul.f32 0.0, %v922_v31  ;;  %v1947_v35 = vmul.f32 0.0, %v923_v32  ;;  %v924_v36 = vld [vmem:[%s3579_s30 + $0x1890] sm:$0xff]  ;;  %v925_v37 = vld [vmem:[%s3579_s30 + $0x1898] sm:$0xff] }
 0x1be   : > { %v926_v38 = vld [vmem:[%s3579_s30 + $0x18a0] sm:$0xff]  ;;  %2966 = vst [vmem:[%s3594_s17 + $0x1860] sm:$0xff] %v1942_v27  ;;  %2967 = vst [vmem:[%s3594_s17 + $0x1868] sm:$0xff] %v1943_v28  ;;  %v1948_v39 = vmul.f32 0.0, %v924_v36  ;;  %v1949_v40 = vmul.f32 0.0, %v925_v37  ;;  %v927_v42 = vld [vmem:[%s3579_s30 + $0x18a8] sm:$0xff] }
 0x1bf   : > { %2968 = vst [vmem:[%s3594_s17 + $0x1870] sm:$0xff] %v1944_v29  ;;  %v1950_v41 = vmul.f32 0.0, %v926_v38  ;;  %v928_v43 = vld [vmem:[%s3579_s30 + $0x18b0] sm:$0xff]  ;;  %v929_v44 = vld [vmem:[%s3579_s30 + $0x18b8] sm:$0xff]  ;;  %2969 = vst [vmem:[%s3594_s17 + $0x1878] sm:$0xff] %v1945_v33  ;;  %v1951_v45 = vmul.f32 0.0, %v927_v42 }
 0x1c0   : > { %2970 = vst [vmem:[%s3594_s17 + $0x1880] sm:$0xff] %v1946_v34  ;;  %2971 = vst [vmem:[%s3594_s17 + $0x1888] sm:$0xff] %v1947_v35  ;;  %v1952_v46 = vmul.f32 0.0, %v928_v43  ;;  %v1953_v47 = vmul.f32 0.0, %v929_v44  ;;  %v930_v48 = vld [vmem:[%s3579_s30 + $0x18c0] sm:$0xff]  ;;  %v931_v49 = vld [vmem:[%s3579_s30 + $0x18c8] sm:$0xff] }
 0x1c1   : > { %v932_v50 = vld [vmem:[%s3579_s30 + $0x18d0] sm:$0xff]  ;;  %2972 = vst [vmem:[%s3594_s17 + $0x1890] sm:$0xff] %v1948_v39  ;;  %2973 = vst [vmem:[%s3594_s17 + $0x1898] sm:$0xff] %v1949_v40  ;;  %v1954_v51 = vmul.f32 0.0, %v930_v48  ;;  %v1955_v52 = vmul.f32 0.0, %v931_v49  ;;  %v933_v54 = vld [vmem:[%s3579_s30 + $0x18d8] sm:$0xff] }
 0x1c2   : > { %2974 = vst [vmem:[%s3594_s17 + $0x18a0] sm:$0xff] %v1950_v41  ;;  %v1956_v53 = vmul.f32 0.0, %v932_v50  ;;  %v934_v55 = vld [vmem:[%s3579_s30 + $0x18e0] sm:$0xff]  ;;  %v935_v56 = vld [vmem:[%s3579_s30 + $0x18e8] sm:$0xff]  ;;  %2975 = vst [vmem:[%s3594_s17 + $0x18a8] sm:$0xff] %v1951_v45  ;;  %v1957_v57 = vmul.f32 0.0, %v933_v54 }
 0x1c3   : > { %2976 = vst [vmem:[%s3594_s17 + $0x18b0] sm:$0xff] %v1952_v46  ;;  %2977 = vst [vmem:[%s3594_s17 + $0x18b8] sm:$0xff] %v1953_v47  ;;  %v1958_v58 = vmul.f32 0.0, %v934_v55  ;;  %v1959_v59 = vmul.f32 0.0, %v935_v56  ;;  %v936_v60 = vld [vmem:[%s3579_s30 + $0x18f0] sm:$0xff]  ;;  %v937_v61 = vld [vmem:[%s3579_s30 + $0x18f8] sm:$0xff] }
 0x1c4   : > { %v938_v62 = vld [vmem:[%s3579_s30 + $0x1900] sm:$0xff]  ;;  %2978 = vst [vmem:[%s3594_s17 + $0x18c0] sm:$0xff] %v1954_v51  ;;  %2979 = vst [vmem:[%s3594_s17 + $0x18c8] sm:$0xff] %v1955_v52  ;;  %v1960_v63 = vmul.f32 0.0, %v936_v60  ;;  %v1961_v0 = vmul.f32 0.0, %v937_v61  ;;  %v939_v2 = vld [vmem:[%s3579_s30 + $0x1908] sm:$0xff] }
 0x1c5   : > { %2980 = vst [vmem:[%s3594_s17 + $0x18d0] sm:$0xff] %v1956_v53  ;;  %v1962_v1 = vmul.f32 0.0, %v938_v62  ;;  %v940_v3 = vld [vmem:[%s3579_s30 + $0x1910] sm:$0xff]  ;;  %v941_v4 = vld [vmem:[%s3579_s30 + $0x1918] sm:$0xff]  ;;  %2981 = vst [vmem:[%s3594_s17 + $0x18d8] sm:$0xff] %v1957_v57  ;;  %v1963_v5 = vmul.f32 0.0, %v939_v2 }
 0x1c6   : > { %2982 = vst [vmem:[%s3594_s17 + $0x18e0] sm:$0xff] %v1958_v58  ;;  %2983 = vst [vmem:[%s3594_s17 + $0x18e8] sm:$0xff] %v1959_v59  ;;  %v1964_v6 = vmul.f32 0.0, %v940_v3  ;;  %v1965_v7 = vmul.f32 0.0, %v941_v4  ;;  %v942_v8 = vld [vmem:[%s3579_s30 + $0x1920] sm:$0xff]  ;;  %v943_v9 = vld [vmem:[%s3579_s30 + $0x1928] sm:$0xff] }
 0x1c7   : > { %v944_v10 = vld [vmem:[%s3579_s30 + $0x1930] sm:$0xff]  ;;  %2984 = vst [vmem:[%s3594_s17 + $0x18f0] sm:$0xff] %v1960_v63  ;;  %2985 = vst [vmem:[%s3594_s17 + $0x18f8] sm:$0xff] %v1961_v0  ;;  %v1966_v11 = vmul.f32 0.0, %v942_v8  ;;  %v1967_v12 = vmul.f32 0.0, %v943_v9  ;;  %v945_v14 = vld [vmem:[%s3579_s30 + $0x1938] sm:$0xff] }
 0x1c8   : > { %2986 = vst [vmem:[%s3594_s17 + $0x1900] sm:$0xff] %v1962_v1  ;;  %v1968_v13 = vmul.f32 0.0, %v944_v10  ;;  %v946_v15 = vld [vmem:[%s3579_s30 + $0x1940] sm:$0xff]  ;;  %v947_v16 = vld [vmem:[%s3579_s30 + $0x1948] sm:$0xff]  ;;  %2987 = vst [vmem:[%s3594_s17 + $0x1908] sm:$0xff] %v1963_v5  ;;  %v1969_v17 = vmul.f32 0.0, %v945_v14 }
 0x1c9   : > { %2988 = vst [vmem:[%s3594_s17 + $0x1910] sm:$0xff] %v1964_v6  ;;  %2989 = vst [vmem:[%s3594_s17 + $0x1918] sm:$0xff] %v1965_v7  ;;  %v1970_v18 = vmul.f32 0.0, %v946_v15  ;;  %v1971_v19 = vmul.f32 0.0, %v947_v16  ;;  %v948_v20 = vld [vmem:[%s3579_s30 + $0x1950] sm:$0xff]  ;;  %v949_v21 = vld [vmem:[%s3579_s30 + $0x1958] sm:$0xff] }
 0x1ca   : > { %v950_v22 = vld [vmem:[%s3579_s30 + $0x1960] sm:$0xff]  ;;  %2990 = vst [vmem:[%s3594_s17 + $0x1920] sm:$0xff] %v1966_v11  ;;  %2991 = vst [vmem:[%s3594_s17 + $0x1928] sm:$0xff] %v1967_v12  ;;  %v1972_v23 = vmul.f32 0.0, %v948_v20  ;;  %v1973_v24 = vmul.f32 0.0, %v949_v21  ;;  %v951_v26 = vld [vmem:[%s3579_s30 + $0x1968] sm:$0xff] }
 0x1cb   : > { %2992 = vst [vmem:[%s3594_s17 + $0x1930] sm:$0xff] %v1968_v13  ;;  %v1974_v25 = vmul.f32 0.0, %v950_v22  ;;  %v952_v27 = vld [vmem:[%s3579_s30 + $0x1970] sm:$0xff]  ;;  %v953_v28 = vld [vmem:[%s3579_s30 + $0x1978] sm:$0xff]  ;;  %2993 = vst [vmem:[%s3594_s17 + $0x1938] sm:$0xff] %v1969_v17  ;;  %v1975_v29 = vmul.f32 0.0, %v951_v26 }
 0x1cc   : > { %2994 = vst [vmem:[%s3594_s17 + $0x1940] sm:$0xff] %v1970_v18  ;;  %2995 = vst [vmem:[%s3594_s17 + $0x1948] sm:$0xff] %v1971_v19  ;;  %v1976_v30 = vmul.f32 0.0, %v952_v27  ;;  %v1977_v31 = vmul.f32 0.0, %v953_v28  ;;  %v954_v32 = vld [vmem:[%s3579_s30 + $0x1980] sm:$0xff]  ;;  %v955_v33 = vld [vmem:[%s3579_s30 + $0x1988] sm:$0xff] }
 0x1cd   : > { %v956_v34 = vld [vmem:[%s3579_s30 + $0x1990] sm:$0xff]  ;;  %2996 = vst [vmem:[%s3594_s17 + $0x1950] sm:$0xff] %v1972_v23  ;;  %2997 = vst [vmem:[%s3594_s17 + $0x1958] sm:$0xff] %v1973_v24  ;;  %v1978_v35 = vmul.f32 0.0, %v954_v32  ;;  %v1979_v36 = vmul.f32 0.0, %v955_v33  ;;  %v957_v38 = vld [vmem:[%s3579_s30 + $0x1998] sm:$0xff] }
 0x1ce   : > { %2998 = vst [vmem:[%s3594_s17 + $0x1960] sm:$0xff] %v1974_v25  ;;  %v1980_v37 = vmul.f32 0.0, %v956_v34  ;;  %v958_v39 = vld [vmem:[%s3579_s30 + $0x19a0] sm:$0xff]  ;;  %v959_v40 = vld [vmem:[%s3579_s30 + $0x19a8] sm:$0xff]  ;;  %2999 = vst [vmem:[%s3594_s17 + $0x1968] sm:$0xff] %v1975_v29  ;;  %v1981_v41 = vmul.f32 0.0, %v957_v38 }
 0x1cf   : > { %3000 = vst [vmem:[%s3594_s17 + $0x1970] sm:$0xff] %v1976_v30  ;;  %3001 = vst [vmem:[%s3594_s17 + $0x1978] sm:$0xff] %v1977_v31  ;;  %v1982_v42 = vmul.f32 0.0, %v958_v39  ;;  %v1983_v43 = vmul.f32 0.0, %v959_v40  ;;  %v960_v44 = vld [vmem:[%s3579_s30 + $0x19b0] sm:$0xff]  ;;  %v961_v45 = vld [vmem:[%s3579_s30 + $0x19b8] sm:$0xff] }
 0x1d0   : > { %v962_v46 = vld [vmem:[%s3579_s30 + $0x19c0] sm:$0xff]  ;;  %3002 = vst [vmem:[%s3594_s17 + $0x1980] sm:$0xff] %v1978_v35  ;;  %3003 = vst [vmem:[%s3594_s17 + $0x1988] sm:$0xff] %v1979_v36  ;;  %v1984_v47 = vmul.f32 0.0, %v960_v44  ;;  %v1985_v48 = vmul.f32 0.0, %v961_v45  ;;  %v963_v50 = vld [vmem:[%s3579_s30 + $0x19c8] sm:$0xff] }
 0x1d1   : > { %3004 = vst [vmem:[%s3594_s17 + $0x1990] sm:$0xff] %v1980_v37  ;;  %v1986_v49 = vmul.f32 0.0, %v962_v46  ;;  %v964_v51 = vld [vmem:[%s3579_s30 + $0x19d0] sm:$0xff]  ;;  %v965_v52 = vld [vmem:[%s3579_s30 + $0x19d8] sm:$0xff]  ;;  %3005 = vst [vmem:[%s3594_s17 + $0x1998] sm:$0xff] %v1981_v41  ;;  %v1987_v53 = vmul.f32 0.0, %v963_v50 }
 0x1d2   : > { %3006 = vst [vmem:[%s3594_s17 + $0x19a0] sm:$0xff] %v1982_v42  ;;  %3007 = vst [vmem:[%s3594_s17 + $0x19a8] sm:$0xff] %v1983_v43  ;;  %v1988_v54 = vmul.f32 0.0, %v964_v51  ;;  %v1989_v55 = vmul.f32 0.0, %v965_v52  ;;  %v966_v56 = vld [vmem:[%s3579_s30 + $0x19e0] sm:$0xff]  ;;  %v967_v57 = vld [vmem:[%s3579_s30 + $0x19e8] sm:$0xff] }
 0x1d3   : > { %v968_v58 = vld [vmem:[%s3579_s30 + $0x19f0] sm:$0xff]  ;;  %3008 = vst [vmem:[%s3594_s17 + $0x19b0] sm:$0xff] %v1984_v47  ;;  %3009 = vst [vmem:[%s3594_s17 + $0x19b8] sm:$0xff] %v1985_v48  ;;  %v1990_v59 = vmul.f32 0.0, %v966_v56  ;;  %v1991_v60 = vmul.f32 0.0, %v967_v57  ;;  %v969_v62 = vld [vmem:[%s3579_s30 + $0x19f8] sm:$0xff] }
 0x1d4   : > { %3010 = vst [vmem:[%s3594_s17 + $0x19c0] sm:$0xff] %v1986_v49  ;;  %v1992_v61 = vmul.f32 0.0, %v968_v58  ;;  %v970_v63 = vld [vmem:[%s3579_s30 + $0x1a00] sm:$0xff]  ;;  %v971_v0 = vld [vmem:[%s3579_s30 + $0x1a08] sm:$0xff]  ;;  %3011 = vst [vmem:[%s3594_s17 + $0x19c8] sm:$0xff] %v1987_v53  ;;  %v1993_v1 = vmul.f32 0.0, %v969_v62 }
 0x1d5   : > { %3012 = vst [vmem:[%s3594_s17 + $0x19d0] sm:$0xff] %v1988_v54  ;;  %3013 = vst [vmem:[%s3594_s17 + $0x19d8] sm:$0xff] %v1989_v55  ;;  %v1994_v2 = vmul.f32 0.0, %v970_v63  ;;  %v1995_v3 = vmul.f32 0.0, %v971_v0  ;;  %v972_v4 = vld [vmem:[%s3579_s30 + $0x1a10] sm:$0xff]  ;;  %v973_v5 = vld [vmem:[%s3579_s30 + $0x1a18] sm:$0xff] }
 0x1d6   : > { %v974_v6 = vld [vmem:[%s3579_s30 + $0x1a20] sm:$0xff]  ;;  %3014 = vst [vmem:[%s3594_s17 + $0x19e0] sm:$0xff] %v1990_v59  ;;  %3015 = vst [vmem:[%s3594_s17 + $0x19e8] sm:$0xff] %v1991_v60  ;;  %v1996_v7 = vmul.f32 0.0, %v972_v4  ;;  %v1997_v8 = vmul.f32 0.0, %v973_v5  ;;  %v975_v10 = vld [vmem:[%s3579_s30 + $0x1a28] sm:$0xff] }
 0x1d7   : > { %3016 = vst [vmem:[%s3594_s17 + $0x19f0] sm:$0xff] %v1992_v61  ;;  %v1998_v9 = vmul.f32 0.0, %v974_v6  ;;  %v976_v11 = vld [vmem:[%s3579_s30 + $0x1a30] sm:$0xff]  ;;  %v977_v12 = vld [vmem:[%s3579_s30 + $0x1a38] sm:$0xff]  ;;  %3017 = vst [vmem:[%s3594_s17 + $0x19f8] sm:$0xff] %v1993_v1  ;;  %v1999_v13 = vmul.f32 0.0, %v975_v10 }
 0x1d8   : > { %3018 = vst [vmem:[%s3594_s17 + $0x1a00] sm:$0xff] %v1994_v2  ;;  %3019 = vst [vmem:[%s3594_s17 + $0x1a08] sm:$0xff] %v1995_v3  ;;  %v2000_v14 = vmul.f32 0.0, %v976_v11  ;;  %v2001_v15 = vmul.f32 0.0, %v977_v12  ;;  %v978_v16 = vld [vmem:[%s3579_s30 + $0x1a40] sm:$0xff]  ;;  %v979_v17 = vld [vmem:[%s3579_s30 + $0x1a48] sm:$0xff] }
 0x1d9   : > { %v980_v18 = vld [vmem:[%s3579_s30 + $0x1a50] sm:$0xff]  ;;  %3020 = vst [vmem:[%s3594_s17 + $0x1a10] sm:$0xff] %v1996_v7  ;;  %3021 = vst [vmem:[%s3594_s17 + $0x1a18] sm:$0xff] %v1997_v8  ;;  %v2002_v19 = vmul.f32 0.0, %v978_v16  ;;  %v2003_v20 = vmul.f32 0.0, %v979_v17  ;;  %v981_v22 = vld [vmem:[%s3579_s30 + $0x1a58] sm:$0xff] }
 0x1da   : > { %3022 = vst [vmem:[%s3594_s17 + $0x1a20] sm:$0xff] %v1998_v9  ;;  %v2004_v21 = vmul.f32 0.0, %v980_v18  ;;  %v982_v23 = vld [vmem:[%s3579_s30 + $0x1a60] sm:$0xff]  ;;  %v983_v24 = vld [vmem:[%s3579_s30 + $0x1a68] sm:$0xff]  ;;  %3023 = vst [vmem:[%s3594_s17 + $0x1a28] sm:$0xff] %v1999_v13  ;;  %v2005_v25 = vmul.f32 0.0, %v981_v22 }
 0x1db   : > { %3024 = vst [vmem:[%s3594_s17 + $0x1a30] sm:$0xff] %v2000_v14  ;;  %3025 = vst [vmem:[%s3594_s17 + $0x1a38] sm:$0xff] %v2001_v15  ;;  %v2006_v26 = vmul.f32 0.0, %v982_v23  ;;  %v2007_v27 = vmul.f32 0.0, %v983_v24  ;;  %v984_v28 = vld [vmem:[%s3579_s30 + $0x1a70] sm:$0xff]  ;;  %v985_v29 = vld [vmem:[%s3579_s30 + $0x1a78] sm:$0xff] }
 0x1dc   : > { %v986_v30 = vld [vmem:[%s3579_s30 + $0x1a80] sm:$0xff]  ;;  %3026 = vst [vmem:[%s3594_s17 + $0x1a40] sm:$0xff] %v2002_v19  ;;  %3027 = vst [vmem:[%s3594_s17 + $0x1a48] sm:$0xff] %v2003_v20  ;;  %v2008_v31 = vmul.f32 0.0, %v984_v28  ;;  %v2009_v32 = vmul.f32 0.0, %v985_v29  ;;  %v987_v34 = vld [vmem:[%s3579_s30 + $0x1a88] sm:$0xff] }
 0x1dd   : > { %3028 = vst [vmem:[%s3594_s17 + $0x1a50] sm:$0xff] %v2004_v21  ;;  %v2010_v33 = vmul.f32 0.0, %v986_v30  ;;  %v988_v35 = vld [vmem:[%s3579_s30 + $0x1a90] sm:$0xff]  ;;  %v989_v36 = vld [vmem:[%s3579_s30 + $0x1a98] sm:$0xff]  ;;  %3029 = vst [vmem:[%s3594_s17 + $0x1a58] sm:$0xff] %v2005_v25  ;;  %v2011_v37 = vmul.f32 0.0, %v987_v34 }
 0x1de   : > { %3030 = vst [vmem:[%s3594_s17 + $0x1a60] sm:$0xff] %v2006_v26  ;;  %3031 = vst [vmem:[%s3594_s17 + $0x1a68] sm:$0xff] %v2007_v27  ;;  %v2012_v38 = vmul.f32 0.0, %v988_v35  ;;  %v2013_v39 = vmul.f32 0.0, %v989_v36  ;;  %v990_v40 = vld [vmem:[%s3579_s30 + $0x1aa0] sm:$0xff]  ;;  %v991_v41 = vld [vmem:[%s3579_s30 + $0x1aa8] sm:$0xff] }
 0x1df   : > { %v992_v42 = vld [vmem:[%s3579_s30 + $0x1ab0] sm:$0xff]  ;;  %3032 = vst [vmem:[%s3594_s17 + $0x1a70] sm:$0xff] %v2008_v31  ;;  %3033 = vst [vmem:[%s3594_s17 + $0x1a78] sm:$0xff] %v2009_v32  ;;  %v2014_v43 = vmul.f32 0.0, %v990_v40  ;;  %v2015_v44 = vmul.f32 0.0, %v991_v41  ;;  %v993_v46 = vld [vmem:[%s3579_s30 + $0x1ab8] sm:$0xff] }
 0x1e0   : > { %3034 = vst [vmem:[%s3594_s17 + $0x1a80] sm:$0xff] %v2010_v33  ;;  %v2016_v45 = vmul.f32 0.0, %v992_v42  ;;  %v994_v47 = vld [vmem:[%s3579_s30 + $0x1ac0] sm:$0xff]  ;;  %v995_v48 = vld [vmem:[%s3579_s30 + $0x1ac8] sm:$0xff]  ;;  %3035 = vst [vmem:[%s3594_s17 + $0x1a88] sm:$0xff] %v2011_v37  ;;  %v2017_v49 = vmul.f32 0.0, %v993_v46 }
 0x1e1   : > { %3036 = vst [vmem:[%s3594_s17 + $0x1a90] sm:$0xff] %v2012_v38  ;;  %3037 = vst [vmem:[%s3594_s17 + $0x1a98] sm:$0xff] %v2013_v39  ;;  %v2018_v50 = vmul.f32 0.0, %v994_v47  ;;  %v2019_v51 = vmul.f32 0.0, %v995_v48  ;;  %v996_v52 = vld [vmem:[%s3579_s30 + $0x1ad0] sm:$0xff]  ;;  %v997_v53 = vld [vmem:[%s3579_s30 + $0x1ad8] sm:$0xff] }
 0x1e2   : > { %v998_v54 = vld [vmem:[%s3579_s30 + $0x1ae0] sm:$0xff]  ;;  %3038 = vst [vmem:[%s3594_s17 + $0x1aa0] sm:$0xff] %v2014_v43  ;;  %3039 = vst [vmem:[%s3594_s17 + $0x1aa8] sm:$0xff] %v2015_v44  ;;  %v2020_v55 = vmul.f32 0.0, %v996_v52  ;;  %v2021_v56 = vmul.f32 0.0, %v997_v53  ;;  %v999_v58 = vld [vmem:[%s3579_s30 + $0x1ae8] sm:$0xff] }
 0x1e3   : > { %3040 = vst [vmem:[%s3594_s17 + $0x1ab0] sm:$0xff] %v2016_v45  ;;  %v2022_v57 = vmul.f32 0.0, %v998_v54  ;;  %v1000_v59 = vld [vmem:[%s3579_s30 + $0x1af0] sm:$0xff]  ;;  %v1001_v60 = vld [vmem:[%s3579_s30 + $0x1af8] sm:$0xff]  ;;  %3041 = vst [vmem:[%s3594_s17 + $0x1ab8] sm:$0xff] %v2017_v49  ;;  %v2023_v61 = vmul.f32 0.0, %v999_v58 }
 0x1e4   : > { %3042 = vst [vmem:[%s3594_s17 + $0x1ac0] sm:$0xff] %v2018_v50  ;;  %3043 = vst [vmem:[%s3594_s17 + $0x1ac8] sm:$0xff] %v2019_v51  ;;  %v2024_v62 = vmul.f32 0.0, %v1000_v59  ;;  %v2025_v63 = vmul.f32 0.0, %v1001_v60  ;;  %v1002_v0 = vld [vmem:[%s3579_s30 + $0x1b00] sm:$0xff]  ;;  %v1003_v1 = vld [vmem:[%s3579_s30 + $0x1b08] sm:$0xff] }
 0x1e5   : > { %v1004_v2 = vld [vmem:[%s3579_s30 + $0x1b10] sm:$0xff]  ;;  %3044 = vst [vmem:[%s3594_s17 + $0x1ad0] sm:$0xff] %v2020_v55  ;;  %3045 = vst [vmem:[%s3594_s17 + $0x1ad8] sm:$0xff] %v2021_v56  ;;  %v2026_v3 = vmul.f32 0.0, %v1002_v0  ;;  %v2027_v4 = vmul.f32 0.0, %v1003_v1  ;;  %v1005_v6 = vld [vmem:[%s3579_s30 + $0x1b18] sm:$0xff] }
 0x1e6   : > { %3046 = vst [vmem:[%s3594_s17 + $0x1ae0] sm:$0xff] %v2022_v57  ;;  %v2028_v5 = vmul.f32 0.0, %v1004_v2  ;;  %v1006_v7 = vld [vmem:[%s3579_s30 + $0x1b20] sm:$0xff]  ;;  %v1007_v8 = vld [vmem:[%s3579_s30 + $0x1b28] sm:$0xff]  ;;  %3047 = vst [vmem:[%s3594_s17 + $0x1ae8] sm:$0xff] %v2023_v61  ;;  %v2029_v9 = vmul.f32 0.0, %v1005_v6 }
 0x1e7   : > { %3048 = vst [vmem:[%s3594_s17 + $0x1af0] sm:$0xff] %v2024_v62  ;;  %3049 = vst [vmem:[%s3594_s17 + $0x1af8] sm:$0xff] %v2025_v63  ;;  %v2030_v10 = vmul.f32 0.0, %v1006_v7  ;;  %v2031_v11 = vmul.f32 0.0, %v1007_v8  ;;  %v1008_v12 = vld [vmem:[%s3579_s30 + $0x1b30] sm:$0xff]  ;;  %v1009_v13 = vld [vmem:[%s3579_s30 + $0x1b38] sm:$0xff] }
 0x1e8   : > { %v1010_v14 = vld [vmem:[%s3579_s30 + $0x1b40] sm:$0xff]  ;;  %3050 = vst [vmem:[%s3594_s17 + $0x1b00] sm:$0xff] %v2026_v3  ;;  %3051 = vst [vmem:[%s3594_s17 + $0x1b08] sm:$0xff] %v2027_v4  ;;  %v2032_v15 = vmul.f32 0.0, %v1008_v12  ;;  %v2033_v16 = vmul.f32 0.0, %v1009_v13  ;;  %v1011_v18 = vld [vmem:[%s3579_s30 + $0x1b48] sm:$0xff] }
 0x1e9   : > { %3052 = vst [vmem:[%s3594_s17 + $0x1b10] sm:$0xff] %v2028_v5  ;;  %v2034_v17 = vmul.f32 0.0, %v1010_v14  ;;  %v1012_v19 = vld [vmem:[%s3579_s30 + $0x1b50] sm:$0xff]  ;;  %v1013_v20 = vld [vmem:[%s3579_s30 + $0x1b58] sm:$0xff]  ;;  %3053 = vst [vmem:[%s3594_s17 + $0x1b18] sm:$0xff] %v2029_v9  ;;  %v2035_v21 = vmul.f32 0.0, %v1011_v18 }
 0x1ea   : > { %3054 = vst [vmem:[%s3594_s17 + $0x1b20] sm:$0xff] %v2030_v10  ;;  %3055 = vst [vmem:[%s3594_s17 + $0x1b28] sm:$0xff] %v2031_v11  ;;  %v2036_v22 = vmul.f32 0.0, %v1012_v19  ;;  %v2037_v23 = vmul.f32 0.0, %v1013_v20  ;;  %v1014_v24 = vld [vmem:[%s3579_s30 + $0x1b60] sm:$0xff]  ;;  %v1015_v25 = vld [vmem:[%s3579_s30 + $0x1b68] sm:$0xff] }
 0x1eb   : > { %v1016_v26 = vld [vmem:[%s3579_s30 + $0x1b70] sm:$0xff]  ;;  %3056 = vst [vmem:[%s3594_s17 + $0x1b30] sm:$0xff] %v2032_v15  ;;  %3057 = vst [vmem:[%s3594_s17 + $0x1b38] sm:$0xff] %v2033_v16  ;;  %v2038_v27 = vmul.f32 0.0, %v1014_v24  ;;  %v2039_v28 = vmul.f32 0.0, %v1015_v25  ;;  %v1017_v30 = vld [vmem:[%s3579_s30 + $0x1b78] sm:$0xff] }
 0x1ec   : > { %3058 = vst [vmem:[%s3594_s17 + $0x1b40] sm:$0xff] %v2034_v17  ;;  %v2040_v29 = vmul.f32 0.0, %v1016_v26  ;;  %v1018_v31 = vld [vmem:[%s3579_s30 + $0x1b80] sm:$0xff]  ;;  %v1019_v32 = vld [vmem:[%s3579_s30 + $0x1b88] sm:$0xff]  ;;  %3059 = vst [vmem:[%s3594_s17 + $0x1b48] sm:$0xff] %v2035_v21  ;;  %v2041_v33 = vmul.f32 0.0, %v1017_v30 }
 0x1ed   : > { %3060 = vst [vmem:[%s3594_s17 + $0x1b50] sm:$0xff] %v2036_v22  ;;  %3061 = vst [vmem:[%s3594_s17 + $0x1b58] sm:$0xff] %v2037_v23  ;;  %v2042_v34 = vmul.f32 0.0, %v1018_v31  ;;  %v2043_v35 = vmul.f32 0.0, %v1019_v32  ;;  %v1020_v36 = vld [vmem:[%s3579_s30 + $0x1b90] sm:$0xff]  ;;  %v1021_v37 = vld [vmem:[%s3579_s30 + $0x1b98] sm:$0xff] }
 0x1ee   : > { %v1022_v38 = vld [vmem:[%s3579_s30 + $0x1ba0] sm:$0xff]  ;;  %3062 = vst [vmem:[%s3594_s17 + $0x1b60] sm:$0xff] %v2038_v27  ;;  %3063 = vst [vmem:[%s3594_s17 + $0x1b68] sm:$0xff] %v2039_v28  ;;  %v2044_v39 = vmul.f32 0.0, %v1020_v36  ;;  %v2045_v40 = vmul.f32 0.0, %v1021_v37  ;;  %v1023_v42 = vld [vmem:[%s3579_s30 + $0x1ba8] sm:$0xff] }
 0x1ef   : > { %3064 = vst [vmem:[%s3594_s17 + $0x1b70] sm:$0xff] %v2040_v29  ;;  %v2046_v41 = vmul.f32 0.0, %v1022_v38  ;;  %v1024_v43 = vld [vmem:[%s3579_s30 + $0x1bb0] sm:$0xff]  ;;  %v1025_v44 = vld [vmem:[%s3579_s30 + $0x1bb8] sm:$0xff]  ;;  %3065 = vst [vmem:[%s3594_s17 + $0x1b78] sm:$0xff] %v2041_v33  ;;  %v2047_v45 = vmul.f32 0.0, %v1023_v42 }
 0x1f0   : > { %3066 = vst [vmem:[%s3594_s17 + $0x1b80] sm:$0xff] %v2042_v34  ;;  %3067 = vst [vmem:[%s3594_s17 + $0x1b88] sm:$0xff] %v2043_v35  ;;  %v2048_v46 = vmul.f32 0.0, %v1024_v43  ;;  %v2049_v47 = vmul.f32 0.0, %v1025_v44  ;;  %v1026_v48 = vld [vmem:[%s3579_s30 + $0x1bc0] sm:$0xff]  ;;  %v1027_v49 = vld [vmem:[%s3579_s30 + $0x1bc8] sm:$0xff] }
 0x1f1   : > { %v1028_v50 = vld [vmem:[%s3579_s30 + $0x1bd0] sm:$0xff]  ;;  %3068 = vst [vmem:[%s3594_s17 + $0x1b90] sm:$0xff] %v2044_v39  ;;  %3069 = vst [vmem:[%s3594_s17 + $0x1b98] sm:$0xff] %v2045_v40  ;;  %v2050_v51 = vmul.f32 0.0, %v1026_v48  ;;  %v2051_v52 = vmul.f32 0.0, %v1027_v49  ;;  %v1029_v54 = vld [vmem:[%s3579_s30 + $0x1bd8] sm:$0xff] }
 0x1f2   : > { %3070 = vst [vmem:[%s3594_s17 + $0x1ba0] sm:$0xff] %v2046_v41  ;;  %v2052_v53 = vmul.f32 0.0, %v1028_v50  ;;  %v1030_v55 = vld [vmem:[%s3579_s30 + $0x1be0] sm:$0xff]  ;;  %v1031_v56 = vld [vmem:[%s3579_s30 + $0x1be8] sm:$0xff]  ;;  %3071 = vst [vmem:[%s3594_s17 + $0x1ba8] sm:$0xff] %v2047_v45  ;;  %v2053_v57 = vmul.f32 0.0, %v1029_v54 }
 0x1f3   : > { %3072 = vst [vmem:[%s3594_s17 + $0x1bb0] sm:$0xff] %v2048_v46  ;;  %3073 = vst [vmem:[%s3594_s17 + $0x1bb8] sm:$0xff] %v2049_v47  ;;  %v2054_v58 = vmul.f32 0.0, %v1030_v55  ;;  %v2055_v59 = vmul.f32 0.0, %v1031_v56  ;;  %v1032_v60 = vld [vmem:[%s3579_s30 + $0x1bf0] sm:$0xff]  ;;  %v1033_v61 = vld [vmem:[%s3579_s30 + $0x1bf8] sm:$0xff] }
 0x1f4   : > { %v1034_v62 = vld [vmem:[%s3579_s30 + $0x1c00] sm:$0xff]  ;;  %3074 = vst [vmem:[%s3594_s17 + $0x1bc0] sm:$0xff] %v2050_v51  ;;  %3075 = vst [vmem:[%s3594_s17 + $0x1bc8] sm:$0xff] %v2051_v52  ;;  %v2056_v63 = vmul.f32 0.0, %v1032_v60  ;;  %v2057_v0 = vmul.f32 0.0, %v1033_v61  ;;  %v1035_v2 = vld [vmem:[%s3579_s30 + $0x1c08] sm:$0xff] }
 0x1f5   : > { %3076 = vst [vmem:[%s3594_s17 + $0x1bd0] sm:$0xff] %v2052_v53  ;;  %v2058_v1 = vmul.f32 0.0, %v1034_v62  ;;  %v1036_v3 = vld [vmem:[%s3579_s30 + $0x1c10] sm:$0xff]  ;;  %v1037_v4 = vld [vmem:[%s3579_s30 + $0x1c18] sm:$0xff]  ;;  %3077 = vst [vmem:[%s3594_s17 + $0x1bd8] sm:$0xff] %v2053_v57  ;;  %v2059_v5 = vmul.f32 0.0, %v1035_v2 }
 0x1f6   : > { %3078 = vst [vmem:[%s3594_s17 + $0x1be0] sm:$0xff] %v2054_v58  ;;  %3079 = vst [vmem:[%s3594_s17 + $0x1be8] sm:$0xff] %v2055_v59  ;;  %v2060_v6 = vmul.f32 0.0, %v1036_v3  ;;  %v2061_v7 = vmul.f32 0.0, %v1037_v4  ;;  %v1038_v8 = vld [vmem:[%s3579_s30 + $0x1c20] sm:$0xff]  ;;  %v1039_v9 = vld [vmem:[%s3579_s30 + $0x1c28] sm:$0xff] }
 0x1f7   : > { %v1040_v10 = vld [vmem:[%s3579_s30 + $0x1c30] sm:$0xff]  ;;  %3080 = vst [vmem:[%s3594_s17 + $0x1bf0] sm:$0xff] %v2056_v63  ;;  %3081 = vst [vmem:[%s3594_s17 + $0x1bf8] sm:$0xff] %v2057_v0  ;;  %v2062_v11 = vmul.f32 0.0, %v1038_v8  ;;  %v2063_v12 = vmul.f32 0.0, %v1039_v9  ;;  %v1041_v14 = vld [vmem:[%s3579_s30 + $0x1c38] sm:$0xff] }
 0x1f8   : > { %3082 = vst [vmem:[%s3594_s17 + $0x1c00] sm:$0xff] %v2058_v1  ;;  %v2064_v13 = vmul.f32 0.0, %v1040_v10  ;;  %v1042_v15 = vld [vmem:[%s3579_s30 + $0x1c40] sm:$0xff]  ;;  %v1043_v16 = vld [vmem:[%s3579_s30 + $0x1c48] sm:$0xff]  ;;  %3083 = vst [vmem:[%s3594_s17 + $0x1c08] sm:$0xff] %v2059_v5  ;;  %v2065_v17 = vmul.f32 0.0, %v1041_v14 }
 0x1f9   : > { %3084 = vst [vmem:[%s3594_s17 + $0x1c10] sm:$0xff] %v2060_v6  ;;  %3085 = vst [vmem:[%s3594_s17 + $0x1c18] sm:$0xff] %v2061_v7  ;;  %v2066_v18 = vmul.f32 0.0, %v1042_v15  ;;  %v2067_v19 = vmul.f32 0.0, %v1043_v16  ;;  %v1044_v20 = vld [vmem:[%s3579_s30 + $0x1c50] sm:$0xff]  ;;  %v1045_v21 = vld [vmem:[%s3579_s30 + $0x1c58] sm:$0xff] }
 0x1fa   : > { %v1046_v22 = vld [vmem:[%s3579_s30 + $0x1c60] sm:$0xff]  ;;  %3086 = vst [vmem:[%s3594_s17 + $0x1c20] sm:$0xff] %v2062_v11  ;;  %3087 = vst [vmem:[%s3594_s17 + $0x1c28] sm:$0xff] %v2063_v12  ;;  %v2068_v23 = vmul.f32 0.0, %v1044_v20  ;;  %v2069_v24 = vmul.f32 0.0, %v1045_v21  ;;  %v1047_v26 = vld [vmem:[%s3579_s30 + $0x1c68] sm:$0xff] }
 0x1fb   : > { %3088 = vst [vmem:[%s3594_s17 + $0x1c30] sm:$0xff] %v2064_v13  ;;  %v2070_v25 = vmul.f32 0.0, %v1046_v22  ;;  %v1048_v27 = vld [vmem:[%s3579_s30 + $0x1c70] sm:$0xff]  ;;  %v1049_v28 = vld [vmem:[%s3579_s30 + $0x1c78] sm:$0xff]  ;;  %3089 = vst [vmem:[%s3594_s17 + $0x1c38] sm:$0xff] %v2065_v17  ;;  %v2071_v29 = vmul.f32 0.0, %v1047_v26 }
 0x1fc   : > { %3090 = vst [vmem:[%s3594_s17 + $0x1c40] sm:$0xff] %v2066_v18  ;;  %3091 = vst [vmem:[%s3594_s17 + $0x1c48] sm:$0xff] %v2067_v19  ;;  %v2072_v30 = vmul.f32 0.0, %v1048_v27  ;;  %v2073_v31 = vmul.f32 0.0, %v1049_v28  ;;  %v1050_v32 = vld [vmem:[%s3579_s30 + $0x1c80] sm:$0xff]  ;;  %v1051_v33 = vld [vmem:[%s3579_s30 + $0x1c88] sm:$0xff] }
 0x1fd   : > { %v1052_v34 = vld [vmem:[%s3579_s30 + $0x1c90] sm:$0xff]  ;;  %3092 = vst [vmem:[%s3594_s17 + $0x1c50] sm:$0xff] %v2068_v23  ;;  %3093 = vst [vmem:[%s3594_s17 + $0x1c58] sm:$0xff] %v2069_v24  ;;  %v2074_v35 = vmul.f32 0.0, %v1050_v32  ;;  %v2075_v36 = vmul.f32 0.0, %v1051_v33  ;;  %v1053_v38 = vld [vmem:[%s3579_s30 + $0x1c98] sm:$0xff] }
 0x1fe   : > { %3094 = vst [vmem:[%s3594_s17 + $0x1c60] sm:$0xff] %v2070_v25  ;;  %v2076_v37 = vmul.f32 0.0, %v1052_v34  ;;  %v1054_v39 = vld [vmem:[%s3579_s30 + $0x1ca0] sm:$0xff]  ;;  %v1055_v40 = vld [vmem:[%s3579_s30 + $0x1ca8] sm:$0xff]  ;;  %3095 = vst [vmem:[%s3594_s17 + $0x1c68] sm:$0xff] %v2071_v29  ;;  %v2077_v41 = vmul.f32 0.0, %v1053_v38 }
 0x1ff   : > { %3096 = vst [vmem:[%s3594_s17 + $0x1c70] sm:$0xff] %v2072_v30  ;;  %3097 = vst [vmem:[%s3594_s17 + $0x1c78] sm:$0xff] %v2073_v31  ;;  %v2078_v42 = vmul.f32 0.0, %v1054_v39  ;;  %v2079_v43 = vmul.f32 0.0, %v1055_v40  ;;  %v1056_v44 = vld [vmem:[%s3579_s30 + $0x1cb0] sm:$0xff]  ;;  %v1057_v45 = vld [vmem:[%s3579_s30 + $0x1cb8] sm:$0xff] }
 0x200   : > { %v1058_v46 = vld [vmem:[%s3579_s30 + $0x1cc0] sm:$0xff]  ;;  %3098 = vst [vmem:[%s3594_s17 + $0x1c80] sm:$0xff] %v2074_v35  ;;  %3099 = vst [vmem:[%s3594_s17 + $0x1c88] sm:$0xff] %v2075_v36  ;;  %v2080_v47 = vmul.f32 0.0, %v1056_v44  ;;  %v2081_v48 = vmul.f32 0.0, %v1057_v45  ;;  %v1059_v50 = vld [vmem:[%s3579_s30 + $0x1cc8] sm:$0xff] }
 0x201   : > { %3100 = vst [vmem:[%s3594_s17 + $0x1c90] sm:$0xff] %v2076_v37  ;;  %v2082_v49 = vmul.f32 0.0, %v1058_v46  ;;  %v1060_v51 = vld [vmem:[%s3579_s30 + $0x1cd0] sm:$0xff]  ;;  %v1061_v52 = vld [vmem:[%s3579_s30 + $0x1cd8] sm:$0xff]  ;;  %3101 = vst [vmem:[%s3594_s17 + $0x1c98] sm:$0xff] %v2077_v41  ;;  %v2083_v53 = vmul.f32 0.0, %v1059_v50 }
 0x202   : > { %3102 = vst [vmem:[%s3594_s17 + $0x1ca0] sm:$0xff] %v2078_v42  ;;  %3103 = vst [vmem:[%s3594_s17 + $0x1ca8] sm:$0xff] %v2079_v43  ;;  %v2084_v54 = vmul.f32 0.0, %v1060_v51  ;;  %v2085_v55 = vmul.f32 0.0, %v1061_v52  ;;  %v1062_v56 = vld [vmem:[%s3579_s30 + $0x1ce0] sm:$0xff]  ;;  %v1063_v57 = vld [vmem:[%s3579_s30 + $0x1ce8] sm:$0xff] }
 0x203   : > { %v1064_v58 = vld [vmem:[%s3579_s30 + $0x1cf0] sm:$0xff]  ;;  %3104 = vst [vmem:[%s3594_s17 + $0x1cb0] sm:$0xff] %v2080_v47  ;;  %3105 = vst [vmem:[%s3594_s17 + $0x1cb8] sm:$0xff] %v2081_v48  ;;  %v2086_v59 = vmul.f32 0.0, %v1062_v56  ;;  %v2087_v60 = vmul.f32 0.0, %v1063_v57  ;;  %v1065_v62 = vld [vmem:[%s3579_s30 + $0x1cf8] sm:$0xff] }
 0x204   : > { %3106 = vst [vmem:[%s3594_s17 + $0x1cc0] sm:$0xff] %v2082_v49  ;;  %v2088_v61 = vmul.f32 0.0, %v1064_v58  ;;  %v1066_v63 = vld [vmem:[%s3579_s30 + $0x1d00] sm:$0xff]  ;;  %v1067_v0 = vld [vmem:[%s3579_s30 + $0x1d08] sm:$0xff]  ;;  %3107 = vst [vmem:[%s3594_s17 + $0x1cc8] sm:$0xff] %v2083_v53  ;;  %v2089_v1 = vmul.f32 0.0, %v1065_v62 }
 0x205   : > { %3108 = vst [vmem:[%s3594_s17 + $0x1cd0] sm:$0xff] %v2084_v54  ;;  %3109 = vst [vmem:[%s3594_s17 + $0x1cd8] sm:$0xff] %v2085_v55  ;;  %v2090_v2 = vmul.f32 0.0, %v1066_v63  ;;  %v2091_v3 = vmul.f32 0.0, %v1067_v0  ;;  %v1068_v4 = vld [vmem:[%s3579_s30 + $0x1d10] sm:$0xff]  ;;  %v1069_v5 = vld [vmem:[%s3579_s30 + $0x1d18] sm:$0xff] }
 0x206   : > { %v1070_v6 = vld [vmem:[%s3579_s30 + $0x1d20] sm:$0xff]  ;;  %3110 = vst [vmem:[%s3594_s17 + $0x1ce0] sm:$0xff] %v2086_v59  ;;  %3111 = vst [vmem:[%s3594_s17 + $0x1ce8] sm:$0xff] %v2087_v60  ;;  %v2092_v7 = vmul.f32 0.0, %v1068_v4  ;;  %v2093_v8 = vmul.f32 0.0, %v1069_v5  ;;  %v1071_v10 = vld [vmem:[%s3579_s30 + $0x1d28] sm:$0xff] }
 0x207   : > { %3112 = vst [vmem:[%s3594_s17 + $0x1cf0] sm:$0xff] %v2088_v61  ;;  %v2094_v9 = vmul.f32 0.0, %v1070_v6  ;;  %v1072_v11 = vld [vmem:[%s3579_s30 + $0x1d30] sm:$0xff]  ;;  %v1073_v12 = vld [vmem:[%s3579_s30 + $0x1d38] sm:$0xff]  ;;  %3113 = vst [vmem:[%s3594_s17 + $0x1cf8] sm:$0xff] %v2089_v1  ;;  %v2095_v13 = vmul.f32 0.0, %v1071_v10 }
 0x208   : > { %3114 = vst [vmem:[%s3594_s17 + $0x1d00] sm:$0xff] %v2090_v2  ;;  %3115 = vst [vmem:[%s3594_s17 + $0x1d08] sm:$0xff] %v2091_v3  ;;  %v2096_v14 = vmul.f32 0.0, %v1072_v11  ;;  %v2097_v15 = vmul.f32 0.0, %v1073_v12  ;;  %v1074_v16 = vld [vmem:[%s3579_s30 + $0x1d40] sm:$0xff]  ;;  %v1075_v17 = vld [vmem:[%s3579_s30 + $0x1d48] sm:$0xff] }
 0x209   : > { %v1076_v18 = vld [vmem:[%s3579_s30 + $0x1d50] sm:$0xff]  ;;  %3116 = vst [vmem:[%s3594_s17 + $0x1d10] sm:$0xff] %v2092_v7  ;;  %3117 = vst [vmem:[%s3594_s17 + $0x1d18] sm:$0xff] %v2093_v8  ;;  %v2098_v19 = vmul.f32 0.0, %v1074_v16  ;;  %v2099_v20 = vmul.f32 0.0, %v1075_v17  ;;  %v1077_v22 = vld [vmem:[%s3579_s30 + $0x1d58] sm:$0xff] }
 0x20a   : > { %3118 = vst [vmem:[%s3594_s17 + $0x1d20] sm:$0xff] %v2094_v9  ;;  %v2100_v21 = vmul.f32 0.0, %v1076_v18  ;;  %v1078_v23 = vld [vmem:[%s3579_s30 + $0x1d60] sm:$0xff]  ;;  %v1079_v24 = vld [vmem:[%s3579_s30 + $0x1d68] sm:$0xff]  ;;  %3119 = vst [vmem:[%s3594_s17 + $0x1d28] sm:$0xff] %v2095_v13  ;;  %v2101_v25 = vmul.f32 0.0, %v1077_v22 }
 0x20b   : > { %3120 = vst [vmem:[%s3594_s17 + $0x1d30] sm:$0xff] %v2096_v14  ;;  %3121 = vst [vmem:[%s3594_s17 + $0x1d38] sm:$0xff] %v2097_v15  ;;  %v2102_v26 = vmul.f32 0.0, %v1078_v23  ;;  %v2103_v27 = vmul.f32 0.0, %v1079_v24  ;;  %v1080_v28 = vld [vmem:[%s3579_s30 + $0x1d70] sm:$0xff]  ;;  %v1081_v29 = vld [vmem:[%s3579_s30 + $0x1d78] sm:$0xff] }
 0x20c   : > { %v1082_v30 = vld [vmem:[%s3579_s30 + $0x1d80] sm:$0xff]  ;;  %3122 = vst [vmem:[%s3594_s17 + $0x1d40] sm:$0xff] %v2098_v19  ;;  %3123 = vst [vmem:[%s3594_s17 + $0x1d48] sm:$0xff] %v2099_v20  ;;  %v2104_v31 = vmul.f32 0.0, %v1080_v28  ;;  %v2105_v32 = vmul.f32 0.0, %v1081_v29  ;;  %v1083_v34 = vld [vmem:[%s3579_s30 + $0x1d88] sm:$0xff] }
 0x20d   : > { %3124 = vst [vmem:[%s3594_s17 + $0x1d50] sm:$0xff] %v2100_v21  ;;  %v2106_v33 = vmul.f32 0.0, %v1082_v30  ;;  %v1084_v35 = vld [vmem:[%s3579_s30 + $0x1d90] sm:$0xff]  ;;  %v1085_v36 = vld [vmem:[%s3579_s30 + $0x1d98] sm:$0xff]  ;;  %3125 = vst [vmem:[%s3594_s17 + $0x1d58] sm:$0xff] %v2101_v25  ;;  %v2107_v37 = vmul.f32 0.0, %v1083_v34 }
 0x20e   : > { %3126 = vst [vmem:[%s3594_s17 + $0x1d60] sm:$0xff] %v2102_v26  ;;  %3127 = vst [vmem:[%s3594_s17 + $0x1d68] sm:$0xff] %v2103_v27  ;;  %v2108_v38 = vmul.f32 0.0, %v1084_v35  ;;  %v2109_v39 = vmul.f32 0.0, %v1085_v36  ;;  %v1086_v40 = vld [vmem:[%s3579_s30 + $0x1da0] sm:$0xff]  ;;  %v1087_v41 = vld [vmem:[%s3579_s30 + $0x1da8] sm:$0xff] }
 0x20f   : > { %v1088_v42 = vld [vmem:[%s3579_s30 + $0x1db0] sm:$0xff]  ;;  %3128 = vst [vmem:[%s3594_s17 + $0x1d70] sm:$0xff] %v2104_v31  ;;  %3129 = vst [vmem:[%s3594_s17 + $0x1d78] sm:$0xff] %v2105_v32  ;;  %v2110_v43 = vmul.f32 0.0, %v1086_v40  ;;  %v2111_v44 = vmul.f32 0.0, %v1087_v41  ;;  %v1089_v46 = vld [vmem:[%s3579_s30 + $0x1db8] sm:$0xff] }
 0x210   : > { %3130 = vst [vmem:[%s3594_s17 + $0x1d80] sm:$0xff] %v2106_v33  ;;  %v2112_v45 = vmul.f32 0.0, %v1088_v42  ;;  %v1090_v47 = vld [vmem:[%s3579_s30 + $0x1dc0] sm:$0xff]  ;;  %v1091_v48 = vld [vmem:[%s3579_s30 + $0x1dc8] sm:$0xff]  ;;  %3131 = vst [vmem:[%s3594_s17 + $0x1d88] sm:$0xff] %v2107_v37  ;;  %v2113_v49 = vmul.f32 0.0, %v1089_v46 }
 0x211   : > { %3132 = vst [vmem:[%s3594_s17 + $0x1d90] sm:$0xff] %v2108_v38  ;;  %3133 = vst [vmem:[%s3594_s17 + $0x1d98] sm:$0xff] %v2109_v39  ;;  %v2114_v50 = vmul.f32 0.0, %v1090_v47  ;;  %v2115_v51 = vmul.f32 0.0, %v1091_v48  ;;  %v1092_v52 = vld [vmem:[%s3579_s30 + $0x1dd0] sm:$0xff]  ;;  %v1093_v53 = vld [vmem:[%s3579_s30 + $0x1dd8] sm:$0xff] }
 0x212   : > { %v1094_v54 = vld [vmem:[%s3579_s30 + $0x1de0] sm:$0xff]  ;;  %3134 = vst [vmem:[%s3594_s17 + $0x1da0] sm:$0xff] %v2110_v43  ;;  %3135 = vst [vmem:[%s3594_s17 + $0x1da8] sm:$0xff] %v2111_v44  ;;  %v2116_v55 = vmul.f32 0.0, %v1092_v52  ;;  %v2117_v56 = vmul.f32 0.0, %v1093_v53  ;;  %v1095_v58 = vld [vmem:[%s3579_s30 + $0x1de8] sm:$0xff] }
 0x213   : > { %3136 = vst [vmem:[%s3594_s17 + $0x1db0] sm:$0xff] %v2112_v45  ;;  %v2118_v57 = vmul.f32 0.0, %v1094_v54  ;;  %v1096_v59 = vld [vmem:[%s3579_s30 + $0x1df0] sm:$0xff]  ;;  %v1097_v60 = vld [vmem:[%s3579_s30 + $0x1df8] sm:$0xff]  ;;  %3137 = vst [vmem:[%s3594_s17 + $0x1db8] sm:$0xff] %v2113_v49  ;;  %v2119_v61 = vmul.f32 0.0, %v1095_v58 }
 0x214   : > { %3138 = vst [vmem:[%s3594_s17 + $0x1dc0] sm:$0xff] %v2114_v50  ;;  %3139 = vst [vmem:[%s3594_s17 + $0x1dc8] sm:$0xff] %v2115_v51  ;;  %v2120_v62 = vmul.f32 0.0, %v1096_v59  ;;  %v2121_v63 = vmul.f32 0.0, %v1097_v60  ;;  %v1098_v0 = vld [vmem:[%s3579_s30 + $0x1e00] sm:$0xff]  ;;  %v1099_v1 = vld [vmem:[%s3579_s30 + $0x1e08] sm:$0xff] }
 0x215   : > { %v1100_v2 = vld [vmem:[%s3579_s30 + $0x1e10] sm:$0xff]  ;;  %3140 = vst [vmem:[%s3594_s17 + $0x1dd0] sm:$0xff] %v2116_v55  ;;  %3141 = vst [vmem:[%s3594_s17 + $0x1dd8] sm:$0xff] %v2117_v56  ;;  %v2122_v3 = vmul.f32 0.0, %v1098_v0  ;;  %v2123_v4 = vmul.f32 0.0, %v1099_v1  ;;  %v1101_v6 = vld [vmem:[%s3579_s30 + $0x1e18] sm:$0xff] }
 0x216   : > { %3142 = vst [vmem:[%s3594_s17 + $0x1de0] sm:$0xff] %v2118_v57  ;;  %v2124_v5 = vmul.f32 0.0, %v1100_v2  ;;  %v1102_v7 = vld [vmem:[%s3579_s30 + $0x1e20] sm:$0xff]  ;;  %v1103_v8 = vld [vmem:[%s3579_s30 + $0x1e28] sm:$0xff]  ;;  %3143 = vst [vmem:[%s3594_s17 + $0x1de8] sm:$0xff] %v2119_v61  ;;  %v2125_v9 = vmul.f32 0.0, %v1101_v6 }
 0x217   : > { %3144 = vst [vmem:[%s3594_s17 + $0x1df0] sm:$0xff] %v2120_v62  ;;  %3145 = vst [vmem:[%s3594_s17 + $0x1df8] sm:$0xff] %v2121_v63  ;;  %v2126_v10 = vmul.f32 0.0, %v1102_v7  ;;  %v2127_v11 = vmul.f32 0.0, %v1103_v8  ;;  %v1104_v12 = vld [vmem:[%s3579_s30 + $0x1e30] sm:$0xff]  ;;  %v1105_v13 = vld [vmem:[%s3579_s30 + $0x1e38] sm:$0xff] }
 0x218   : > { %v1106_v14 = vld [vmem:[%s3579_s30 + $0x1e40] sm:$0xff]  ;;  %3146 = vst [vmem:[%s3594_s17 + $0x1e00] sm:$0xff] %v2122_v3  ;;  %3147 = vst [vmem:[%s3594_s17 + $0x1e08] sm:$0xff] %v2123_v4  ;;  %v2128_v15 = vmul.f32 0.0, %v1104_v12  ;;  %v2129_v16 = vmul.f32 0.0, %v1105_v13  ;;  %v1107_v18 = vld [vmem:[%s3579_s30 + $0x1e48] sm:$0xff] }
 0x219   : > { %3148 = vst [vmem:[%s3594_s17 + $0x1e10] sm:$0xff] %v2124_v5  ;;  %v2130_v17 = vmul.f32 0.0, %v1106_v14  ;;  %v1108_v19 = vld [vmem:[%s3579_s30 + $0x1e50] sm:$0xff]  ;;  %v1109_v20 = vld [vmem:[%s3579_s30 + $0x1e58] sm:$0xff]  ;;  %3149 = vst [vmem:[%s3594_s17 + $0x1e18] sm:$0xff] %v2125_v9  ;;  %v2131_v21 = vmul.f32 0.0, %v1107_v18 }
 0x21a   : > { %3150 = vst [vmem:[%s3594_s17 + $0x1e20] sm:$0xff] %v2126_v10  ;;  %3151 = vst [vmem:[%s3594_s17 + $0x1e28] sm:$0xff] %v2127_v11  ;;  %v2132_v22 = vmul.f32 0.0, %v1108_v19  ;;  %v2133_v23 = vmul.f32 0.0, %v1109_v20  ;;  %v1110_v24 = vld [vmem:[%s3579_s30 + $0x1e60] sm:$0xff]  ;;  %v1111_v25 = vld [vmem:[%s3579_s30 + $0x1e68] sm:$0xff] }
 0x21b   : > { %v1112_v26 = vld [vmem:[%s3579_s30 + $0x1e70] sm:$0xff]  ;;  %3152 = vst [vmem:[%s3594_s17 + $0x1e30] sm:$0xff] %v2128_v15  ;;  %3153 = vst [vmem:[%s3594_s17 + $0x1e38] sm:$0xff] %v2129_v16  ;;  %v2134_v27 = vmul.f32 0.0, %v1110_v24  ;;  %v2135_v28 = vmul.f32 0.0, %v1111_v25  ;;  %v1113_v30 = vld [vmem:[%s3579_s30 + $0x1e78] sm:$0xff] }
 0x21c   : > { %3154 = vst [vmem:[%s3594_s17 + $0x1e40] sm:$0xff] %v2130_v17  ;;  %v2136_v29 = vmul.f32 0.0, %v1112_v26  ;;  %v1114_v31 = vld [vmem:[%s3579_s30 + $0x1e80] sm:$0xff]  ;;  %v1115_v32 = vld [vmem:[%s3579_s30 + $0x1e88] sm:$0xff]  ;;  %3155 = vst [vmem:[%s3594_s17 + $0x1e48] sm:$0xff] %v2131_v21  ;;  %v2137_v33 = vmul.f32 0.0, %v1113_v30 }
 0x21d   : > { %3156 = vst [vmem:[%s3594_s17 + $0x1e50] sm:$0xff] %v2132_v22  ;;  %3157 = vst [vmem:[%s3594_s17 + $0x1e58] sm:$0xff] %v2133_v23  ;;  %v2138_v34 = vmul.f32 0.0, %v1114_v31  ;;  %v2139_v35 = vmul.f32 0.0, %v1115_v32  ;;  %v1116_v36 = vld [vmem:[%s3579_s30 + $0x1e90] sm:$0xff]  ;;  %v1117_v37 = vld [vmem:[%s3579_s30 + $0x1e98] sm:$0xff] }
 0x21e   : > { %v1118_v38 = vld [vmem:[%s3579_s30 + $0x1ea0] sm:$0xff]  ;;  %3158 = vst [vmem:[%s3594_s17 + $0x1e60] sm:$0xff] %v2134_v27  ;;  %3159 = vst [vmem:[%s3594_s17 + $0x1e68] sm:$0xff] %v2135_v28  ;;  %v2140_v39 = vmul.f32 0.0, %v1116_v36  ;;  %v2141_v40 = vmul.f32 0.0, %v1117_v37  ;;  %v1119_v42 = vld [vmem:[%s3579_s30 + $0x1ea8] sm:$0xff] }
 0x21f   : > { %3160 = vst [vmem:[%s3594_s17 + $0x1e70] sm:$0xff] %v2136_v29  ;;  %v2142_v41 = vmul.f32 0.0, %v1118_v38  ;;  %v1120_v43 = vld [vmem:[%s3579_s30 + $0x1eb0] sm:$0xff]  ;;  %v1121_v44 = vld [vmem:[%s3579_s30 + $0x1eb8] sm:$0xff]  ;;  %3161 = vst [vmem:[%s3594_s17 + $0x1e78] sm:$0xff] %v2137_v33  ;;  %v2143_v45 = vmul.f32 0.0, %v1119_v42 }
 0x220   : > { %3162 = vst [vmem:[%s3594_s17 + $0x1e80] sm:$0xff] %v2138_v34  ;;  %3163 = vst [vmem:[%s3594_s17 + $0x1e88] sm:$0xff] %v2139_v35  ;;  %v2144_v46 = vmul.f32 0.0, %v1120_v43  ;;  %v2145_v47 = vmul.f32 0.0, %v1121_v44  ;;  %v1122_v48 = vld [vmem:[%s3579_s30 + $0x1ec0] sm:$0xff]  ;;  %v1123_v49 = vld [vmem:[%s3579_s30 + $0x1ec8] sm:$0xff] }
 0x221   : > { %v1124_v50 = vld [vmem:[%s3579_s30 + $0x1ed0] sm:$0xff]  ;;  %3164 = vst [vmem:[%s3594_s17 + $0x1e90] sm:$0xff] %v2140_v39  ;;  %3165 = vst [vmem:[%s3594_s17 + $0x1e98] sm:$0xff] %v2141_v40  ;;  %v2146_v51 = vmul.f32 0.0, %v1122_v48  ;;  %v2147_v52 = vmul.f32 0.0, %v1123_v49  ;;  %v1125_v54 = vld [vmem:[%s3579_s30 + $0x1ed8] sm:$0xff] }
 0x222   : > { %3166 = vst [vmem:[%s3594_s17 + $0x1ea0] sm:$0xff] %v2142_v41  ;;  %v2148_v53 = vmul.f32 0.0, %v1124_v50  ;;  %v1126_v55 = vld [vmem:[%s3579_s30 + $0x1ee0] sm:$0xff]  ;;  %v1127_v56 = vld [vmem:[%s3579_s30 + $0x1ee8] sm:$0xff]  ;;  %3167 = vst [vmem:[%s3594_s17 + $0x1ea8] sm:$0xff] %v2143_v45  ;;  %v2149_v57 = vmul.f32 0.0, %v1125_v54 }
 0x223   : > { %3168 = vst [vmem:[%s3594_s17 + $0x1eb0] sm:$0xff] %v2144_v46  ;;  %3169 = vst [vmem:[%s3594_s17 + $0x1eb8] sm:$0xff] %v2145_v47  ;;  %v2150_v58 = vmul.f32 0.0, %v1126_v55  ;;  %v2151_v59 = vmul.f32 0.0, %v1127_v56  ;;  %v1128_v60 = vld [vmem:[%s3579_s30 + $0x1ef0] sm:$0xff]  ;;  %v1129_v61 = vld [vmem:[%s3579_s30 + $0x1ef8] sm:$0xff] }
 0x224   : > { %v1130_v62 = vld [vmem:[%s3579_s30 + $0x1f00] sm:$0xff]  ;;  %3170 = vst [vmem:[%s3594_s17 + $0x1ec0] sm:$0xff] %v2146_v51  ;;  %3171 = vst [vmem:[%s3594_s17 + $0x1ec8] sm:$0xff] %v2147_v52  ;;  %v2152_v63 = vmul.f32 0.0, %v1128_v60  ;;  %v2153_v0 = vmul.f32 0.0, %v1129_v61  ;;  %v1131_v2 = vld [vmem:[%s3579_s30 + $0x1f08] sm:$0xff] }
 0x225   : > { %3172 = vst [vmem:[%s3594_s17 + $0x1ed0] sm:$0xff] %v2148_v53  ;;  %v2154_v1 = vmul.f32 0.0, %v1130_v62  ;;  %v1132_v3 = vld [vmem:[%s3579_s30 + $0x1f10] sm:$0xff]  ;;  %v1133_v4 = vld [vmem:[%s3579_s30 + $0x1f18] sm:$0xff]  ;;  %3173 = vst [vmem:[%s3594_s17 + $0x1ed8] sm:$0xff] %v2149_v57  ;;  %v2155_v5 = vmul.f32 0.0, %v1131_v2 }
 0x226   : > { %3174 = vst [vmem:[%s3594_s17 + $0x1ee0] sm:$0xff] %v2150_v58  ;;  %3175 = vst [vmem:[%s3594_s17 + $0x1ee8] sm:$0xff] %v2151_v59  ;;  %v2156_v6 = vmul.f32 0.0, %v1132_v3  ;;  %v2157_v7 = vmul.f32 0.0, %v1133_v4  ;;  %v1134_v8 = vld [vmem:[%s3579_s30 + $0x1f20] sm:$0xff]  ;;  %v1135_v9 = vld [vmem:[%s3579_s30 + $0x1f28] sm:$0xff] }
 0x227   : > { %v1136_v10 = vld [vmem:[%s3579_s30 + $0x1f30] sm:$0xff]  ;;  %3176 = vst [vmem:[%s3594_s17 + $0x1ef0] sm:$0xff] %v2152_v63  ;;  %3177 = vst [vmem:[%s3594_s17 + $0x1ef8] sm:$0xff] %v2153_v0  ;;  %v2158_v11 = vmul.f32 0.0, %v1134_v8  ;;  %v2159_v12 = vmul.f32 0.0, %v1135_v9  ;;  %v1137_v14 = vld [vmem:[%s3579_s30 + $0x1f38] sm:$0xff] }
 0x228   : > { %3178 = vst [vmem:[%s3594_s17 + $0x1f00] sm:$0xff] %v2154_v1  ;;  %v2160_v13 = vmul.f32 0.0, %v1136_v10  ;;  %v1138_v15 = vld [vmem:[%s3579_s30 + $0x1f40] sm:$0xff]  ;;  %v1139_v16 = vld [vmem:[%s3579_s30 + $0x1f48] sm:$0xff]  ;;  %3179 = vst [vmem:[%s3594_s17 + $0x1f08] sm:$0xff] %v2155_v5  ;;  %v2161_v17 = vmul.f32 0.0, %v1137_v14 }
 0x229   : > { %3180 = vst [vmem:[%s3594_s17 + $0x1f10] sm:$0xff] %v2156_v6  ;;  %3181 = vst [vmem:[%s3594_s17 + $0x1f18] sm:$0xff] %v2157_v7  ;;  %v2162_v18 = vmul.f32 0.0, %v1138_v15  ;;  %v2163_v19 = vmul.f32 0.0, %v1139_v16  ;;  %v1140_v20 = vld [vmem:[%s3579_s30 + $0x1f50] sm:$0xff]  ;;  %v1141_v21 = vld [vmem:[%s3579_s30 + $0x1f58] sm:$0xff] }
 0x22a   : > { %v1142_v22 = vld [vmem:[%s3579_s30 + $0x1f60] sm:$0xff]  ;;  %3182 = vst [vmem:[%s3594_s17 + $0x1f20] sm:$0xff] %v2158_v11  ;;  %3183 = vst [vmem:[%s3594_s17 + $0x1f28] sm:$0xff] %v2159_v12  ;;  %v2164_v23 = vmul.f32 0.0, %v1140_v20  ;;  %v2165_v24 = vmul.f32 0.0, %v1141_v21  ;;  %v1143_v26 = vld [vmem:[%s3579_s30 + $0x1f68] sm:$0xff] }
 0x22b   : > { %3184 = vst [vmem:[%s3594_s17 + $0x1f30] sm:$0xff] %v2160_v13  ;;  %v2166_v25 = vmul.f32 0.0, %v1142_v22  ;;  %v1144_v27 = vld [vmem:[%s3579_s30 + $0x1f70] sm:$0xff]  ;;  %v1145_v28 = vld [vmem:[%s3579_s30 + $0x1f78] sm:$0xff]  ;;  %3185 = vst [vmem:[%s3594_s17 + $0x1f38] sm:$0xff] %v2161_v17  ;;  %v2167_v29 = vmul.f32 0.0, %v1143_v26 }
 0x22c   : > { %3186 = vst [vmem:[%s3594_s17 + $0x1f40] sm:$0xff] %v2162_v18  ;;  %3187 = vst [vmem:[%s3594_s17 + $0x1f48] sm:$0xff] %v2163_v19  ;;  %v2168_v30 = vmul.f32 0.0, %v1144_v27  ;;  %v2169_v31 = vmul.f32 0.0, %v1145_v28  ;;  %v1146_v32 = vld [vmem:[%s3579_s30 + $0x1f80] sm:$0xff]  ;;  %v1147_v33 = vld [vmem:[%s3579_s30 + $0x1f88] sm:$0xff] }
 0x22d   : > { %v1148_v34 = vld [vmem:[%s3579_s30 + $0x1f90] sm:$0xff]  ;;  %3188 = vst [vmem:[%s3594_s17 + $0x1f50] sm:$0xff] %v2164_v23  ;;  %3189 = vst [vmem:[%s3594_s17 + $0x1f58] sm:$0xff] %v2165_v24  ;;  %v2170_v35 = vmul.f32 0.0, %v1146_v32  ;;  %v2171_v36 = vmul.f32 0.0, %v1147_v33  ;;  %v1149_v38 = vld [vmem:[%s3579_s30 + $0x1f98] sm:$0xff] }
 0x22e   : > { %3190 = vst [vmem:[%s3594_s17 + $0x1f60] sm:$0xff] %v2166_v25  ;;  %v2172_v37 = vmul.f32 0.0, %v1148_v34  ;;  %v1150_v39 = vld [vmem:[%s3579_s30 + $0x1fa0] sm:$0xff]  ;;  %v1151_v40 = vld [vmem:[%s3579_s30 + $0x1fa8] sm:$0xff]  ;;  %3191 = vst [vmem:[%s3594_s17 + $0x1f68] sm:$0xff] %v2167_v29  ;;  %v2173_v41 = vmul.f32 0.0, %v1149_v38 }
 0x22f   : > { %3192 = vst [vmem:[%s3594_s17 + $0x1f70] sm:$0xff] %v2168_v30  ;;  %3193 = vst [vmem:[%s3594_s17 + $0x1f78] sm:$0xff] %v2169_v31  ;;  %v2174_v42 = vmul.f32 0.0, %v1150_v39  ;;  %v2175_v43 = vmul.f32 0.0, %v1151_v40  ;;  %v1152_v44 = vld [vmem:[%s3579_s30 + $0x1fb0] sm:$0xff]  ;;  %v1153_v45 = vld [vmem:[%s3579_s30 + $0x1fb8] sm:$0xff] }
 0x230   : > { %v1154_v46 = vld [vmem:[%s3579_s30 + $0x1fc0] sm:$0xff]  ;;  %3194 = vst [vmem:[%s3594_s17 + $0x1f80] sm:$0xff] %v2170_v35  ;;  %3195 = vst [vmem:[%s3594_s17 + $0x1f88] sm:$0xff] %v2171_v36  ;;  %v2176_v47 = vmul.f32 0.0, %v1152_v44  ;;  %v2177_v48 = vmul.f32 0.0, %v1153_v45  ;;  %v1155_v50 = vld [vmem:[%s3579_s30 + $0x1fc8] sm:$0xff] }
 0x231   : > { %3196 = vst [vmem:[%s3594_s17 + $0x1f90] sm:$0xff] %v2172_v37  ;;  %v2178_v49 = vmul.f32 0.0, %v1154_v46  ;;  %v1156_v51 = vld [vmem:[%s3579_s30 + $0x1fd0] sm:$0xff]  ;;  %v1157_v52 = vld [vmem:[%s3579_s30 + $0x1fd8] sm:$0xff]  ;;  %3197 = vst [vmem:[%s3594_s17 + $0x1f98] sm:$0xff] %v2173_v41  ;;  %v2179_v53 = vmul.f32 0.0, %v1155_v50 }
 0x232   : > { %3198 = vst [vmem:[%s3594_s17 + $0x1fa0] sm:$0xff] %v2174_v42  ;;  %3199 = vst [vmem:[%s3594_s17 + $0x1fa8] sm:$0xff] %v2175_v43  ;;  %v2180_v54 = vmul.f32 0.0, %v1156_v51  ;;  %v2181_v55 = vmul.f32 0.0, %v1157_v52  ;;  %v1158_v56 = vld [vmem:[%s3579_s30 + $0x1fe0] sm:$0xff]  ;;  %v1159_v57 = vld [vmem:[%s3579_s30 + $0x1fe8] sm:$0xff] }
 0x233   : > { %v1160_v58 = vld [vmem:[%s3579_s30 + $0x1ff0] sm:$0xff]  ;;  %3200 = vst [vmem:[%s3594_s17 + $0x1fb0] sm:$0xff] %v2176_v47  ;;  %3201 = vst [vmem:[%s3594_s17 + $0x1fb8] sm:$0xff] %v2177_v48  ;;  %v2182_v59 = vmul.f32 0.0, %v1158_v56  ;;  %v2183_v60 = vmul.f32 0.0, %v1159_v57  ;;  %v1161_v62 = vld [vmem:[%s3579_s30 + $0x1ff8] sm:$0xff] }
 0x234   : > { %3202 = vst [vmem:[%s3594_s17 + $0x1fc0] sm:$0xff] %v2178_v49  ;;  %v2184_v61 = vmul.f32 0.0, %v1160_v58  ;;  %3203 = vst [vmem:[%s3594_s17 + $0x1fc8] sm:$0xff] %v2179_v53  ;;  %v2185_v63 = vmul.f32 0.0, %v1161_v62  ;;  %s3211_s10 = scalar_lea.sflag [#allocation4], %s3575_s23  ;;  %s3396_s3 = scalar_lea.vmem %s5641_s2, 131072 }
 0x235   : > { %3204 = vst [vmem:[%s3594_s17 + $0x1fd0] sm:$0xff] %v2180_v54  ;;  %3205 = vst [vmem:[%s3594_s17 + $0x1fd8] sm:$0xff] %v2181_v55  ;;  %p3397_p11 = scmp.ne.s32.totalorder %s5641_s2, %s3396_s3  ;;  %p5695_p12 = scmp.ne.s32.totalorder %s5691_s18, 0 }
 0x236   : > { %3206 = vst [vmem:[%s3594_s17 + $0x1fe0] sm:$0xff] %v2182_v59  ;;  %3207 = vst [vmem:[%s3594_s17 + $0x1fe8] sm:$0xff] %v2183_v60  ;;  %s3465_s4 = smov [#allocation5]  }
 0x237   : > { %3208 = vst [vmem:[%s3594_s17 + $0x1ff0] sm:$0xff] %v2184_v61  ;;  %3209 = vst [vmem:[%s3594_s17 + $0x1ff8] sm:$0xff] %v2185_v63  ;;  %p3398_p13 = pnand %p3397_p11, %p5695_p12  ;;  %s3400_s5 = sshll.u32 %s3465_s4, 4  ;;  %s3401_s5 = int_to_ptr.vmem [resolvable:$false] %s3400_s5 }
 0x238   : > { %s3402_s11 = scalar_lea.vmem %s3401_s5, 262144  ;;  %p3403_p5 = scmp.lt.s32.totalorder %s5641_s2, %s3401_s5 }
 0x239   : > { %p3399_p4 = pneg %p3398_p13  ;;  %p3404_p7 = scmp.lt.s32.totalorder %s3402_s11, %s3396_s3 }
 0x23b   : > { %p3405_p8 = por %p3404_p7, %p3403_p5 }
 0x23d   : > { %p3406_p10 = pnand %p3405_p8, %p3399_p4 }
 0x23f   : > { %3409 = shalt.err (!%p3406_p10)
}
 0x240   : > { %s3410_s13 = scalar_lea.hbm %s5635_s29, 131072  ;;  %s3414_s20 = scalar_lea.hbm %s5686_s1, 262144 }
 0x241   : > { %p3411_p0 = scmp.ne.s32.totalorder %s5635_s29, %s3410_s13  ;;  %p3415_p1 = scmp.lt.s32.totalorder %s5635_s29, %s5686_s1 }
 0x242   : > { %p3416_p3 = scmp.lt.s32.totalorder %s3414_s20, %s3410_s13 }
 0x243   : > { %p3412_p2 = pnand %p3411_p0, %p5695_p12 }
 0x244   : > { %p3417_p6 = por %p3416_p3, %p3415_p1 }
 0x245   : > { %p3413_p9 = pneg %p3412_p2 }
 0x247   : > { %p3418_p11 = pnand %p3417_p6, %p3413_p9 }
 0x249   : > { %3421 = shalt.err (!%p3418_p11)
}
 0x24a   : > { %s3466_s24 = smov 2048   ;;  %s3467_s26 = smov 128  }
 0x24b   : > { %3320 = dma.vmem_to_hbm [thread:$0]  (%p5695_p12), %s5641_s2, 131072, %s5635_s29, %s3211_s10, %s3466_s24, %s3466_s24, %s3467_s26  }
 0x24c PF: > { %s3240_s30 = sand.u32 1, %s3448_s6   ;;  %p5696_p13 = scmp.ne.s32.totalorder %s5692_s19, 0 }
 0x24d   : > { %p5697_p4 = scmp.ge.s32.totalorder %s3460_s9, 2  ;;  %s3241_s17 = scalar_lea.sflag [#allocation4], %s3240_s30 }
 0x24f   : > { %p3327_p5 = pnand %p5697_p4, %p5696_p13 }
 0x251   : > { %p3328_p7 = pneg %p3327_p5 }
 0x253   : > { %3443 = dma.done.wait (%p3328_p7), %s3241_s17, 131072  }
 0x254   : > { %3445 = vsyncadd (%p3328_p7), %s3241_s17, 4294836224  ;;  %p14_p8 = scmp.ge.s32.totalorder %s3503_s12, 4   ;;  %s5698_s6 = smov %s3452_s7 }
 0x255   : > { %s5699_s7 = smov %s3456_s8  ;;  %s5700_s8 = smov %s3515_s15 }
 0x256   : > { %s5701_s9 = smov %s3503_s12  ;;  %16 = sbr.rel (!%p14_p8) target bundleno = 5 (0x5), region = 69 }
 0x25b   :  { %3246 = vsyncpa [#allocation3], 1 }
 0x25c   :  { %3248 = vsyncpa [#allocation3 + $0x1], 1 }
 0x25d   :  { %3249 = vsyncpa [#allocation4], 1 }
 0x25e   :  { %3251 = vsyncpa [#allocation4 + $0x1], 1 }

</bundles_post_ra>
